<compile_context>
chip_gen: v5e
topology: v5e:2x2
jax: 0.10.0
libtpu: 0.0.40
codegen_flags: <defaults>
</compile_context>

<pallas_src>
import math
import functools
import numpy as np

import jax
import jax.numpy as jnp
from jax.experimental import pallas as pl
from jax.experimental.pallas import tpu as pltpu

# ------------------------- static model hyper-params -------------------------
D_K = D_V    = 16        # args.aemb
N_HEADS      = 2         # args.speaker_head_num (also image_n_heads)
D_FF         = 64        # args.proj_hidden
HIDDEN       = 32        # args.h_dim  == hidden_size
N_LAYERS     = 2         # args.speaker_layer_num
FEATURE_SIZE = 64        # feature_size
OBJ_SIZE     = 48        # obj_size (kept small for the synthetic run)
N_VIEWS      = 36        # panoramic views
LN_EPS       = 1e-5
PE_MAX_LEN   = 64
OBJ_PACK     = 64        # 48 + 4 + 3 = 55 object-input features, zero-padded to 64

# MXU input precision: bf16 operands, f32 accumulation (set to jnp.float32 for
# strict f32 parity).  Element-wise math stays f32 regardless.
_MXU_DTYPE = jnp.bfloat16


# =============================== fused kernel ================================

def _fused_encoder_kernel(act_ref, feat_ref, obj_ref,
                          dw_ref, db_ref, ow_ref, ob_ref,
                          iwq_ref, iwk_ref, iwv_ref, iwo_ref,
                          oow_ref, oob_ref, pe_ref,
                          wq_ref, wk_ref, wv_ref, wo_ref, w1_ref, w2_ref,
                          enc_in_ref, enc_out_ref, attn_ref):
    """Entire TranspeakerEncoder forward for ONE batch element (grid over B)."""
    T = act_ref.shape[1]
    n_keys = feat_ref.shape[1]                 # T * N_VIEWS
    scale = 1.0 / math.sqrt(D_K)

    def mm(a, b):                              # a @ b, f32 accumulate
        return jnp.dot(a.astype(_MXU_DTYPE), b.astype(_MXU_DTYPE),
                       preferred_element_type=jnp.float32)

    def mm_bt(a, b):                           # a @ b.T, f32 accumulate
        return jax.lax.dot_general(a.astype(_MXU_DTYPE), b.astype(_MXU_DTYPE),
                                   (((1,), (1,)), ((), ())),
                                   preferred_element_type=jnp.float32)

    def layer_norm(x):                         # gamma=1, beta=0
        mu = jnp.mean(x, axis=-1, keepdims=True)
        var = jnp.mean((x - mu) ** 2, axis=-1, keepdims=True)
        return (x - mu) * jax.lax.rsqrt(var + LN_EPS)

    def softmax_rows(s):                       # stable softmax over last axis
        m = jnp.max(s, axis=-1, keepdims=True)
        e = jnp.exp(s - m)
        return e * pl.reciprocal(jnp.sum(e, axis=-1, keepdims=True), approx=True)

    act = act_ref[0]                           # (T, F)
    feat = feat_ref[0]                         # (T*36, F)
    obj = obj_ref[0]                           # (T, n_obj, OBJ_PACK)

    # ---- down_size -----------------------------------------------------------
    ctx = mm(act, dw_ref[...]) + db_ref[...]                       # (T, H)

    # ---- fused object embedding (obj_feat/ang/pos linears in one matmul) -----
    # mean over objects commutes with the linear, so reduce first (T, 64)
    obj_mean = jnp.mean(obj, axis=1)                               # (T, OBJ_PACK)
    obj_emb = mm(obj_mean, ow_ref[...]) + ob_ref[...]              # (T, H)

    # ---- image cross-attention: one query per token over its 36 views --------
    # block-diagonal mask over the flattened (T*36) key axis == T independent
    # softmaxes over 36 keys; masked scores underflow to exactly 0 probability.
    row = jax.lax.broadcasted_iota(jnp.int32, (T, n_keys), 0)
    col = jax.lax.broadcasted_iota(jnp.int32, (T, n_keys), 1)
    lo = row * N_VIEWS
    own_views = jnp.logical_and(col >= lo, col < lo + N_VIEWS)     # (T, T*36)

    img_out = jnp.zeros((T, HIDDEN), jnp.float32)
    for h in range(N_HEADS):                                       # static, no lane slicing
        qh = mm(ctx, iwq_ref[h])                                   # (T, dk)
        kh = mm(feat, iwk_ref[h])                                  # (T*36, dk)
        vh = mm(feat, iwv_ref[h])                                  # (T*36, dv)
        s = mm_bt(qh, kh) * scale                                  # (T, T*36)
        s = jnp.where(own_views, s, -1e9)
        a = softmax_rows(s)                                        # (unused map: not emitted)
        img_out = img_out + mm(mm(a, vh), iwo_ref[h])              # (T, H)
    img_out = layer_norm(img_out + ctx)                            # residual + LN

    # ---- obj_type == 'mean': concat + ob_obj_linear as a split matmul --------
    enc_in = mm(img_out, oow_ref[0]) + mm(obj_emb, oow_ref[1]) + oob_ref[...]
    enc_in_ref[0] = enc_in                                         # returned enc_inputs

    # ---- positional encoding (dropout = identity) -----------------------------
    x = enc_in + pe_ref[...]

    # ---- transformer encoder stack --------------------------------------------
    for l in range(N_LAYERS):
        attn_out = jnp.zeros((T, HIDDEN), jnp.float32)
        for h in range(N_HEADS):
            qh = mm(x, wq_ref[l, h])                               # (T, dk)
            kh = mm(x, wk_ref[l, h])                               # (T, dk)
            vh = mm(x, wv_ref[l, h])                               # (T, dv)
            s = mm_bt(qh, kh) * scale                              # (T, T)
            a = softmax_rows(s)
            if l == N_LAYERS - 1:                                  # only returned layer
                attn_ref[0, h] = a
            attn_out = attn_out + mm(mm(a, vh), wo_ref[l, h])      # (T, H)
        x = layer_norm(attn_out + x)                               # MHA residual + LN
        hdn = jnp.maximum(mm(x, w1_ref[l]), 0.0)                   # FFN
        x = layer_norm(mm(hdn, w2_ref[l]) + x)                     # FFN residual + LN

    enc_out_ref[0] = x


# ============================== pallas wrapper ================================

def _weight_spec(arr):
    nd = arr.ndim
    return pl.BlockSpec(arr.shape, lambda b, _nd=nd: (0,) * _nd)


def _batched_spec(tail_shape):
    nd = len(tail_shape)
    return pl.BlockSpec((1,) + tuple(tail_shape),
                        lambda b, _nd=nd: (b,) + (0,) * _nd)


def transpeaker_encoder_forward(packed, action_inputs, feature_inputs,
                                obj_feat, obj_ang, obj_pos):
    B, T, F = action_inputs.shape
    n_obj = obj_feat.shape[2]
    H = HIDDEN

    # pack the three object inputs along features (48+4+3=55 -> pad to 64 lanes)
    obj_in = jnp.concatenate([obj_feat, obj_ang, obj_pos], axis=-1)
    obj_in = jnp.pad(obj_in, ((0, 0), (0, 0), (0, 0),
                              (0, OBJ_PACK - obj_in.shape[-1])))
    feat2 = feature_inputs.reshape(B, T * N_VIEWS, F)
    pe = packed['pe'][:T]                                          # (T, H)

    weights = (packed['down_w'], packed['down_b'],
               packed['obj_w'], packed['obj_b'],
               packed['iwq'], packed['iwk'], packed['iwv'], packed['iwo'],
               packed['oow'], packed['oob'], pe,
               packed['wq'], packed['wk'], packed['wv'], packed['wo'],
               packed['w1'], packed['w2'])

    out_shape = (jax.ShapeDtypeStruct((B, T, H), jnp.float32),
                 jax.ShapeDtypeStruct((B, T, H), jnp.float32),
                 jax.ShapeDtypeStruct((B, N_HEADS, T, T), jnp.float32))

    enc_in, enc_out, attn = pl.pallas_call(
        _fused_encoder_kernel,
        out_shape=out_shape,
        grid=(B,),
        in_specs=[_batched_spec((T, F)),
                  _batched_spec((T * N_VIEWS, F)),
                  _batched_spec((T, n_obj, OBJ_PACK))]
                 + [_weight_spec(w) for w in weights],
        out_specs=(_batched_spec((T, H)),
                   _batched_spec((T, H)),
                   _batched_spec((N_HEADS, T, T))),
        compiler_params=pltpu.CompilerParams(
            dimension_semantics=("parallel",),        # 2-way split over v7x's 2 TCs
            vmem_limit_bytes=16 * 1024 * 1024),        # explicit; working set << 1 MiB
    )(action_inputs, feat2, obj_in, *weights)

    # matches PyTorch return (enc_inputs, enc_outputs, enc_self_attn)
    return enc_in, enc_out, attn


# ============================= parameter setup ================================

def sinusoidal_pe(max_len, d_model):
    position = np.arange(max_len, dtype=np.float32)[:, None]
    div_term = np.exp(np.arange(0, d_model, 2, dtype=np.float32)
                      * (-math.log(10000.0) / d_model))
    pe = np.zeros((max_len, d_model), dtype=np.float32)
    pe[:, 0::2] = np.sin(position * div_term)
    pe[:, 1::2] = np.cos(position * div_term)
    return jnp.asarray(pe)


def init_params(key):
    """PyTorch-layout parameters (same shapes nn.Linear would hold, transposed)."""
    def w(k, shape, scale=0.05):
        return scale * jax.random.normal(k, shape, jnp.float32)

    keys = iter(jax.random.split(key, 64))
    p = {}
    p['down_w'] = w(next(keys), (FEATURE_SIZE, HIDDEN))
    p['down_b'] = w(next(keys), (HIDDEN,))
    p['obj_feat_w'] = w(next(keys), (OBJ_SIZE, HIDDEN))
    p['obj_feat_b'] = w(next(keys), (HIDDEN,))
    p['obj_ang_w'] = w(next(keys), (4, HIDDEN))
    p['obj_ang_b'] = w(next(keys), (HIDDEN,))
    p['obj_pos_w'] = w(next(keys), (3, HIDDEN))
    p['obj_pos_b'] = w(next(keys), (HIDDEN,))
    p['ob_obj_w'] = w(next(keys), (2 * HIDDEN, HIDDEN))
    p['ob_obj_b'] = w(next(keys), (HIDDEN,))
    # image cross-attention: Q from HIDDEN, K/V from FEATURE_SIZE (bias-free)
    p['img_attn'] = (w(next(keys), (HIDDEN, N_HEADS * D_K)),
                     w(next(keys), (FEATURE_SIZE, N_HEADS * D_K)),
                     w(next(keys), (FEATURE_SIZE, N_HEADS * D_V)),
                     w(next(keys), (N_HEADS * D_V, HIDDEN)))
    p['layers'] = []
    for _ in range(N_LAYERS):
        p['layers'].append({
            'wq': w(next(keys), (HIDDEN, N_HEADS * D_K)),
            'wk': w(next(keys), (HIDDEN, N_HEADS * D_K)),
            'wv': w(next(keys), (HIDDEN, N_HEADS * D_V)),
            'wo': w(next(keys), (N_HEADS * D_V, HIDDEN)),
            'w1': w(next(keys), (HIDDEN, D_FF)),
            'w2': w(next(keys), (D_FF, HIDDEN)),
        })
    p['pe'] = sinusoidal_pe(PE_MAX_LEN, HIDDEN)
    return p


def pack_params(p):
    """Re-layout PyTorch-style weights for the fused kernel (done once)."""
    H, dk, dv, nh = HIDDEN, D_K, D_V, N_HEADS

    def split_cols(w):        # (in, nh*dk) -> (nh, in, dk)
        return jnp.stack([w[:, h * dk:(h + 1) * dk] for h in range(nh)], axis=0)

    def split_rows(w):        # (nh*dv, out) -> (nh, dv, out)
        return jnp.stack([w[h * dv:(h + 1) * dv, :] for h in range(nh)], axis=0)

    # fuse the three object-embedding linears into one (OBJ_PACK, H) matmul
    obj_w = jnp.concatenate([p['obj_feat_w'], p['obj_ang_w'], p['obj_pos_w']], axis=0)
    obj_w = jnp.pad(obj_w, ((0, OBJ_PACK - obj_w.shape[0]), (0, 0)))
    obj_b = p['obj_feat_b'] + p['obj_ang_b'] + p['obj_pos_b']

    wq_img, wk_img, wv_img, wo_img = p['img_attn']
    packed = {
        'down_w': p['down_w'],
        'down_b': p['down_b'].reshape(1, H),
        'obj_w': obj_w,
        'obj_b': obj_b.reshape(1, H),
        'iwq': split_cols(wq_img), 'iwk': split_cols(wk_img),
        'iwv': split_cols(wv_img), 'iwo': split_rows(wo_img),
        # ob_obj_linear input is concat([enc_inputs, obj_emb]) -> split its rows
        'oow': jnp.stack([p['ob_obj_w'][:H], p['ob_obj_w'][H:]], axis=0),
        'oob': p['ob_obj_b'].reshape(1, H),
        'pe': p['pe'],
        'wq': jnp.stack([split_cols(l['wq']) for l in p['layers']]),
        'wk': jnp.stack([split_cols(l['wk']) for l in p['layers']]),
        'wv': jnp.stack([split_cols(l['wv']) for l in p['layers']]),
        'wo': jnp.stack([split_rows(l['wo']) for l in p['layers']]),
        'w1': jnp.stack([l['w1'] for l in p['layers']]),
        'w2': jnp.stack([l['w2'] for l in p['layers']]),
    }
    return packed


# ==================================== main ====================================

if __name__ == "__main__":
    key = jax.random.PRNGKey(0)
    k_par, k_act, k_fea, k_of, k_oa, k_op = jax.random.split(key, 6)

    B, T, N_OBJ = 2, 4, 3
    params = init_params(k_par)
    packed = pack_params(params)

    action_inputs  = jax.random.normal(k_act, (B, T, FEATURE_SIZE), jnp.float32)
    feature_inputs = jax.random.normal(k_fea, (B, T, N_VIEWS, FEATURE_SIZE), jnp.float32)
    obj_feat       = jax.random.normal(k_of,  (B, T, N_OBJ, OBJ_SIZE), jnp.float32)
    obj_ang        = jax.random.normal(k_oa,  (B, T, N_OBJ, 4), jnp.float32)
    obj_pos        = jax.random.normal(k_op,  (B, T, N_OBJ, 3), jnp.float32)

    fwd = jax.jit(transpeaker_encoder_forward)
    enc_inputs, enc_outputs, enc_self_attn = fwd(
        packed, action_inputs, feature_inputs, obj_feat, obj_ang, obj_pos)

    jax.block_until_ready((enc_inputs, enc_outputs, enc_self_attn))
    assert enc_inputs.shape == (B, T, HIDDEN)
    assert enc_outputs.shape == (B, T, HIDDEN)
    assert enc_self_attn.shape == (B, N_HEADS, T, T)
    assert bool(jnp.all(jnp.isfinite(enc_outputs)))
    assert bool(jnp.all(jnp.isfinite(enc_self_attn)))
    print("KERNEL_OK")
</pallas_src>

<mosaic_0001>
module attributes {stable_mosaic.version = 11 : i64} {
  func.func @_fused_encoder_kernel(%arg0: i32, %arg1: memref<1x4x64xf32, #tpu.memory_space<vmem>>, %arg2: memref<1x144x64xf32, #tpu.memory_space<vmem>>, %arg3: memref<1x4x3x64xf32, #tpu.memory_space<vmem>>, %arg4: memref<64x32xf32, #tpu.memory_space<vmem>>, %arg5: memref<1x32xf32, #tpu.memory_space<vmem>>, %arg6: memref<64x32xf32, #tpu.memory_space<vmem>>, %arg7: memref<1x32xf32, #tpu.memory_space<vmem>>, %arg8: memref<2x32x16xf32, #tpu.memory_space<vmem>>, %arg9: memref<2x64x16xf32, #tpu.memory_space<vmem>>, %arg10: memref<2x64x16xf32, #tpu.memory_space<vmem>>, %arg11: memref<2x16x32xf32, #tpu.memory_space<vmem>>, %arg12: memref<2x32x32xf32, #tpu.memory_space<vmem>>, %arg13: memref<1x32xf32, #tpu.memory_space<vmem>>, %arg14: memref<4x32xf32, #tpu.memory_space<vmem>>, %arg15: memref<2x2x32x16xf32, #tpu.memory_space<vmem>>, %arg16: memref<2x2x32x16xf32, #tpu.memory_space<vmem>>, %arg17: memref<2x2x32x16xf32, #tpu.memory_space<vmem>>, %arg18: memref<2x2x16x32xf32, #tpu.memory_space<vmem>>, %arg19: memref<2x32x64xf32, #tpu.memory_space<vmem>>, %arg20: memref<2x64x32xf32, #tpu.memory_space<vmem>>, %arg21: memref<1x4x32xf32, #tpu.memory_space<vmem>>, %arg22: memref<1x4x32xf32, #tpu.memory_space<vmem>>, %arg23: memref<1x2x4x4xf32, #tpu.memory_space<vmem>>) attributes {dimension_semantics = [#tpu.dimension_semantics<parallel>], iteration_bounds = array<i64: 2>, scalar_prefetch = 0 : i64, scratch_operands = 0 : i64, tpu.core_type = #tpu.core_type<tc>, window_params = [{transform_indices = @transform_0, window_bounds = array<i64: 1, 4, 64>}, {transform_indices = @transform_1, window_bounds = array<i64: 1, 144, 64>}, {transform_indices = @transform_2, window_bounds = array<i64: 1, 4, 3, 64>}, {pipeline_mode = #tpu.pipeline_mode<synchronous>, transform_indices = @transform_3, window_bounds = array<i64: 64, 32>}, {pipeline_mode = #tpu.pipeline_mode<synchronous>, transform_indices = @transform_4, window_bounds = array<i64: 1, 32>}, {pipeline_mode = #tpu.pipeline_mode<synchronous>, transform_indices = @transform_5, window_bounds = array<i64: 64, 32>}, {pipeline_mode = #tpu.pipeline_mode<synchronous>, transform_indices = @transform_6, window_bounds = array<i64: 1, 32>}, {pipeline_mode = #tpu.pipeline_mode<synchronous>, transform_indices = @transform_7, window_bounds = array<i64: 2, 32, 16>}, {pipeline_mode = #tpu.pipeline_mode<synchronous>, transform_indices = @transform_8, window_bounds = array<i64: 2, 64, 16>}, {pipeline_mode = #tpu.pipeline_mode<synchronous>, transform_indices = @transform_9, window_bounds = array<i64: 2, 64, 16>}, {pipeline_mode = #tpu.pipeline_mode<synchronous>, transform_indices = @transform_10, window_bounds = array<i64: 2, 16, 32>}, {pipeline_mode = #tpu.pipeline_mode<synchronous>, transform_indices = @transform_11, window_bounds = array<i64: 2, 32, 32>}, {pipeline_mode = #tpu.pipeline_mode<synchronous>, transform_indices = @transform_12, window_bounds = array<i64: 1, 32>}, {pipeline_mode = #tpu.pipeline_mode<synchronous>, transform_indices = @transform_13, window_bounds = array<i64: 4, 32>}, {pipeline_mode = #tpu.pipeline_mode<synchronous>, transform_indices = @transform_14, window_bounds = array<i64: 2, 2, 32, 16>}, {pipeline_mode = #tpu.pipeline_mode<synchronous>, transform_indices = @transform_15, window_bounds = array<i64: 2, 2, 32, 16>}, {pipeline_mode = #tpu.pipeline_mode<synchronous>, transform_indices = @transform_16, window_bounds = array<i64: 2, 2, 32, 16>}, {pipeline_mode = #tpu.pipeline_mode<synchronous>, transform_indices = @transform_17, window_bounds = array<i64: 2, 2, 16, 32>}, {pipeline_mode = #tpu.pipeline_mode<synchronous>, transform_indices = @transform_18, window_bounds = array<i64: 2, 32, 64>}, {pipeline_mode = #tpu.pipeline_mode<synchronous>, transform_indices = @transform_19, window_bounds = array<i64: 2, 64, 32>}, {transform_indices = @transform_20, window_bounds = array<i64: 1, 4, 32>}, {transform_indices = @transform_21, window_bounds = array<i64: 1, 4, 32>}, {transform_indices = @transform_22, window_bounds = array<i64: 1, 2, 4, 4>}]} {
    %c0 = arith.constant 0 : index
    %c0_0 = arith.constant 0 : index
    %c0_1 = arith.constant 0 : index
    %0 = vector.load %arg1[%c0, %c0_0, %c0_1] : memref<1x4x64xf32, #tpu.memory_space<vmem>>, vector<1x4x64xf32>
    %1 = vector.shape_cast %0 : vector<1x4x64xf32> to vector<4x64xf32>
    %c0_2 = arith.constant 0 : index
    %c0_3 = arith.constant 0 : index
    %c0_4 = arith.constant 0 : index
    %2 = vector.load %arg2[%c0_2, %c0_3, %c0_4] : memref<1x144x64xf32, #tpu.memory_space<vmem>>, vector<1x144x64xf32>
    %3 = vector.shape_cast %2 : vector<1x144x64xf32> to vector<144x64xf32>
    %c0_5 = arith.constant 0 : index
    %c0_6 = arith.constant 0 : index
    %c0_7 = arith.constant 0 : index
    %c0_8 = arith.constant 0 : index
    %4 = vector.load %arg3[%c0_5, %c0_6, %c0_7, %c0_8] : memref<1x4x3x64xf32, #tpu.memory_space<vmem>>, vector<1x4x3x64xf32>
    %5 = vector.shape_cast %4 : vector<1x4x3x64xf32> to vector<4x3x64xf32>
    %c0_9 = arith.constant 0 : index
    %c0_10 = arith.constant 0 : index
    %6 = vector.load %arg4[%c0_9, %c0_10] : memref<64x32xf32, #tpu.memory_space<vmem>>, vector<64x32xf32>
    %7 = arith.truncf %1 : vector<4x64xf32> to vector<4x64xbf16>
    %8 = arith.truncf %6 : vector<64x32xf32> to vector<64x32xbf16>
    %cst = arith.constant dense<0.000000e+00> : vector<4x32xf32>
    %9 = tpu.matmul %7, %8, %cst {dimension_numbers = #tpu.dot_dimension_numbers<[1], [0], [0], [1], [0, 0, 1, 1], [], []>} : vector<4x64xbf16>, vector<64x32xbf16>, vector<4x32xf32> -> vector<4x32xf32>
    %c0_11 = arith.constant 0 : index
    %c0_12 = arith.constant 0 : index
    %10 = vector.load %arg5[%c0_11, %c0_12] : memref<1x32xf32, #tpu.memory_space<vmem>>, vector<1x32xf32>
    %11 = vector.broadcast %10 : vector<1x32xf32> to vector<4x32xf32>
    %12 = arith.addf %9, %11 : vector<4x32xf32>
    %cst_13 = arith.constant dense<0.000000e+00> : vector<4x64xf32>
    %13 = vector.multi_reduction <add>, %5, %cst_13 [1] : vector<4x3x64xf32> to vector<4x64xf32>
    %cst_14 = arith.constant 3.000000e+00 : f32
    %14 = vector.broadcast %cst_14 : f32 to vector<4x64xf32>
    %15 = arith.divf %13, %14 : vector<4x64xf32>
    %c0_15 = arith.constant 0 : index
    %c0_16 = arith.constant 0 : index
    %16 = vector.load %arg6[%c0_15, %c0_16] : memref<64x32xf32, #tpu.memory_space<vmem>>, vector<64x32xf32>
    %17 = arith.truncf %15 : vector<4x64xf32> to vector<4x64xbf16>
    %18 = arith.truncf %16 : vector<64x32xf32> to vector<64x32xbf16>
    %cst_17 = arith.constant dense<0.000000e+00> : vector<4x32xf32>
    %19 = tpu.matmul %17, %18, %cst_17 {dimension_numbers = #tpu.dot_dimension_numbers<[1], [0], [0], [1], [0, 0, 1, 1], [], []>} : vector<4x64xbf16>, vector<64x32xbf16>, vector<4x32xf32> -> vector<4x32xf32>
    %c0_18 = arith.constant 0 : index
    %c0_19 = arith.constant 0 : index
    %20 = vector.load %arg7[%c0_18, %c0_19] : memref<1x32xf32, #tpu.memory_space<vmem>>, vector<1x32xf32>
    %21 = vector.broadcast %20 : vector<1x32xf32> to vector<4x32xf32>
    %22 = arith.addf %19, %21 : vector<4x32xf32>
    %23 = tpu.iota {dimensions = array<i32: 0>} : vector<4x144xi32>
    %24 = tpu.iota {dimensions = array<i32: 1>} : vector<4x144xi32>
    %c36_i32 = arith.constant 36 : i32
    %25 = vector.broadcast %c36_i32 : i32 to vector<4x144xi32>
    %26 = arith.muli %23, %25 : vector<4x144xi32>
    %27 = arith.cmpi sge, %24, %26 : vector<4x144xi32>
    %c36_i32_20 = arith.constant 36 : i32
    %28 = vector.broadcast %c36_i32_20 : i32 to vector<4x144xi32>
    %29 = arith.addi %26, %28 : vector<4x144xi32>
    %30 = arith.cmpi slt, %24, %29 : vector<4x144xi32>
    %31 = arith.andi %27, %30 : vector<4x144xi1>
    %cst_21 = arith.constant 0.000000e+00 : f32
    %32 = vector.broadcast %cst_21 : f32 to vector<4x32xf32>
    %c0_22 = arith.constant 0 : index
    %c0_23 = arith.constant 0 : index
    %c0_24 = arith.constant 0 : index
    %33 = vector.load %arg8[%c0_22, %c0_23, %c0_24] : memref<2x32x16xf32, #tpu.memory_space<vmem>>, vector<1x32x16xf32>
    %34 = vector.shape_cast %33 : vector<1x32x16xf32> to vector<32x16xf32>
    %35 = arith.truncf %12 : vector<4x32xf32> to vector<4x32xbf16>
    %36 = arith.truncf %34 : vector<32x16xf32> to vector<32x16xbf16>
    %cst_25 = arith.constant dense<0.000000e+00> : vector<4x16xf32>
    %37 = tpu.matmul %35, %36, %cst_25 {dimension_numbers = #tpu.dot_dimension_numbers<[1], [0], [0], [1], [0, 0, 1, 1], [], []>} : vector<4x32xbf16>, vector<32x16xbf16>, vector<4x16xf32> -> vector<4x16xf32>
    %c0_26 = arith.constant 0 : index
    %c0_27 = arith.constant 0 : index
    %c0_28 = arith.constant 0 : index
    %38 = vector.load %arg9[%c0_26, %c0_27, %c0_28] : memref<2x64x16xf32, #tpu.memory_space<vmem>>, vector<1x64x16xf32>
    %39 = vector.shape_cast %38 : vector<1x64x16xf32> to vector<64x16xf32>
    %40 = arith.truncf %3 : vector<144x64xf32> to vector<144x64xbf16>
    %41 = arith.truncf %39 : vector<64x16xf32> to vector<64x16xbf16>
    %cst_29 = arith.constant dense<0.000000e+00> : vector<144x16xf32>
    %42 = tpu.matmul %40, %41, %cst_29 {dimension_numbers = #tpu.dot_dimension_numbers<[1], [0], [0], [1], [0, 0, 1, 1], [], []>} : vector<144x64xbf16>, vector<64x16xbf16>, vector<144x16xf32> -> vector<144x16xf32>
    %c0_30 = arith.constant 0 : index
    %c0_31 = arith.constant 0 : index
    %c0_32 = arith.constant 0 : index
    %43 = vector.load %arg10[%c0_30, %c0_31, %c0_32] : memref<2x64x16xf32, #tpu.memory_space<vmem>>, vector<1x64x16xf32>
    %44 = vector.shape_cast %43 : vector<1x64x16xf32> to vector<64x16xf32>
    %45 = arith.truncf %3 : vector<144x64xf32> to vector<144x64xbf16>
    %46 = arith.truncf %44 : vector<64x16xf32> to vector<64x16xbf16>
    %cst_33 = arith.constant dense<0.000000e+00> : vector<144x16xf32>
    %47 = tpu.matmul %45, %46, %cst_33 {dimension_numbers = #tpu.dot_dimension_numbers<[1], [0], [0], [1], [0, 0, 1, 1], [], []>} : vector<144x64xbf16>, vector<64x16xbf16>, vector<144x16xf32> -> vector<144x16xf32>
    %48 = arith.truncf %37 : vector<4x16xf32> to vector<4x16xbf16>
    %49 = arith.truncf %42 : vector<144x16xf32> to vector<144x16xbf16>
    %cst_34 = arith.constant dense<0.000000e+00> : vector<4x144xf32>
    %50 = tpu.matmul %48, %49, %cst_34 {dimension_numbers = #tpu.dot_dimension_numbers<[1], [1], [0], [0], [0, 0, 1, 0], [], []>} : vector<4x16xbf16>, vector<144x16xbf16>, vector<4x144xf32> -> vector<4x144xf32>
    %cst_35 = arith.constant 2.500000e-01 : f32
    %51 = vector.broadcast %cst_35 : f32 to vector<4x144xf32>
    %52 = arith.mulf %50, %51 : vector<4x144xf32>
    %cst_36 = arith.constant -1.000000e+09 : f32
    %53 = vector.broadcast %cst_36 : f32 to vector<4x144xf32>
    %54 = arith.select %31, %52, %53 : vector<4x144xi1>, vector<4x144xf32>
    %cst_37 = arith.constant dense<0xFF800000> : vector<4xf32>
    %55 = vector.multi_reduction <maximumf>, %54, %cst_37 [1] : vector<4x144xf32> to vector<4xf32>
    %56 = vector.shape_cast %55 : vector<4xf32> to vector<4x1xf32>
    %57 = vector.broadcast %56 : vector<4x1xf32> to vector<4x144xf32>
    %58 = arith.subf %54, %57 : vector<4x144xf32>
    %59 = math.exp %58 : vector<4x144xf32>
    %cst_38 = arith.constant dense<0.000000e+00> : vector<4xf32>
    %60 = vector.multi_reduction <add>, %59, %cst_38 [1] : vector<4x144xf32> to vector<4xf32>
    %61 = vector.shape_cast %60 : vector<4xf32> to vector<4x1xf32>
    %62 = tpu.reciprocal %61 {approx = true} : vector<4x1xf32> -> vector<4x1xf32>
    %63 = vector.broadcast %62 : vector<4x1xf32> to vector<4x144xf32>
    %64 = arith.mulf %59, %63 : vector<4x144xf32>
    %65 = arith.truncf %64 : vector<4x144xf32> to vector<4x144xbf16>
    %66 = arith.truncf %47 : vector<144x16xf32> to vector<144x16xbf16>
    %cst_39 = arith.constant dense<0.000000e+00> : vector<4x16xf32>
    %67 = tpu.matmul %65, %66, %cst_39 {dimension_numbers = #tpu.dot_dimension_numbers<[1], [0], [0], [1], [0, 0, 1, 1], [], []>} : vector<4x144xbf16>, vector<144x16xbf16>, vector<4x16xf32> -> vector<4x16xf32>
    %c0_40 = arith.constant 0 : index
    %c0_41 = arith.constant 0 : index
    %c0_42 = arith.constant 0 : index
    %68 = vector.load %arg11[%c0_40, %c0_41, %c0_42] : memref<2x16x32xf32, #tpu.memory_space<vmem>>, vector<1x16x32xf32>
    %69 = vector.shape_cast %68 : vector<1x16x32xf32> to vector<16x32xf32>
    %70 = arith.truncf %67 : vector<4x16xf32> to vector<4x16xbf16>
    %71 = arith.truncf %69 : vector<16x32xf32> to vector<16x32xbf16>
    %cst_43 = arith.constant dense<0.000000e+00> : vector<4x32xf32>
    %72 = tpu.matmul %70, %71, %cst_43 {dimension_numbers = #tpu.dot_dimension_numbers<[1], [0], [0], [1], [0, 0, 1, 1], [], []>} : vector<4x16xbf16>, vector<16x32xbf16>, vector<4x32xf32> -> vector<4x32xf32>
    %73 = arith.addf %32, %72 : vector<4x32xf32>
    %c1 = arith.constant 1 : index
    %c0_44 = arith.constant 0 : index
    %c0_45 = arith.constant 0 : index
    %74 = vector.load %arg8[%c1, %c0_44, %c0_45] : memref<2x32x16xf32, #tpu.memory_space<vmem>>, vector<1x32x16xf32>
    %75 = vector.shape_cast %74 : vector<1x32x16xf32> to vector<32x16xf32>
    %76 = arith.truncf %12 : vector<4x32xf32> to vector<4x32xbf16>
    %77 = arith.truncf %75 : vector<32x16xf32> to vector<32x16xbf16>
    %cst_46 = arith.constant dense<0.000000e+00> : vector<4x16xf32>
    %78 = tpu.matmul %76, %77, %cst_46 {dimension_numbers = #tpu.dot_dimension_numbers<[1], [0], [0], [1], [0, 0, 1, 1], [], []>} : vector<4x32xbf16>, vector<32x16xbf16>, vector<4x16xf32> -> vector<4x16xf32>
    %c1_47 = arith.constant 1 : index
    %c0_48 = arith.constant 0 : index
    %c0_49 = arith.constant 0 : index
    %79 = vector.load %arg9[%c1_47, %c0_48, %c0_49] : memref<2x64x16xf32, #tpu.memory_space<vmem>>, vector<1x64x16xf32>
    %80 = vector.shape_cast %79 : vector<1x64x16xf32> to vector<64x16xf32>
    %81 = arith.truncf %3 : vector<144x64xf32> to vector<144x64xbf16>
    %82 = arith.truncf %80 : vector<64x16xf32> to vector<64x16xbf16>
    %cst_50 = arith.constant dense<0.000000e+00> : vector<144x16xf32>
    %83 = tpu.matmul %81, %82, %cst_50 {dimension_numbers = #tpu.dot_dimension_numbers<[1], [0], [0], [1], [0, 0, 1, 1], [], []>} : vector<144x64xbf16>, vector<64x16xbf16>, vector<144x16xf32> -> vector<144x16xf32>
    %c1_51 = arith.constant 1 : index
    %c0_52 = arith.constant 0 : index
    %c0_53 = arith.constant 0 : index
    %84 = vector.load %arg10[%c1_51, %c0_52, %c0_53] : memref<2x64x16xf32, #tpu.memory_space<vmem>>, vector<1x64x16xf32>
    %85 = vector.shape_cast %84 : vector<1x64x16xf32> to vector<64x16xf32>
    %86 = arith.truncf %3 : vector<144x64xf32> to vector<144x64xbf16>
    %87 = arith.truncf %85 : vector<64x16xf32> to vector<64x16xbf16>
    %cst_54 = arith.constant dense<0.000000e+00> : vector<144x16xf32>
    %88 = tpu.matmul %86, %87, %cst_54 {dimension_numbers = #tpu.dot_dimension_numbers<[1], [0], [0], [1], [0, 0, 1, 1], [], []>} : vector<144x64xbf16>, vector<64x16xbf16>, vector<144x16xf32> -> vector<144x16xf32>
    %89 = arith.truncf %78 : vector<4x16xf32> to vector<4x16xbf16>
    %90 = arith.truncf %83 : vector<144x16xf32> to vector<144x16xbf16>
    %cst_55 = arith.constant dense<0.000000e+00> : vector<4x144xf32>
    %91 = tpu.matmul %89, %90, %cst_55 {dimension_numbers = #tpu.dot_dimension_numbers<[1], [1], [0], [0], [0, 0, 1, 0], [], []>} : vector<4x16xbf16>, vector<144x16xbf16>, vector<4x144xf32> -> vector<4x144xf32>
    %cst_56 = arith.constant 2.500000e-01 : f32
    %92 = vector.broadcast %cst_56 : f32 to vector<4x144xf32>
    %93 = arith.mulf %91, %92 : vector<4x144xf32>
    %cst_57 = arith.constant -1.000000e+09 : f32
    %94 = vector.broadcast %cst_57 : f32 to vector<4x144xf32>
    %95 = arith.select %31, %93, %94 : vector<4x144xi1>, vector<4x144xf32>
    %cst_58 = arith.constant dense<0xFF800000> : vector<4xf32>
    %96 = vector.multi_reduction <maximumf>, %95, %cst_58 [1] : vector<4x144xf32> to vector<4xf32>
    %97 = vector.shape_cast %96 : vector<4xf32> to vector<4x1xf32>
    %98 = vector.broadcast %97 : vector<4x1xf32> to vector<4x144xf32>
    %99 = arith.subf %95, %98 : vector<4x144xf32>
    %100 = math.exp %99 : vector<4x144xf32>
    %cst_59 = arith.constant dense<0.000000e+00> : vector<4xf32>
    %101 = vector.multi_reduction <add>, %100, %cst_59 [1] : vector<4x144xf32> to vector<4xf32>
    %102 = vector.shape_cast %101 : vector<4xf32> to vector<4x1xf32>
    %103 = tpu.reciprocal %102 {approx = true} : vector<4x1xf32> -> vector<4x1xf32>
    %104 = vector.broadcast %103 : vector<4x1xf32> to vector<4x144xf32>
    %105 = arith.mulf %100, %104 : vector<4x144xf32>
    %106 = arith.truncf %105 : vector<4x144xf32> to vector<4x144xbf16>
    %107 = arith.truncf %88 : vector<144x16xf32> to vector<144x16xbf16>
    %cst_60 = arith.constant dense<0.000000e+00> : vector<4x16xf32>
    %108 = tpu.matmul %106, %107, %cst_60 {dimension_numbers = #tpu.dot_dimension_numbers<[1], [0], [0], [1], [0, 0, 1, 1], [], []>} : vector<4x144xbf16>, vector<144x16xbf16>, vector<4x16xf32> -> vector<4x16xf32>
    %c1_61 = arith.constant 1 : index
    %c0_62 = arith.constant 0 : index
    %c0_63 = arith.constant 0 : index
    %109 = vector.load %arg11[%c1_61, %c0_62, %c0_63] : memref<2x16x32xf32, #tpu.memory_space<vmem>>, vector<1x16x32xf32>
    %110 = vector.shape_cast %109 : vector<1x16x32xf32> to vector<16x32xf32>
    %111 = arith.truncf %108 : vector<4x16xf32> to vector<4x16xbf16>
    %112 = arith.truncf %110 : vector<16x32xf32> to vector<16x32xbf16>
    %cst_64 = arith.constant dense<0.000000e+00> : vector<4x32xf32>
    %113 = tpu.matmul %111, %112, %cst_64 {dimension_numbers = #tpu.dot_dimension_numbers<[1], [0], [0], [1], [0, 0, 1, 1], [], []>} : vector<4x16xbf16>, vector<16x32xbf16>, vector<4x32xf32> -> vector<4x32xf32>
    %114 = arith.addf %73, %113 : vector<4x32xf32>
    %115 = arith.addf %114, %12 : vector<4x32xf32>
    %cst_65 = arith.constant dense<0.000000e+00> : vector<4xf32>
    %116 = vector.multi_reduction <add>, %115, %cst_65 [1] : vector<4x32xf32> to vector<4xf32>
    %117 = vector.shape_cast %116 : vector<4xf32> to vector<4x1xf32>
    %cst_66 = arith.constant 3.200000e+01 : f32
    %118 = vector.broadcast %cst_66 : f32 to vector<4x1xf32>
    %119 = arith.divf %117, %118 : vector<4x1xf32>
    %120 = vector.broadcast %119 : vector<4x1xf32> to vector<4x32xf32>
    %121 = arith.subf %115, %120 : vector<4x32xf32>
    %122 = arith.mulf %121, %121 : vector<4x32xf32>
    %cst_67 = arith.constant dense<0.000000e+00> : vector<4xf32>
    %123 = vector.multi_reduction <add>, %122, %cst_67 [1] : vector<4x32xf32> to vector<4xf32>
    %124 = vector.shape_cast %123 : vector<4xf32> to vector<4x1xf32>
    %cst_68 = arith.constant 3.200000e+01 : f32
    %125 = vector.broadcast %cst_68 : f32 to vector<4x1xf32>
    %126 = arith.divf %124, %125 : vector<4x1xf32>
    %127 = vector.broadcast %119 : vector<4x1xf32> to vector<4x32xf32>
    %128 = arith.subf %115, %127 : vector<4x32xf32>
    %cst_69 = arith.constant 9.99999974E-6 : f32
    %129 = vector.broadcast %cst_69 : f32 to vector<4x1xf32>
    %130 = arith.addf %126, %129 : vector<4x1xf32>
    %131 = math.rsqrt %130 : vector<4x1xf32>
    %132 = vector.broadcast %131 : vector<4x1xf32> to vector<4x32xf32>
    %133 = arith.mulf %128, %132 : vector<4x32xf32>
    %c0_70 = arith.constant 0 : index
    %c0_71 = arith.constant 0 : index
    %c0_72 = arith.constant 0 : index
    %134 = vector.load %arg12[%c0_70, %c0_71, %c0_72] : memref<2x32x32xf32, #tpu.memory_space<vmem>>, vector<1x32x32xf32>
    %135 = vector.shape_cast %134 : vector<1x32x32xf32> to vector<32x32xf32>
    %136 = arith.truncf %133 : vector<4x32xf32> to vector<4x32xbf16>
    %137 = arith.truncf %135 : vector<32x32xf32> to vector<32x32xbf16>
    %cst_73 = arith.constant dense<0.000000e+00> : vector<4x32xf32>
    %138 = tpu.matmul %136, %137, %cst_73 {dimension_numbers = #tpu.dot_dimension_numbers<[1], [0], [0], [1], [0, 0, 1, 1], [], []>} : vector<4x32xbf16>, vector<32x32xbf16>, vector<4x32xf32> -> vector<4x32xf32>
    %c1_74 = arith.constant 1 : index
    %c0_75 = arith.constant 0 : index
    %c0_76 = arith.constant 0 : index
    %139 = vector.load %arg12[%c1_74, %c0_75, %c0_76] : memref<2x32x32xf32, #tpu.memory_space<vmem>>, vector<1x32x32xf32>
    %140 = vector.shape_cast %139 : vector<1x32x32xf32> to vector<32x32xf32>
    %141 = arith.truncf %22 : vector<4x32xf32> to vector<4x32xbf16>
    %142 = arith.truncf %140 : vector<32x32xf32> to vector<32x32xbf16>
    %cst_77 = arith.constant dense<0.000000e+00> : vector<4x32xf32>
    %143 = tpu.matmul %141, %142, %cst_77 {dimension_numbers = #tpu.dot_dimension_numbers<[1], [0], [0], [1], [0, 0, 1, 1], [], []>} : vector<4x32xbf16>, vector<32x32xbf16>, vector<4x32xf32> -> vector<4x32xf32>
    %144 = arith.addf %138, %143 : vector<4x32xf32>
    %c0_78 = arith.constant 0 : index
    %c0_79 = arith.constant 0 : index
    %145 = vector.load %arg13[%c0_78, %c0_79] : memref<1x32xf32, #tpu.memory_space<vmem>>, vector<1x32xf32>
    %146 = vector.broadcast %145 : vector<1x32xf32> to vector<4x32xf32>
    %147 = arith.addf %144, %146 : vector<4x32xf32>
    %c0_80 = arith.constant 0 : index
    %c0_81 = arith.constant 0 : index
    %c0_82 = arith.constant 0 : index
    %148 = vector.load %arg21[%c0_80, %c0_81, %c0_82] : memref<1x4x32xf32, #tpu.memory_space<vmem>>, vector<1x4x32xf32>
    %149 = vector.shape_cast %148 : vector<1x4x32xf32> to vector<4x32xf32>
    %150 = vector.shape_cast %147 : vector<4x32xf32> to vector<1x4x32xf32>
    tpu.vector_store %arg21[%c0_80, %c0_81, %c0_82], %150 {strides = array<i32>} : memref<1x4x32xf32, #tpu.memory_space<vmem>>, vector<1x4x32xf32>,
    %c0_83 = arith.constant 0 : index
    %c0_84 = arith.constant 0 : index
    %151 = vector.load %arg14[%c0_83, %c0_84] : memref<4x32xf32, #tpu.memory_space<vmem>>, vector<4x32xf32>
    %152 = arith.addf %147, %151 : vector<4x32xf32>
    %cst_85 = arith.constant 0.000000e+00 : f32
    %153 = vector.broadcast %cst_85 : f32 to vector<4x32xf32>
    %c0_86 = arith.constant 0 : index
    %c0_87 = arith.constant 0 : index
    %c0_88 = arith.constant 0 : index
    %c0_89 = arith.constant 0 : index
    %154 = vector.load %arg15[%c0_86, %c0_87, %c0_88, %c0_89] : memref<2x2x32x16xf32, #tpu.memory_space<vmem>>, vector<1x1x32x16xf32>
    %155 = vector.shape_cast %154 : vector<1x1x32x16xf32> to vector<32x16xf32>
    %156 = arith.truncf %152 : vector<4x32xf32> to vector<4x32xbf16>
    %157 = arith.truncf %155 : vector<32x16xf32> to vector<32x16xbf16>
    %cst_90 = arith.constant dense<0.000000e+00> : vector<4x16xf32>
    %158 = tpu.matmul %156, %157, %cst_90 {dimension_numbers = #tpu.dot_dimension_numbers<[1], [0], [0], [1], [0, 0, 1, 1], [], []>} : vector<4x32xbf16>, vector<32x16xbf16>, vector<4x16xf32> -> vector<4x16xf32>
    %c0_91 = arith.constant 0 : index
    %c0_92 = arith.constant 0 : index
    %c0_93 = arith.constant 0 : index
    %c0_94 = arith.constant 0 : index
    %159 = vector.load %arg16[%c0_91, %c0_92, %c0_93, %c0_94] : memref<2x2x32x16xf32, #tpu.memory_space<vmem>>, vector<1x1x32x16xf32>
    %160 = vector.shape_cast %159 : vector<1x1x32x16xf32> to vector<32x16xf32>
    %161 = arith.truncf %152 : vector<4x32xf32> to vector<4x32xbf16>
    %162 = arith.truncf %160 : vector<32x16xf32> to vector<32x16xbf16>
    %cst_95 = arith.constant dense<0.000000e+00> : vector<4x16xf32>
    %163 = tpu.matmul %161, %162, %cst_95 {dimension_numbers = #tpu.dot_dimension_numbers<[1], [0], [0], [1], [0, 0, 1, 1], [], []>} : vector<4x32xbf16>, vector<32x16xbf16>, vector<4x16xf32> -> vector<4x16xf32>
    %c0_96 = arith.constant 0 : index
    %c0_97 = arith.constant 0 : index
    %c0_98 = arith.constant 0 : index
    %c0_99 = arith.constant 0 : index
    %164 = vector.load %arg17[%c0_96, %c0_97, %c0_98, %c0_99] : memref<2x2x32x16xf32, #tpu.memory_space<vmem>>, vector<1x1x32x16xf32>
    %165 = vector.shape_cast %164 : vector<1x1x32x16xf32> to vector<32x16xf32>
    %166 = arith.truncf %152 : vector<4x32xf32> to vector<4x32xbf16>
    %167 = arith.truncf %165 : vector<32x16xf32> to vector<32x16xbf16>
    %cst_100 = arith.constant dense<0.000000e+00> : vector<4x16xf32>
    %168 = tpu.matmul %166, %167, %cst_100 {dimension_numbers = #tpu.dot_dimension_numbers<[1], [0], [0], [1], [0, 0, 1, 1], [], []>} : vector<4x32xbf16>, vector<32x16xbf16>, vector<4x16xf32> -> vector<4x16xf32>
    %169 = arith.truncf %158 : vector<4x16xf32> to vector<4x16xbf16>
    %170 = arith.truncf %163 : vector<4x16xf32> to vector<4x16xbf16>
    %cst_101 = arith.constant dense<0.000000e+00> : vector<4x4xf32>
    %171 = tpu.matmul %169, %170, %cst_101 {dimension_numbers = #tpu.dot_dimension_numbers<[1], [1], [0], [0], [0, 0, 1, 0], [], []>} : vector<4x16xbf16>, vector<4x16xbf16>, vector<4x4xf32> -> vector<4x4xf32>
    %cst_102 = arith.constant 2.500000e-01 : f32
    %172 = vector.broadcast %cst_102 : f32 to vector<4x4xf32>
    %173 = arith.mulf %171, %172 : vector<4x4xf32>
    %cst_103 = arith.constant dense<0xFF800000> : vector<4xf32>
    %174 = vector.multi_reduction <maximumf>, %173, %cst_103 [1] : vector<4x4xf32> to vector<4xf32>
    %175 = vector.shape_cast %174 : vector<4xf32> to vector<4x1xf32>
    %176 = vector.broadcast %175 : vector<4x1xf32> to vector<4x4xf32>
    %177 = arith.subf %173, %176 : vector<4x4xf32>
    %178 = math.exp %177 : vector<4x4xf32>
    %cst_104 = arith.constant dense<0.000000e+00> : vector<4xf32>
    %179 = vector.multi_reduction <add>, %178, %cst_104 [1] : vector<4x4xf32> to vector<4xf32>
    %180 = vector.shape_cast %179 : vector<4xf32> to vector<4x1xf32>
    %181 = tpu.reciprocal %180 {approx = true} : vector<4x1xf32> -> vector<4x1xf32>
    %182 = vector.broadcast %181 : vector<4x1xf32> to vector<4x4xf32>
    %183 = arith.mulf %178, %182 : vector<4x4xf32>
    %184 = arith.truncf %183 : vector<4x4xf32> to vector<4x4xbf16>
    %185 = arith.truncf %168 : vector<4x16xf32> to vector<4x16xbf16>
    %cst_105 = arith.constant dense<0.000000e+00> : vector<4x16xf32>
    %186 = tpu.matmul %184, %185, %cst_105 {dimension_numbers = #tpu.dot_dimension_numbers<[1], [0], [0], [1], [0, 0, 1, 1], [], []>} : vector<4x4xbf16>, vector<4x16xbf16>, vector<4x16xf32> -> vector<4x16xf32>
    %c0_106 = arith.constant 0 : index
    %c0_107 = arith.constant 0 : index
    %c0_108 = arith.constant 0 : index
    %c0_109 = arith.constant 0 : index
    %187 = vector.load %arg18[%c0_106, %c0_107, %c0_108, %c0_109] : memref<2x2x16x32xf32, #tpu.memory_space<vmem>>, vector<1x1x16x32xf32>
    %188 = vector.shape_cast %187 : vector<1x1x16x32xf32> to vector<16x32xf32>
    %189 = arith.truncf %186 : vector<4x16xf32> to vector<4x16xbf16>
    %190 = arith.truncf %188 : vector<16x32xf32> to vector<16x32xbf16>
    %cst_110 = arith.constant dense<0.000000e+00> : vector<4x32xf32>
    %191 = tpu.matmul %189, %190, %cst_110 {dimension_numbers = #tpu.dot_dimension_numbers<[1], [0], [0], [1], [0, 0, 1, 1], [], []>} : vector<4x16xbf16>, vector<16x32xbf16>, vector<4x32xf32> -> vector<4x32xf32>
    %192 = arith.addf %153, %191 : vector<4x32xf32>
    %c0_111 = arith.constant 0 : index
    %c1_112 = arith.constant 1 : index
    %c0_113 = arith.constant 0 : index
    %c0_114 = arith.constant 0 : index
    %193 = vector.load %arg15[%c0_111, %c1_112, %c0_113, %c0_114] : memref<2x2x32x16xf32, #tpu.memory_space<vmem>>, vector<1x1x32x16xf32>
    %194 = vector.shape_cast %193 : vector<1x1x32x16xf32> to vector<32x16xf32>
    %195 = arith.truncf %152 : vector<4x32xf32> to vector<4x32xbf16>
    %196 = arith.truncf %194 : vector<32x16xf32> to vector<32x16xbf16>
    %cst_115 = arith.constant dense<0.000000e+00> : vector<4x16xf32>
    %197 = tpu.matmul %195, %196, %cst_115 {dimension_numbers = #tpu.dot_dimension_numbers<[1], [0], [0], [1], [0, 0, 1, 1], [], []>} : vector<4x32xbf16>, vector<32x16xbf16>, vector<4x16xf32> -> vector<4x16xf32>
    %c0_116 = arith.constant 0 : index
    %c1_117 = arith.constant 1 : index
    %c0_118 = arith.constant 0 : index
    %c0_119 = arith.constant 0 : index
    %198 = vector.load %arg16[%c0_116, %c1_117, %c0_118, %c0_119] : memref<2x2x32x16xf32, #tpu.memory_space<vmem>>, vector<1x1x32x16xf32>
    %199 = vector.shape_cast %198 : vector<1x1x32x16xf32> to vector<32x16xf32>
    %200 = arith.truncf %152 : vector<4x32xf32> to vector<4x32xbf16>
    %201 = arith.truncf %199 : vector<32x16xf32> to vector<32x16xbf16>
    %cst_120 = arith.constant dense<0.000000e+00> : vector<4x16xf32>
    %202 = tpu.matmul %200, %201, %cst_120 {dimension_numbers = #tpu.dot_dimension_numbers<[1], [0], [0], [1], [0, 0, 1, 1], [], []>} : vector<4x32xbf16>, vector<32x16xbf16>, vector<4x16xf32> -> vector<4x16xf32>
    %c0_121 = arith.constant 0 : index
    %c1_122 = arith.constant 1 : index
    %c0_123 = arith.constant 0 : index
    %c0_124 = arith.constant 0 : index
    %203 = vector.load %arg17[%c0_121, %c1_122, %c0_123, %c0_124] : memref<2x2x32x16xf32, #tpu.memory_space<vmem>>, vector<1x1x32x16xf32>
    %204 = vector.shape_cast %203 : vector<1x1x32x16xf32> to vector<32x16xf32>
    %205 = arith.truncf %152 : vector<4x32xf32> to vector<4x32xbf16>
    %206 = arith.truncf %204 : vector<32x16xf32> to vector<32x16xbf16>
    %cst_125 = arith.constant dense<0.000000e+00> : vector<4x16xf32>
    %207 = tpu.matmul %205, %206, %cst_125 {dimension_numbers = #tpu.dot_dimension_numbers<[1], [0], [0], [1], [0, 0, 1, 1], [], []>} : vector<4x32xbf16>, vector<32x16xbf16>, vector<4x16xf32> -> vector<4x16xf32>
    %208 = arith.truncf %197 : vector<4x16xf32> to vector<4x16xbf16>
    %209 = arith.truncf %202 : vector<4x16xf32> to vector<4x16xbf16>
    %cst_126 = arith.constant dense<0.000000e+00> : vector<4x4xf32>
    %210 = tpu.matmul %208, %209, %cst_126 {dimension_numbers = #tpu.dot_dimension_numbers<[1], [1], [0], [0], [0, 0, 1, 0], [], []>} : vector<4x16xbf16>, vector<4x16xbf16>, vector<4x4xf32> -> vector<4x4xf32>
    %cst_127 = arith.constant 2.500000e-01 : f32
    %211 = vector.broadcast %cst_127 : f32 to vector<4x4xf32>
    %212 = arith.mulf %210, %211 : vector<4x4xf32>
    %cst_128 = arith.constant dense<0xFF800000> : vector<4xf32>
    %213 = vector.multi_reduction <maximumf>, %212, %cst_128 [1] : vector<4x4xf32> to vector<4xf32>
    %214 = vector.shape_cast %213 : vector<4xf32> to vector<4x1xf32>
    %215 = vector.broadcast %214 : vector<4x1xf32> to vector<4x4xf32>
    %216 = arith.subf %212, %215 : vector<4x4xf32>
    %217 = math.exp %216 : vector<4x4xf32>
    %cst_129 = arith.constant dense<0.000000e+00> : vector<4xf32>
    %218 = vector.multi_reduction <add>, %217, %cst_129 [1] : vector<4x4xf32> to vector<4xf32>
    %219 = vector.shape_cast %218 : vector<4xf32> to vector<4x1xf32>
    %220 = tpu.reciprocal %219 {approx = true} : vector<4x1xf32> -> vector<4x1xf32>
    %221 = vector.broadcast %220 : vector<4x1xf32> to vector<4x4xf32>
    %222 = arith.mulf %217, %221 : vector<4x4xf32>
    %223 = arith.truncf %222 : vector<4x4xf32> to vector<4x4xbf16>
    %224 = arith.truncf %207 : vector<4x16xf32> to vector<4x16xbf16>
    %cst_130 = arith.constant dense<0.000000e+00> : vector<4x16xf32>
    %225 = tpu.matmul %223, %224, %cst_130 {dimension_numbers = #tpu.dot_dimension_numbers<[1], [0], [0], [1], [0, 0, 1, 1], [], []>} : vector<4x4xbf16>, vector<4x16xbf16>, vector<4x16xf32> -> vector<4x16xf32>
    %c0_131 = arith.constant 0 : index
    %c1_132 = arith.constant 1 : index
    %c0_133 = arith.constant 0 : index
    %c0_134 = arith.constant 0 : index
    %226 = vector.load %arg18[%c0_131, %c1_132, %c0_133, %c0_134] : memref<2x2x16x32xf32, #tpu.memory_space<vmem>>, vector<1x1x16x32xf32>
    %227 = vector.shape_cast %226 : vector<1x1x16x32xf32> to vector<16x32xf32>
    %228 = arith.truncf %225 : vector<4x16xf32> to vector<4x16xbf16>
    %229 = arith.truncf %227 : vector<16x32xf32> to vector<16x32xbf16>
    %cst_135 = arith.constant dense<0.000000e+00> : vector<4x32xf32>
    %230 = tpu.matmul %228, %229, %cst_135 {dimension_numbers = #tpu.dot_dimension_numbers<[1], [0], [0], [1], [0, 0, 1, 1], [], []>} : vector<4x16xbf16>, vector<16x32xbf16>, vector<4x32xf32> -> vector<4x32xf32>
    %231 = arith.addf %192, %230 : vector<4x32xf32>
    %232 = arith.addf %231, %152 : vector<4x32xf32>
    %cst_136 = arith.constant dense<0.000000e+00> : vector<4xf32>
    %233 = vector.multi_reduction <add>, %232, %cst_136 [1] : vector<4x32xf32> to vector<4xf32>
    %234 = vector.shape_cast %233 : vector<4xf32> to vector<4x1xf32>
    %cst_137 = arith.constant 3.200000e+01 : f32
    %235 = vector.broadcast %cst_137 : f32 to vector<4x1xf32>
    %236 = arith.divf %234, %235 : vector<4x1xf32>
    %237 = vector.broadcast %236 : vector<4x1xf32> to vector<4x32xf32>
    %238 = arith.subf %232, %237 : vector<4x32xf32>
    %239 = arith.mulf %238, %238 : vector<4x32xf32>
    %cst_138 = arith.constant dense<0.000000e+00> : vector<4xf32>
    %240 = vector.multi_reduction <add>, %239, %cst_138 [1] : vector<4x32xf32> to vector<4xf32>
    %241 = vector.shape_cast %240 : vector<4xf32> to vector<4x1xf32>
    %cst_139 = arith.constant 3.200000e+01 : f32
    %242 = vector.broadcast %cst_139 : f32 to vector<4x1xf32>
    %243 = arith.divf %241, %242 : vector<4x1xf32>
    %244 = vector.broadcast %236 : vector<4x1xf32> to vector<4x32xf32>
    %245 = arith.subf %232, %244 : vector<4x32xf32>
    %cst_140 = arith.constant 9.99999974E-6 : f32
    %246 = vector.broadcast %cst_140 : f32 to vector<4x1xf32>
    %247 = arith.addf %243, %246 : vector<4x1xf32>
    %248 = math.rsqrt %247 : vector<4x1xf32>
    %249 = vector.broadcast %248 : vector<4x1xf32> to vector<4x32xf32>
    %250 = arith.mulf %245, %249 : vector<4x32xf32>
    %c0_141 = arith.constant 0 : index
    %c0_142 = arith.constant 0 : index
    %c0_143 = arith.constant 0 : index
    %251 = vector.load %arg19[%c0_141, %c0_142, %c0_143] : memref<2x32x64xf32, #tpu.memory_space<vmem>>, vector<1x32x64xf32>
    %252 = vector.shape_cast %251 : vector<1x32x64xf32> to vector<32x64xf32>
    %253 = arith.truncf %250 : vector<4x32xf32> to vector<4x32xbf16>
    %254 = arith.truncf %252 : vector<32x64xf32> to vector<32x64xbf16>
    %cst_144 = arith.constant dense<0.000000e+00> : vector<4x64xf32>
    %255 = tpu.matmul %253, %254, %cst_144 {dimension_numbers = #tpu.dot_dimension_numbers<[1], [0], [0], [1], [0, 0, 1, 1], [], []>} : vector<4x32xbf16>, vector<32x64xbf16>, vector<4x64xf32> -> vector<4x64xf32>
    %cst_145 = arith.constant 0.000000e+00 : f32
    %256 = vector.broadcast %cst_145 : f32 to vector<4x64xf32>
    %257 = arith.maximumf %255, %256 : vector<4x64xf32>
    %c0_146 = arith.constant 0 : index
    %c0_147 = arith.constant 0 : index
    %c0_148 = arith.constant 0 : index
    %258 = vector.load %arg20[%c0_146, %c0_147, %c0_148] : memref<2x64x32xf32, #tpu.memory_space<vmem>>, vector<1x64x32xf32>
    %259 = vector.shape_cast %258 : vector<1x64x32xf32> to vector<64x32xf32>
    %260 = arith.truncf %257 : vector<4x64xf32> to vector<4x64xbf16>
    %261 = arith.truncf %259 : vector<64x32xf32> to vector<64x32xbf16>
    %cst_149 = arith.constant dense<0.000000e+00> : vector<4x32xf32>
    %262 = tpu.matmul %260, %261, %cst_149 {dimension_numbers = #tpu.dot_dimension_numbers<[1], [0], [0], [1], [0, 0, 1, 1], [], []>} : vector<4x64xbf16>, vector<64x32xbf16>, vector<4x32xf32> -> vector<4x32xf32>
    %263 = arith.addf %262, %250 : vector<4x32xf32>
    %cst_150 = arith.constant dense<0.000000e+00> : vector<4xf32>
    %264 = vector.multi_reduction <add>, %263, %cst_150 [1] : vector<4x32xf32> to vector<4xf32>
    %265 = vector.shape_cast %264 : vector<4xf32> to vector<4x1xf32>
    %cst_151 = arith.constant 3.200000e+01 : f32
    %266 = vector.broadcast %cst_151 : f32 to vector<4x1xf32>
    %267 = arith.divf %265, %266 : vector<4x1xf32>
    %268 = vector.broadcast %267 : vector<4x1xf32> to vector<4x32xf32>
    %269 = arith.subf %263, %268 : vector<4x32xf32>
    %270 = arith.mulf %269, %269 : vector<4x32xf32>
    %cst_152 = arith.constant dense<0.000000e+00> : vector<4xf32>
    %271 = vector.multi_reduction <add>, %270, %cst_152 [1] : vector<4x32xf32> to vector<4xf32>
    %272 = vector.shape_cast %271 : vector<4xf32> to vector<4x1xf32>
    %cst_153 = arith.constant 3.200000e+01 : f32
    %273 = vector.broadcast %cst_153 : f32 to vector<4x1xf32>
    %274 = arith.divf %272, %273 : vector<4x1xf32>
    %275 = vector.broadcast %267 : vector<4x1xf32> to vector<4x32xf32>
    %276 = arith.subf %263, %275 : vector<4x32xf32>
    %cst_154 = arith.constant 9.99999974E-6 : f32
    %277 = vector.broadcast %cst_154 : f32 to vector<4x1xf32>
    %278 = arith.addf %274, %277 : vector<4x1xf32>
    %279 = math.rsqrt %278 : vector<4x1xf32>
    %280 = vector.broadcast %279 : vector<4x1xf32> to vector<4x32xf32>
    %281 = arith.mulf %276, %280 : vector<4x32xf32>
    %cst_155 = arith.constant 0.000000e+00 : f32
    %282 = vector.broadcast %cst_155 : f32 to vector<4x32xf32>
    %c1_156 = arith.constant 1 : index
    %c0_157 = arith.constant 0 : index
    %c0_158 = arith.constant 0 : index
    %c0_159 = arith.constant 0 : index
    %283 = vector.load %arg15[%c1_156, %c0_157, %c0_158, %c0_159] : memref<2x2x32x16xf32, #tpu.memory_space<vmem>>, vector<1x1x32x16xf32>
    %284 = vector.shape_cast %283 : vector<1x1x32x16xf32> to vector<32x16xf32>
    %285 = arith.truncf %281 : vector<4x32xf32> to vector<4x32xbf16>
    %286 = arith.truncf %284 : vector<32x16xf32> to vector<32x16xbf16>
    %cst_160 = arith.constant dense<0.000000e+00> : vector<4x16xf32>
    %287 = tpu.matmul %285, %286, %cst_160 {dimension_numbers = #tpu.dot_dimension_numbers<[1], [0], [0], [1], [0, 0, 1, 1], [], []>} : vector<4x32xbf16>, vector<32x16xbf16>, vector<4x16xf32> -> vector<4x16xf32>
    %c1_161 = arith.constant 1 : index
    %c0_162 = arith.constant 0 : index
    %c0_163 = arith.constant 0 : index
    %c0_164 = arith.constant 0 : index
    %288 = vector.load %arg16[%c1_161, %c0_162, %c0_163, %c0_164] : memref<2x2x32x16xf32, #tpu.memory_space<vmem>>, vector<1x1x32x16xf32>
    %289 = vector.shape_cast %288 : vector<1x1x32x16xf32> to vector<32x16xf32>
    %290 = arith.truncf %281 : vector<4x32xf32> to vector<4x32xbf16>
    %291 = arith.truncf %289 : vector<32x16xf32> to vector<32x16xbf16>
    %cst_165 = arith.constant dense<0.000000e+00> : vector<4x16xf32>
    %292 = tpu.matmul %290, %291, %cst_165 {dimension_numbers = #tpu.dot_dimension_numbers<[1], [0], [0], [1], [0, 0, 1, 1], [], []>} : vector<4x32xbf16>, vector<32x16xbf16>, vector<4x16xf32> -> vector<4x16xf32>
    %c1_166 = arith.constant 1 : index
    %c0_167 = arith.constant 0 : index
    %c0_168 = arith.constant 0 : index
    %c0_169 = arith.constant 0 : index
    %293 = vector.load %arg17[%c1_166, %c0_167, %c0_168, %c0_169] : memref<2x2x32x16xf32, #tpu.memory_space<vmem>>, vector<1x1x32x16xf32>
    %294 = vector.shape_cast %293 : vector<1x1x32x16xf32> to vector<32x16xf32>
    %295 = arith.truncf %281 : vector<4x32xf32> to vector<4x32xbf16>
    %296 = arith.truncf %294 : vector<32x16xf32> to vector<32x16xbf16>
    %cst_170 = arith.constant dense<0.000000e+00> : vector<4x16xf32>
    %297 = tpu.matmul %295, %296, %cst_170 {dimension_numbers = #tpu.dot_dimension_numbers<[1], [0], [0], [1], [0, 0, 1, 1], [], []>} : vector<4x32xbf16>, vector<32x16xbf16>, vector<4x16xf32> -> vector<4x16xf32>
    %298 = arith.truncf %287 : vector<4x16xf32> to vector<4x16xbf16>
    %299 = arith.truncf %292 : vector<4x16xf32> to vector<4x16xbf16>
    %cst_171 = arith.constant dense<0.000000e+00> : vector<4x4xf32>
    %300 = tpu.matmul %298, %299, %cst_171 {dimension_numbers = #tpu.dot_dimension_numbers<[1], [1], [0], [0], [0, 0, 1, 0], [], []>} : vector<4x16xbf16>, vector<4x16xbf16>, vector<4x4xf32> -> vector<4x4xf32>
    %cst_172 = arith.constant 2.500000e-01 : f32
    %301 = vector.broadcast %cst_172 : f32 to vector<4x4xf32>
    %302 = arith.mulf %300, %301 : vector<4x4xf32>
    %cst_173 = arith.constant dense<0xFF800000> : vector<4xf32>
    %303 = vector.multi_reduction <maximumf>, %302, %cst_173 [1] : vector<4x4xf32> to vector<4xf32>
    %304 = vector.shape_cast %303 : vector<4xf32> to vector<4x1xf32>
    %305 = vector.broadcast %304 : vector<4x1xf32> to vector<4x4xf32>
    %306 = arith.subf %302, %305 : vector<4x4xf32>
    %307 = math.exp %306 : vector<4x4xf32>
    %cst_174 = arith.constant dense<0.000000e+00> : vector<4xf32>
    %308 = vector.multi_reduction <add>, %307, %cst_174 [1] : vector<4x4xf32> to vector<4xf32>
    %309 = vector.shape_cast %308 : vector<4xf32> to vector<4x1xf32>
    %310 = tpu.reciprocal %309 {approx = true} : vector<4x1xf32> -> vector<4x1xf32>
    %311 = vector.broadcast %310 : vector<4x1xf32> to vector<4x4xf32>
    %312 = arith.mulf %307, %311 : vector<4x4xf32>
    %c0_175 = arith.constant 0 : index
    %c0_176 = arith.constant 0 : index
    %c0_177 = arith.constant 0 : index
    %c0_178 = arith.constant 0 : index
    %313 = vector.load %arg23[%c0_175, %c0_176, %c0_177, %c0_178] : memref<1x2x4x4xf32, #tpu.memory_space<vmem>>, vector<1x1x4x4xf32>
    %314 = vector.shape_cast %313 : vector<1x1x4x4xf32> to vector<4x4xf32>
    %315 = vector.shape_cast %312 : vector<4x4xf32> to vector<1x1x4x4xf32>
    tpu.vector_store %arg23[%c0_175, %c0_176, %c0_177, %c0_178], %315 {strides = array<i32>} : memref<1x2x4x4xf32, #tpu.memory_space<vmem>>, vector<1x1x4x4xf32>,
    %316 = arith.truncf %312 : vector<4x4xf32> to vector<4x4xbf16>
    %317 = arith.truncf %297 : vector<4x16xf32> to vector<4x16xbf16>
    %cst_179 = arith.constant dense<0.000000e+00> : vector<4x16xf32>
    %318 = tpu.matmul %316, %317, %cst_179 {dimension_numbers = #tpu.dot_dimension_numbers<[1], [0], [0], [1], [0, 0, 1, 1], [], []>} : vector<4x4xbf16>, vector<4x16xbf16>, vector<4x16xf32> -> vector<4x16xf32>
    %c1_180 = arith.constant 1 : index
    %c0_181 = arith.constant 0 : index
    %c0_182 = arith.constant 0 : index
    %c0_183 = arith.constant 0 : index
    %319 = vector.load %arg18[%c1_180, %c0_181, %c0_182, %c0_183] : memref<2x2x16x32xf32, #tpu.memory_space<vmem>>, vector<1x1x16x32xf32>
    %320 = vector.shape_cast %319 : vector<1x1x16x32xf32> to vector<16x32xf32>
    %321 = arith.truncf %318 : vector<4x16xf32> to vector<4x16xbf16>
    %322 = arith.truncf %320 : vector<16x32xf32> to vector<16x32xbf16>
    %cst_184 = arith.constant dense<0.000000e+00> : vector<4x32xf32>
    %323 = tpu.matmul %321, %322, %cst_184 {dimension_numbers = #tpu.dot_dimension_numbers<[1], [0], [0], [1], [0, 0, 1, 1], [], []>} : vector<4x16xbf16>, vector<16x32xbf16>, vector<4x32xf32> -> vector<4x32xf32>
    %324 = arith.addf %282, %323 : vector<4x32xf32>
    %c1_185 = arith.constant 1 : index
    %c1_186 = arith.constant 1 : index
    %c0_187 = arith.constant 0 : index
    %c0_188 = arith.constant 0 : index
    %325 = vector.load %arg15[%c1_185, %c1_186, %c0_187, %c0_188] : memref<2x2x32x16xf32, #tpu.memory_space<vmem>>, vector<1x1x32x16xf32>
    %326 = vector.shape_cast %325 : vector<1x1x32x16xf32> to vector<32x16xf32>
    %327 = arith.truncf %281 : vector<4x32xf32> to vector<4x32xbf16>
    %328 = arith.truncf %326 : vector<32x16xf32> to vector<32x16xbf16>
    %cst_189 = arith.constant dense<0.000000e+00> : vector<4x16xf32>
    %329 = tpu.matmul %327, %328, %cst_189 {dimension_numbers = #tpu.dot_dimension_numbers<[1], [0], [0], [1], [0, 0, 1, 1], [], []>} : vector<4x32xbf16>, vector<32x16xbf16>, vector<4x16xf32> -> vector<4x16xf32>
    %c1_190 = arith.constant 1 : index
    %c1_191 = arith.constant 1 : index
    %c0_192 = arith.constant 0 : index
    %c0_193 = arith.constant 0 : index
    %330 = vector.load %arg16[%c1_190, %c1_191, %c0_192, %c0_193] : memref<2x2x32x16xf32, #tpu.memory_space<vmem>>, vector<1x1x32x16xf32>
    %331 = vector.shape_cast %330 : vector<1x1x32x16xf32> to vector<32x16xf32>
    %332 = arith.truncf %281 : vector<4x32xf32> to vector<4x32xbf16>
    %333 = arith.truncf %331 : vector<32x16xf32> to vector<32x16xbf16>
    %cst_194 = arith.constant dense<0.000000e+00> : vector<4x16xf32>
    %334 = tpu.matmul %332, %333, %cst_194 {dimension_numbers = #tpu.dot_dimension_numbers<[1], [0], [0], [1], [0, 0, 1, 1], [], []>} : vector<4x32xbf16>, vector<32x16xbf16>, vector<4x16xf32> -> vector<4x16xf32>
    %c1_195 = arith.constant 1 : index
    %c1_196 = arith.constant 1 : index
    %c0_197 = arith.constant 0 : index
    %c0_198 = arith.constant 0 : index
    %335 = vector.load %arg17[%c1_195, %c1_196, %c0_197, %c0_198] : memref<2x2x32x16xf32, #tpu.memory_space<vmem>>, vector<1x1x32x16xf32>
    %336 = vector.shape_cast %335 : vector<1x1x32x16xf32> to vector<32x16xf32>
    %337 = arith.truncf %281 : vector<4x32xf32> to vector<4x32xbf16>
    %338 = arith.truncf %336 : vector<32x16xf32> to vector<32x16xbf16>
    %cst_199 = arith.constant dense<0.000000e+00> : vector<4x16xf32>
    %339 = tpu.matmul %337, %338, %cst_199 {dimension_numbers = #tpu.dot_dimension_numbers<[1], [0], [0], [1], [0, 0, 1, 1], [], []>} : vector<4x32xbf16>, vector<32x16xbf16>, vector<4x16xf32> -> vector<4x16xf32>
    %340 = arith.truncf %329 : vector<4x16xf32> to vector<4x16xbf16>
    %341 = arith.truncf %334 : vector<4x16xf32> to vector<4x16xbf16>
    %cst_200 = arith.constant dense<0.000000e+00> : vector<4x4xf32>
    %342 = tpu.matmul %340, %341, %cst_200 {dimension_numbers = #tpu.dot_dimension_numbers<[1], [1], [0], [0], [0, 0, 1, 0], [], []>} : vector<4x16xbf16>, vector<4x16xbf16>, vector<4x4xf32> -> vector<4x4xf32>
    %cst_201 = arith.constant 2.500000e-01 : f32
    %343 = vector.broadcast %cst_201 : f32 to vector<4x4xf32>
    %344 = arith.mulf %342, %343 : vector<4x4xf32>
    %cst_202 = arith.constant dense<0xFF800000> : vector<4xf32>
    %345 = vector.multi_reduction <maximumf>, %344, %cst_202 [1] : vector<4x4xf32> to vector<4xf32>
    %346 = vector.shape_cast %345 : vector<4xf32> to vector<4x1xf32>
    %347 = vector.broadcast %346 : vector<4x1xf32> to vector<4x4xf32>
    %348 = arith.subf %344, %347 : vector<4x4xf32>
    %349 = math.exp %348 : vector<4x4xf32>
    %cst_203 = arith.constant dense<0.000000e+00> : vector<4xf32>
    %350 = vector.multi_reduction <add>, %349, %cst_203 [1] : vector<4x4xf32> to vector<4xf32>
    %351 = vector.shape_cast %350 : vector<4xf32> to vector<4x1xf32>
    %352 = tpu.reciprocal %351 {approx = true} : vector<4x1xf32> -> vector<4x1xf32>
    %353 = vector.broadcast %352 : vector<4x1xf32> to vector<4x4xf32>
    %354 = arith.mulf %349, %353 : vector<4x4xf32>
    %c0_204 = arith.constant 0 : index
    %c1_205 = arith.constant 1 : index
    %c0_206 = arith.constant 0 : index
    %c0_207 = arith.constant 0 : index
    %355 = vector.load %arg23[%c0_204, %c1_205, %c0_206, %c0_207] : memref<1x2x4x4xf32, #tpu.memory_space<vmem>>, vector<1x1x4x4xf32>
    %356 = vector.shape_cast %355 : vector<1x1x4x4xf32> to vector<4x4xf32>
    %357 = vector.shape_cast %354 : vector<4x4xf32> to vector<1x1x4x4xf32>
    tpu.vector_store %arg23[%c0_204, %c1_205, %c0_206, %c0_207], %357 {strides = array<i32>} : memref<1x2x4x4xf32, #tpu.memory_space<vmem>>, vector<1x1x4x4xf32>,
    %358 = arith.truncf %354 : vector<4x4xf32> to vector<4x4xbf16>
    %359 = arith.truncf %339 : vector<4x16xf32> to vector<4x16xbf16>
    %cst_208 = arith.constant dense<0.000000e+00> : vector<4x16xf32>
    %360 = tpu.matmul %358, %359, %cst_208 {dimension_numbers = #tpu.dot_dimension_numbers<[1], [0], [0], [1], [0, 0, 1, 1], [], []>} : vector<4x4xbf16>, vector<4x16xbf16>, vector<4x16xf32> -> vector<4x16xf32>
    %c1_209 = arith.constant 1 : index
    %c1_210 = arith.constant 1 : index
    %c0_211 = arith.constant 0 : index
    %c0_212 = arith.constant 0 : index
    %361 = vector.load %arg18[%c1_209, %c1_210, %c0_211, %c0_212] : memref<2x2x16x32xf32, #tpu.memory_space<vmem>>, vector<1x1x16x32xf32>
    %362 = vector.shape_cast %361 : vector<1x1x16x32xf32> to vector<16x32xf32>
    %363 = arith.truncf %360 : vector<4x16xf32> to vector<4x16xbf16>
    %364 = arith.truncf %362 : vector<16x32xf32> to vector<16x32xbf16>
    %cst_213 = arith.constant dense<0.000000e+00> : vector<4x32xf32>
    %365 = tpu.matmul %363, %364, %cst_213 {dimension_numbers = #tpu.dot_dimension_numbers<[1], [0], [0], [1], [0, 0, 1, 1], [], []>} : vector<4x16xbf16>, vector<16x32xbf16>, vector<4x32xf32> -> vector<4x32xf32>
    %366 = arith.addf %324, %365 : vector<4x32xf32>
    %367 = arith.addf %366, %281 : vector<4x32xf32>
    %cst_214 = arith.constant dense<0.000000e+00> : vector<4xf32>
    %368 = vector.multi_reduction <add>, %367, %cst_214 [1] : vector<4x32xf32> to vector<4xf32>
    %369 = vector.shape_cast %368 : vector<4xf32> to vector<4x1xf32>
    %cst_215 = arith.constant 3.200000e+01 : f32
    %370 = vector.broadcast %cst_215 : f32 to vector<4x1xf32>
    %371 = arith.divf %369, %370 : vector<4x1xf32>
    %372 = vector.broadcast %371 : vector<4x1xf32> to vector<4x32xf32>
    %373 = arith.subf %367, %372 : vector<4x32xf32>
    %374 = arith.mulf %373, %373 : vector<4x32xf32>
    %cst_216 = arith.constant dense<0.000000e+00> : vector<4xf32>
    %375 = vector.multi_reduction <add>, %374, %cst_216 [1] : vector<4x32xf32> to vector<4xf32>
    %376 = vector.shape_cast %375 : vector<4xf32> to vector<4x1xf32>
    %cst_217 = arith.constant 3.200000e+01 : f32
    %377 = vector.broadcast %cst_217 : f32 to vector<4x1xf32>
    %378 = arith.divf %376, %377 : vector<4x1xf32>
    %379 = vector.broadcast %371 : vector<4x1xf32> to vector<4x32xf32>
    %380 = arith.subf %367, %379 : vector<4x32xf32>
    %cst_218 = arith.constant 9.99999974E-6 : f32
    %381 = vector.broadcast %cst_218 : f32 to vector<4x1xf32>
    %382 = arith.addf %378, %381 : vector<4x1xf32>
    %383 = math.rsqrt %382 : vector<4x1xf32>
    %384 = vector.broadcast %383 : vector<4x1xf32> to vector<4x32xf32>
    %385 = arith.mulf %380, %384 : vector<4x32xf32>
    %c1_219 = arith.constant 1 : index
    %c0_220 = arith.constant 0 : index
    %c0_221 = arith.constant 0 : index
    %386 = vector.load %arg19[%c1_219, %c0_220, %c0_221] : memref<2x32x64xf32, #tpu.memory_space<vmem>>, vector<1x32x64xf32>
    %387 = vector.shape_cast %386 : vector<1x32x64xf32> to vector<32x64xf32>
    %388 = arith.truncf %385 : vector<4x32xf32> to vector<4x32xbf16>
    %389 = arith.truncf %387 : vector<32x64xf32> to vector<32x64xbf16>
    %cst_222 = arith.constant dense<0.000000e+00> : vector<4x64xf32>
    %390 = tpu.matmul %388, %389, %cst_222 {dimension_numbers = #tpu.dot_dimension_numbers<[1], [0], [0], [1], [0, 0, 1, 1], [], []>} : vector<4x32xbf16>, vector<32x64xbf16>, vector<4x64xf32> -> vector<4x64xf32>
    %cst_223 = arith.constant 0.000000e+00 : f32
    %391 = vector.broadcast %cst_223 : f32 to vector<4x64xf32>
    %392 = arith.maximumf %390, %391 : vector<4x64xf32>
    %c1_224 = arith.constant 1 : index
    %c0_225 = arith.constant 0 : index
    %c0_226 = arith.constant 0 : index
    %393 = vector.load %arg20[%c1_224, %c0_225, %c0_226] : memref<2x64x32xf32, #tpu.memory_space<vmem>>, vector<1x64x32xf32>
    %394 = vector.shape_cast %393 : vector<1x64x32xf32> to vector<64x32xf32>
    %395 = arith.truncf %392 : vector<4x64xf32> to vector<4x64xbf16>
    %396 = arith.truncf %394 : vector<64x32xf32> to vector<64x32xbf16>
    %cst_227 = arith.constant dense<0.000000e+00> : vector<4x32xf32>
    %397 = tpu.matmul %395, %396, %cst_227 {dimension_numbers = #tpu.dot_dimension_numbers<[1], [0], [0], [1], [0, 0, 1, 1], [], []>} : vector<4x64xbf16>, vector<64x32xbf16>, vector<4x32xf32> -> vector<4x32xf32>
    %398 = arith.addf %397, %385 : vector<4x32xf32>
    %cst_228 = arith.constant dense<0.000000e+00> : vector<4xf32>
    %399 = vector.multi_reduction <add>, %398, %cst_228 [1] : vector<4x32xf32> to vector<4xf32>
    %400 = vector.shape_cast %399 : vector<4xf32> to vector<4x1xf32>
    %cst_229 = arith.constant 3.200000e+01 : f32
    %401 = vector.broadcast %cst_229 : f32 to vector<4x1xf32>
    %402 = arith.divf %400, %401 : vector<4x1xf32>
    %403 = vector.broadcast %402 : vector<4x1xf32> to vector<4x32xf32>
    %404 = arith.subf %398, %403 : vector<4x32xf32>
    %405 = arith.mulf %404, %404 : vector<4x32xf32>
    %cst_230 = arith.constant dense<0.000000e+00> : vector<4xf32>
    %406 = vector.multi_reduction <add>, %405, %cst_230 [1] : vector<4x32xf32> to vector<4xf32>
    %407 = vector.shape_cast %406 : vector<4xf32> to vector<4x1xf32>
    %cst_231 = arith.constant 3.200000e+01 : f32
    %408 = vector.broadcast %cst_231 : f32 to vector<4x1xf32>
    %409 = arith.divf %407, %408 : vector<4x1xf32>
    %410 = vector.broadcast %402 : vector<4x1xf32> to vector<4x32xf32>
    %411 = arith.subf %398, %410 : vector<4x32xf32>
    %cst_232 = arith.constant 9.99999974E-6 : f32
    %412 = vector.broadcast %cst_232 : f32 to vector<4x1xf32>
    %413 = arith.addf %409, %412 : vector<4x1xf32>
    %414 = math.rsqrt %413 : vector<4x1xf32>
    %415 = vector.broadcast %414 : vector<4x1xf32> to vector<4x32xf32>
    %416 = arith.mulf %411, %415 : vector<4x32xf32>
    %c0_233 = arith.constant 0 : index
    %c0_234 = arith.constant 0 : index
    %c0_235 = arith.constant 0 : index
    %417 = vector.load %arg22[%c0_233, %c0_234, %c0_235] : memref<1x4x32xf32, #tpu.memory_space<vmem>>, vector<1x4x32xf32>
    %418 = vector.shape_cast %417 : vector<1x4x32xf32> to vector<4x32xf32>
    %419 = vector.shape_cast %416 : vector<4x32xf32> to vector<1x4x32xf32>
    tpu.vector_store %arg22[%c0_233, %c0_234, %c0_235], %419 {strides = array<i32>} : memref<1x4x32xf32, #tpu.memory_space<vmem>>, vector<1x4x32xf32>,
    return
  }
  func.func @transform_0(%arg0: i32) -> (i32, i32, i32) {
    %c0_i32 = arith.constant 0 : i32
    %c0_i32_0 = arith.constant 0 : i32
    %c0_i32_1 = arith.constant 0 : i32
    return %arg0, %c0_i32, %c0_i32_0 : i32, i32, i32
  }
  func.func @transform_1(%arg0: i32) -> (i32, i32, i32) {
    %c0_i32 = arith.constant 0 : i32
    %c0_i32_0 = arith.constant 0 : i32
    %c0_i32_1 = arith.constant 0 : i32
    return %arg0, %c0_i32, %c0_i32_0 : i32, i32, i32
  }
  func.func @transform_2(%arg0: i32) -> (i32, i32, i32, i32) {
    %c0_i32 = arith.constant 0 : i32
    %c0_i32_0 = arith.constant 0 : i32
    %c0_i32_1 = arith.constant 0 : i32
    %c0_i32_2 = arith.constant 0 : i32
    return %arg0, %c0_i32, %c0_i32_0, %c0_i32_1 : i32, i32, i32, i32
  }
  func.func @transform_3(%arg0: i32) -> (i32, i32) {
    %c0_i32 = arith.constant 0 : i32
    %c0_i32_0 = arith.constant 0 : i32
    %c0_i32_1 = arith.constant 0 : i32
    return %c0_i32, %c0_i32_0 : i32, i32
  }
  func.func @transform_4(%arg0: i32) -> (i32, i32) {
    %c0_i32 = arith.constant 0 : i32
    %c0_i32_0 = arith.constant 0 : i32
    %c0_i32_1 = arith.constant 0 : i32
    return %c0_i32, %c0_i32_0 : i32, i32
  }
  func.func @transform_5(%arg0: i32) -> (i32, i32) {
    %c0_i32 = arith.constant 0 : i32
    %c0_i32_0 = arith.constant 0 : i32
    %c0_i32_1 = arith.constant 0 : i32
    return %c0_i32, %c0_i32_0 : i32, i32
  }
  func.func @transform_6(%arg0: i32) -> (i32, i32) {
    %c0_i32 = arith.constant 0 : i32
    %c0_i32_0 = arith.constant 0 : i32
    %c0_i32_1 = arith.constant 0 : i32
    return %c0_i32, %c0_i32_0 : i32, i32
  }
  func.func @transform_7(%arg0: i32) -> (i32, i32, i32) {
    %c0_i32 = arith.constant 0 : i32
    %c0_i32_0 = arith.constant 0 : i32
    %c0_i32_1 = arith.constant 0 : i32
    %c0_i32_2 = arith.constant 0 : i32
    return %c0_i32, %c0_i32_0, %c0_i32_1 : i32, i32, i32
  }
  func.func @transform_8(%arg0: i32) -> (i32, i32, i32) {
    %c0_i32 = arith.constant 0 : i32
    %c0_i32_0 = arith.constant 0 : i32
    %c0_i32_1 = arith.constant 0 : i32
    %c0_i32_2 = arith.constant 0 : i32
    return %c0_i32, %c0_i32_0, %c0_i32_1 : i32, i32, i32
  }
  func.func @transform_9(%arg0: i32) -> (i32, i32, i32) {
    %c0_i32 = arith.constant 0 : i32
    %c0_i32_0 = arith.constant 0 : i32
    %c0_i32_1 = arith.constant 0 : i32
    %c0_i32_2 = arith.constant 0 : i32
    return %c0_i32, %c0_i32_0, %c0_i32_1 : i32, i32, i32
  }
  func.func @transform_10(%arg0: i32) -> (i32, i32, i32) {
    %c0_i32 = arith.constant 0 : i32
    %c0_i32_0 = arith.constant 0 : i32
    %c0_i32_1 = arith.constant 0 : i32
    %c0_i32_2 = arith.constant 0 : i32
    return %c0_i32, %c0_i32_0, %c0_i32_1 : i32, i32, i32
  }
  func.func @transform_11(%arg0: i32) -> (i32, i32, i32) {
    %c0_i32 = arith.constant 0 : i32
    %c0_i32_0 = arith.constant 0 : i32
    %c0_i32_1 = arith.constant 0 : i32
    %c0_i32_2 = arith.constant 0 : i32
    return %c0_i32, %c0_i32_0, %c0_i32_1 : i32, i32, i32
  }
  func.func @transform_12(%arg0: i32) -> (i32, i32) {
    %c0_i32 = arith.constant 0 : i32
    %c0_i32_0 = arith.constant 0 : i32
    %c0_i32_1 = arith.constant 0 : i32
    return %c0_i32, %c0_i32_0 : i32, i32
  }
  func.func @transform_13(%arg0: i32) -> (i32, i32) {
    %c0_i32 = arith.constant 0 : i32
    %c0_i32_0 = arith.constant 0 : i32
    %c0_i32_1 = arith.constant 0 : i32
    return %c0_i32, %c0_i32_0 : i32, i32
  }
  func.func @transform_14(%arg0: i32) -> (i32, i32, i32, i32) {
    %c0_i32 = arith.constant 0 : i32
    %c0_i32_0 = arith.constant 0 : i32
    %c0_i32_1 = arith.constant 0 : i32
    %c0_i32_2 = arith.constant 0 : i32
    %c0_i32_3 = arith.constant 0 : i32
    return %c0_i32, %c0_i32_0, %c0_i32_1, %c0_i32_2 : i32, i32, i32, i32
  }
  func.func @transform_15(%arg0: i32) -> (i32, i32, i32, i32) {
    %c0_i32 = arith.constant 0 : i32
    %c0_i32_0 = arith.constant 0 : i32
    %c0_i32_1 = arith.constant 0 : i32
    %c0_i32_2 = arith.constant 0 : i32
    %c0_i32_3 = arith.constant 0 : i32
    return %c0_i32, %c0_i32_0, %c0_i32_1, %c0_i32_2 : i32, i32, i32, i32
  }
  func.func @transform_16(%arg0: i32) -> (i32, i32, i32, i32) {
    %c0_i32 = arith.constant 0 : i32
    %c0_i32_0 = arith.constant 0 : i32
    %c0_i32_1 = arith.constant 0 : i32
    %c0_i32_2 = arith.constant 0 : i32
    %c0_i32_3 = arith.constant 0 : i32
    return %c0_i32, %c0_i32_0, %c0_i32_1, %c0_i32_2 : i32, i32, i32, i32
  }
  func.func @transform_17(%arg0: i32) -> (i32, i32, i32, i32) {
    %c0_i32 = arith.constant 0 : i32
    %c0_i32_0 = arith.constant 0 : i32
    %c0_i32_1 = arith.constant 0 : i32
    %c0_i32_2 = arith.constant 0 : i32
    %c0_i32_3 = arith.constant 0 : i32
    return %c0_i32, %c0_i32_0, %c0_i32_1, %c0_i32_2 : i32, i32, i32, i32
  }
  func.func @transform_18(%arg0: i32) -> (i32, i32, i32) {
    %c0_i32 = arith.constant 0 : i32
    %c0_i32_0 = arith.constant 0 : i32
    %c0_i32_1 = arith.constant 0 : i32
    %c0_i32_2 = arith.constant 0 : i32
    return %c0_i32, %c0_i32_0, %c0_i32_1 : i32, i32, i32
  }
  func.func @transform_19(%arg0: i32) -> (i32, i32, i32) {
    %c0_i32 = arith.constant 0 : i32
    %c0_i32_0 = arith.constant 0 : i32
    %c0_i32_1 = arith.constant 0 : i32
    %c0_i32_2 = arith.constant 0 : i32
    return %c0_i32, %c0_i32_0, %c0_i32_1 : i32, i32, i32
  }
  func.func @transform_20(%arg0: i32) -> (i32, i32, i32) {
    %c0_i32 = arith.constant 0 : i32
    %c0_i32_0 = arith.constant 0 : i32
    %c0_i32_1 = arith.constant 0 : i32
    return %arg0, %c0_i32, %c0_i32_0 : i32, i32, i32
  }
  func.func @transform_21(%arg0: i32) -> (i32, i32, i32) {
    %c0_i32 = arith.constant 0 : i32
    %c0_i32_0 = arith.constant 0 : i32
    %c0_i32_1 = arith.constant 0 : i32
    return %arg0, %c0_i32, %c0_i32_0 : i32, i32, i32
  }
  func.func @transform_22(%arg0: i32) -> (i32, i32, i32, i32) {
    %c0_i32 = arith.constant 0 : i32
    %c0_i32_0 = arith.constant 0 : i32
    %c0_i32_1 = arith.constant 0 : i32
    %c0_i32_2 = arith.constant 0 : i32
    return %arg0, %c0_i32, %c0_i32_0, %c0_i32_1 : i32, i32, i32, i32
  }
}

</mosaic_0001>

<bundles_post_ra>
// kernel: transpeaker_encoder_forward.1
= control target key start
LH: loop header
LB: loop body
LE: loop exit
PB: predicated region body
PF: predicated region fallthrough
CT: control target
= control target key end

     0   :  { %s4042_s0 = inlined_call_operand.vmem [shape: f32[2,4,64], index: 0, kind: input, shape index: {}]   ;;  %s4043_s1 = inlined_call_operand.vmem [shape: f32[2,144,64], index: 1, kind: input, shape index: {}]   ;;  %s4044_s2 = inlined_call_operand.vmem [shape: f32[2,4,3,64], index: 2, kind: input, shape index: {}]   ;;  %s4045_s3 = inlined_call_operand.vmem [shape: f32[64,32], index: 3, kind: input, shape index: {}]   ;;  %s4046_s4 = inlined_call_operand.vmem [shape: f32[1,32], index: 4, kind: input, shape index: {}]   ;;  %s4047_s5 = inlined_call_operand.vmem [shape: f32[64,32], index: 5, kind: input, shape index: {}]   ;;  %s4048_s6 = inlined_call_operand.vmem [shape: f32[1,32], index: 6, kind: input, shape index: {}]   ;;  %s4049_s7 = inlined_call_operand.vmem [shape: f32[2,32,16], index: 7, kind: input, shape index: {}]   ;;  %s4050_s8 = inlined_call_operand.vmem [shape: f32[2,64,16], index: 8, kind: input, shape index: {}]   ;;  %s4051_s9 = inlined_call_operand.vmem [shape: f32[2,64,16], index: 9, kind: input, shape index: {}]   ;;  %s4052_s10 = inlined_call_operand.vmem [shape: f32[2,16,32], index: 10, kind: input, shape index: {}]   ;;  %s4053_s11 = inlined_call_operand.vmem [shape: f32[2,32,32], index: 11, kind: input, shape index: {}]   ;;  %s4054_s12 = inlined_call_operand.vmem [shape: f32[1,32], index: 12, kind: input, shape index: {}]   ;;  %s4055_s13 = inlined_call_operand.vmem [shape: f32[4,32], index: 13, kind: input, shape index: {}]   ;;  %s4056_s14 = inlined_call_operand.vmem [shape: f32[2,2,32,16], index: 14, kind: input, shape index: {}]   ;;  %s4057_s15 = inlined_call_operand.vmem [shape: f32[2,2,32,16], index: 15, kind: input, shape index: {}]   ;;  %s4058_s16 = inlined_call_operand.vmem [shape: f32[2,2,32,16], index: 16, kind: input, shape index: {}]   ;;  %s4059_s17 = inlined_call_operand.vmem [shape: f32[2,2,16,32], index: 17, kind: input, shape index: {}]   ;;  %s4060_s18 = inlined_call_operand.vmem [shape: f32[2,32,64], index: 18, kind: input, shape index: {}]   ;;  %s4061_s19 = inlined_call_operand.vmem [shape: f32[2,64,32], index: 19, kind: input, shape index: {}]   ;;  %s4062_s20 = inlined_call_operand.hbm [shape: f32[2,4,32], index: 20, kind: output, shape index: {0}]   ;;  %s4063_s21 = inlined_call_operand.hbm [shape: f32[2,4,32], index: 21, kind: output, shape index: {1}]   ;;  %s4064_s22 = inlined_call_operand.hbm [shape: f32[2,2,4,4], index: 22, kind: output, shape index: {2}]  }
   0x1   :  { %4078 = sst [smem:[#allocation15_spill]] %s4042_s0 }
   0x2   :  { %4079 = sst [smem:[#allocation16_spill]] %s4043_s1 }
   0x3   :  { %4080 = sst [smem:[#allocation17_spill]] %s4044_s2 }
   0x4   :  { %4081 = sst [smem:[#allocation18_spill]] %s4045_s3 }
   0x5   :  { %4082 = sst [smem:[#allocation19_spill]] %s4046_s4 }
   0x6   :  { %4083 = sst [smem:[#allocation20_spill]] %s4047_s5 }
   0x7   :  { %4084 = sst [smem:[#allocation21_spill]] %s4048_s6 }
   0x8   :  { %4085 = sst [smem:[#allocation22_spill]] %s4049_s7 }
   0x9   :  { %4086 = sst [smem:[#allocation23_spill]] %s4050_s8 }
   0xa   :  { %4087 = sst [smem:[#allocation24_spill]] %s4051_s9 }
   0xb   :  { %4088 = sst [smem:[#allocation25_spill]] %s4052_s10 }
   0xc   :  { %4089 = sst [smem:[#allocation26_spill]] %s4053_s11 }
   0xd   :  { %4090 = sst [smem:[#allocation27_spill]] %s4054_s12 }
   0xe   :  { %4091 = sst [smem:[#allocation28_spill]] %s4055_s13 }
   0xf   :  { %4092 = sst [smem:[#allocation29_spill]] %s4056_s14 }
  0x10   :  { %4093 = sst [smem:[#allocation30_spill]] %s4063_s21 }
  0x11   :  { %4094 = sst [smem:[#allocation31_spill]] %s4064_s22 }
  0x12   :  { %28 = vsyncpa [#allocation3], 0 }
  0x13   :  { %30 = vsyncpa [#allocation3 + $0x1], 0 }
  0x14   :  { %31 = vsyncpa [#allocation5], 0 }
  0x15   :  { %33 = vsyncpa [#allocation5 + $0x1], 0  ;;  %s3108_s3 = smov 0   ;;  %s3110_s28 = smov 0  }
  0x16   :  { %s3112_s29 = smov 0   ;;  %s3114_s30 = smov 0  }
  0x17 LB: > { %4095 = sst [smem:[#allocation9_spill]] %s2975_s3  ;;  %s3129_s4 = sadd.s32 4294967295, %s2987_s30   ;;  %s2987_s30 = sphi %s3114_s30, %s4130_s30   ;;  %s2983_s29 = sphi %s3112_s29, %s4132_s29   ;;  %s2979_s28 = sphi %s3110_s28, %s4134_s28   ;;  %s2975_s3 = sphi %s3108_s3, %s4133_s3  }
  0x18   : > { %4096 = sst [smem:[#allocation10_spill]] %s2983_s29  ;;  %s4067_s0 = sadd.s32 4294967294, %s2987_s30  }
  0x19   : > { %4097 = sst [smem:[#allocation11_spill]] %s2987_s30  ;;  %s3133_s23 = sadd.s32 1, %s2987_s30  }
  0x1a   : > { %4098 = sst [smem:[#allocation12_spill]] %s3133_s23  ;;  %s481_s1 = sadd.s32 1, %s2983_s29 }
  0x1b   : > { %s478_s5 = ssub.s32 %s2987_s30, %s3133_s23  ;;  %p491_p0 = scmp.ne.s32.totalorder %s2983_s29, %s2979_s28 }
  0x1c   : > { %p479_p1 = scmp.eq.s32.totalorder %s478_s5, 0  ;;  %p492_p2 = scmp.eq.s32.totalorder %s3129_s4, 1 }
  0x1d   : > { %p497_p3 = scmp.ne.s32.totalorder %s2979_s28, %s2975_s3  ;;  %p498_p4 = scmp.eq.s32.totalorder %s4067_s0, 1 }
  0x1e   : > { %s3146_s24 = scalar_select %p479_p1, %s2983_s29, %s481_s1  }
  0x1f   : > { %p3148_p5 = por %p492_p2, %p491_p0  ;;  %p3152_p6 = por %p498_p4, %p497_p3 }
  0x20   : > { %4099 = sst [smem:[#allocation13_spill]] %s3146_s24  ;;  %p2588_p7 = scmp.ge.s32.totalorder %s2987_s30, 1 }
  0x21   : > { %s4101_s25 = scalar_select %p3152_p6, 1, 0 }
  0x22   : > { %p642_p8 = scmp.lt.s32.totalorder %s2987_s30, 3 }
  0x23   : > { %4102 = sst [smem:[#allocation14_spill]] %s4101_s25 }
  0x24   : > { %p643_p9 = pnand %p2588_p7, %p642_p8 }
  0x25   : > { %s4103_s8 = sld [smem:[#allocation23_spill]] (!%p643_p9)  ;;  %p723_p10 = scmp.lt.s32.totalorder (!%p643_p9), %s3129_s4, 1 }
  0x26   : > { %646 = sbr.rel (%p643_p9) target bundleno = 6179 (0x1823), region = 100  ;;  %s4104_s25 = sld [smem:[#allocation18_spill]] (!%p643_p9) }
  0x27   : > { %s4105_s5 = sld [smem:[#allocation16_spill]] (!%p643_p9) }
  0x28   : > { %s4106_s2 = sld [smem:[#allocation15_spill]] (!%p643_p9) }
  0x29   : > { %s4107_s7 = sld [smem:[#allocation22_spill]] (!%p643_p9) }
  0x2a   : > { %s4109_s9 = sld [smem:[#allocation24_spill]] (!%p643_p9) }
  0x2b   : > { %v929_v0 = vld [vmem:[%s4103_s8 + $0x30] sm:$0xff]  ;;  %v930_v1 = vld [vmem:[%s4103_s8 + $0x38] sm:$0xff]  ;;  %v927_v2 = vld [vmem:[%s4103_s8 + $0x20] sm:$0xff]  ;;  %s3172_s23 = scalar_select %p723_p10, %s3129_s4, 1  ;;  %vm778_vm0 = vcmask 523264   ;;  %vm906_vm1 = vcmask 261120  }
  0x2c   : > { %v943_v3 = vpack.c.bf16 %v930_v1, %v929_v0  ;;  %v928_v4 = vld [vmem:[%s4103_s8 + $0x28] sm:$0xff]  ;;  %v767_v5 = vld [vmem:[%s4104_s25 + $0x30] sm:$0xff]  ;;  %v768_v7 = vld [vmem:[%s4104_s25 + $0x38] sm:$0xff]  ;;  %vm795_vm2 = vcmask 518144   ;;  %vm1101_vm4 = vcmask 130048   ;;  %vm863_vm5 = vcmask 1041409  }
  0x2d   : > { %v942_v6 = vpack.c.bf16 %v928_v4, %v927_v2  ;;  %v925_v8 = vld [vmem:[%s4103_s8 + $0x10] sm:$0xff]  ;;  %v926_v9 = vld [vmem:[%s4103_s8 + $0x18] sm:$0xff]  ;;  %s2766_s24 = smul.u32 144, %s3172_s23  ;;  %v773_v10 = vpack.c.bf16 %v768_v7, %v767_v5  ;;  %v923_v12 = vld [vmem:[%s4103_s8] sm:$0xff]  ;;  %s2592_s0 = sshll.u32 %s3172_s23, 2  ;;  %vm865_vm6 = vcmask 1042434  }
  0x2e   : > { %975 = vmatpush.bf16.msra.mxu3 %v943_v3  ;;  %v941_v11 = vpack.c.bf16 %v926_v9, %v925_v8  ;;  %v924_v13 = vld [vmem:[%s4103_s8 + $0x8] sm:$0xff]  ;;  %v765_v18 = vld [vmem:[%s4104_s25 + $0x20] sm:$0xff]  ;;  %v763_v20 = vld [vmem:[%s4104_s25 + $0x10] sm:$0xff]  ;;  %s726_s21 = scalar_lea.vmem %s4106_s2, %s2592_s0  ;;  %s2764_s27 = sshll.u32 %s3172_s23, 4  ;;  %vm867_vm7 = vcmask 1043459   ;;  %vm1164_vm13 = vcmask 125952  }
  0x2f   : > { %786 = vmatpush.bf16.msra.mxu0 %v773_v10  ;;  %s3196_s22 = scalar_lea.vmem %s4105_s5, %s2766_s24  ;;  %v940_v14 = vpack.c.bf16 %v924_v13, %v923_v12  ;;  %v766_v19 = vld [vmem:[%s4104_s25 + $0x28] sm:$0xff]  ;;  %v764_v22 = vld [vmem:[%s4104_s25 + $0x18] sm:$0xff]  ;;  %v761_v24 = vld [vmem:[%s4104_s25] sm:$0xff]  ;;  %s4111_s24 = sld [smem:[#allocation20_spill]]  ;;  %vm1162_vm15 = vcmask 1043456  }
  0x30   : > { %v739_v15 = vld [vmem:[%s3196_s22] sm:$0xff]  ;;  %v740_v16 = vld [vmem:[%s3196_s22 + $0x8] sm:$0xff]  ;;  %v772_v21 = vpack.c.bf16 %v766_v19, %v765_v18  ;;  %v771_v23 = vpack.c.bf16 %v764_v22, %v763_v20  ;;  %v741_v28 = vld [vmem:[%s3196_s22 + $0x10] sm:$0xff]  ;;  %s4116_s10 = sld [smem:[#allocation25_spill]]  ;;  %s3687_s2 = sand.u32 1, %s2979_s28  }
  0x31   : > { %v3200_v17 = vpack.c.bf16 %v740_v16, %v739_v15  ;;  %v762_v25 = vld [vmem:[%s4104_s25 + $0x8] sm:$0xff]  ;;  %v738_v27 = vld [vmem:[%s726_s21] sm:$0xf]  ;;  %v742_v29 = vld [vmem:[%s3196_s22 + $0x18] sm:$0xff]  ;;  %s4117_s11 = sld [smem:[#allocation26_spill]]  ;;  %s4077_s1 = sshll.u32 %s3687_s2, 2 }
  0x32   : > { %976 = vmatpush.bf16.msra.mxu3 %v942_v6  ;;  %v770_v26 = vpack.c.bf16 %v762_v25, %v761_v24  ;;  %v769_v30 = vpack.c.bf16 %v738_v27, %v738_v27  ;;  %v3228_v31 = vpack.c.bf16 %v742_v29, %v741_v28  ;;  %v743_v32 = vld [vmem:[%s3196_s22 + $0x20] sm:$0xff]  ;;  %v744_v33 = vld [vmem:[%s3196_s22 + $0x28] sm:$0xff]  ;;  %v745_v35 = vld [vmem:[%s3196_s22 + $0x30] sm:$0xff]  ;;  %v2989_v27 = vmov 3.0   ;;  %s4118_s26 = sld [smem:[#allocation21_spill]]  ;;  %s3701_s3 = scalar_lea.vmem [#allocation2], %s4077_s1 }
  0x33   : > { %787 = vmatpush.bf16.msra.mxu0 %v772_v21  ;;  %v3235_v34 = vpack.c.bf16 %v744_v33, %v743_v32  ;;  %v746_v36 = vld [vmem:[%s3196_s22 + $0x38] sm:$0xff]  ;;  %v747_v38 = vld [vmem:[%s3196_s22 + $0x40] sm:$0xff]  ;;  %v748_v39 = vld [vmem:[%s3196_s22 + $0x48] sm:$0xff]  ;;  %2823 = vrcp.f32 %v2989_v27  ;;  %s4119_s14 = sld [smem:[#allocation29_spill]]  ;;  %s2591_s1 = sshll.u32 %s3687_s2, 3 }
  0x34   : > { %v3241_v37 = vpack.c.bf16 %v746_v36, %v745_v35  ;;  %v3247_v40 = vpack.c.bf16 %v748_v39, %v747_v38  ;;  %v749_v41 = vld [vmem:[%s3196_s22 + $0x50] sm:$0xff]  ;;  %v750_v42 = vld [vmem:[%s3196_s22 + $0x58] sm:$0xff]  ;;  %v751_v44 = vld [vmem:[%s3196_s22 + $0x60] sm:$0xff]  ;;  %s4120_s12 = sld [smem:[#allocation27_spill]]  ;;  %s2758_s5 = sshll.u32 %s3129_s4, 2 }
  0x35   : > { %v3253_v43 = vpack.c.bf16 %v750_v42, %v749_v41  ;;  %v752_v45 = vld [vmem:[%s3196_s22 + $0x68] sm:$0xff]  ;;  %v753_v47 = vld [vmem:[%s3196_s22 + $0x70] sm:$0xff]  ;;  %v754_v48 = vld [vmem:[%s3196_s22 + $0x78] sm:$0xff]  ;;  %s4121_s13 = sld [smem:[#allocation28_spill]]  ;;  %s2403_s23 = scalar_lea.hbm %s4062_s20, %s2758_s5 }
  0x36   : > { %977 = vmatpush.bf16.msra.mxu3 %v941_v11  ;;  %v3259_v46 = vpack.c.bf16 %v752_v45, %v751_v44  ;;  %v3265_v49 = vpack.c.bf16 %v754_v48, %v753_v47  ;;  %v755_v50 = vld [vmem:[%s3196_s22 + $0x80] sm:$0xff]  ;;  %v756_v51 = vld [vmem:[%s3196_s22 + $0x88] sm:$0xff]  ;;  %v901_v54 = vld [vmem:[%s4107_s7 + $0x10] sm:$0xff]  ;;  %s4108_s22 = sld [smem:[#allocation19_spill]]  ;;  %s2405_s29 = sshll.u32 %s3701_s3, 4  ;;  %s2406_s29 = int_to_ptr.vmem [resolvable:$true] %s2405_s29 }
  0x37   : > { %788 = vmatpush.bf16.msra.mxu0 %v771_v23  ;;  %v3271_v52 = vpack.c.bf16 %v756_v51, %v755_v50  ;;  %v902_v55 = vld [vmem:[%s4107_s7 + $0x18] sm:$0xff]  ;;  %v899_v58 = vld [vmem:[%s4107_s7] sm:$0xff]  ;;  %v900_v59 = vld [vmem:[%s4107_s7 + $0x8] sm:$0xff]  ;;  %s2383_s21 = scalar_lea.sflag [#allocation3], %s3687_s2 }
  0x38   : > { %v905_v56 = vpack.c.bf16 %v902_v55, %v901_v54  ;;  %v904_v62 = vpack.c.bf16 %v900_v59, %v899_v58  ;;  %v1031_v12 = vld [vmem:[%s4109_s9 + $0x30] sm:$0xff]  ;;  %v1032_v13 = vld [vmem:[%s4109_s9 + $0x38] sm:$0xff]  ;;  %v1030_v16 = vld [vmem:[%s4109_s9 + $0x28] sm:$0xff] }
  0x39   : > { %v1036_v15 = vpack.c.bf16 %v1032_v13, %v1031_v12  ;;  %v1027_v20 = vld [vmem:[%s4109_s9 + $0x10] sm:$0xff]  ;;  %v1028_v21 = vld [vmem:[%s4109_s9 + $0x18] sm:$0xff]  ;;  %v1025_v22 = vld [vmem:[%s4109_s9] sm:$0xff]  ;;  %v2824_v47 = vpop.eup %2823 }
  0x3a   : > { %978 = vmatpush.bf16.msra.mxu3 %v940_v14  ;;  %916 = vmatpush.bf16.msra.mxu2 %v905_v56  ;;  %v1029_v14 = vld [vmem:[%s4109_s9 + $0x20] sm:$0xff]  ;;  %v1034_v23 = vpack.c.bf16 %v1028_v21, %v1027_v20  ;;  %v1026_v24 = vld [vmem:[%s4109_s9 + $0x8] sm:$0xff]  ;;  %v841_v35 = vld [vmem:[%s4111_s24 + $0x30] sm:$0xff]  ;;  %v825_v55 = vmul.f32 3.0, %v2824_v47  ;;  %vm829_vm3 = vweird.f32 %v2824_v47 }
  0x3b   : > { %789 = vmatpush.bf16.msra.mxu0 %v770_v26  ;;  %v1035_v18 = vpack.c.bf16 %v1030_v16, %v1029_v14  ;;  %v1033_v25 = vpack.c.bf16 %v1026_v24, %v1025_v22  ;;  %v842_v36 = vld [vmem:[%s4111_s24 + $0x38] sm:$0xff]  ;;  %v839_v16 = vld [vmem:[%s4111_s24 + $0x20] sm:$0xff]  ;;  %v837_v20 = vld [vmem:[%s4111_s24 + $0x10] sm:$0xff] }
  0x3c   : > { %v2820_v57 = vld [vmem:[%s4108_s22] ss:$0 sm:$0xff]  ;;  %s4110_s22 = sld [smem:[#allocation17_spill]]  ;;  %v850_v42 = vpack.c.bf16 %v842_v36, %v841_v35  ;;  %v838_v27 = vld [vmem:[%s4111_s24 + $0x18] sm:$0xff] }
  0x3d   : > { %2599 = vmatmul.msk.bf16.vlgmr.msra.gmra.mxu3 %vm778_vm0, %v3200_v17 }
  0x3e   : > { %2596 = vmatmul.msk.bf16.vlgmr.msra.gmra.mxu0 %vm778_vm0, %v769_v30  ;;  %917 = vmatpush.bf16.msra.mxu2 %v904_v62  ;;  %v826_v62 = vsub.f32 1.0, %v825_v55 }
  0x3f   : > { %877 = vmatpush.bf16.msra.mxu1 %v850_v42 }
  0x42   : > { %1041 = vmatpush.bf16.msrb.mxu2 %v1036_v15  ;;  %s736_s30 = scalar_lea.vmem %s4110_s22, %s2764_s27  ;;  %v827_v15 = vmul.f32 %v2824_v47, %v826_v62  ;;  %s3888_s27 = scalar_lea.vmem [#allocation6], %s2591_s1 }
  0x43   : > { %v757_v28 = vld [vmem:[%s736_s30] sm:$0x7]  ;;  %v758_v29 = vld [vmem:[%s736_s30 + $0x4] sm:$0x7]  ;;  %v759_v30 = vld [vmem:[%s736_s30 + $0x8] sm:$0x7] }
  0x44   : > { %v796_v32 = vsel %vm795_vm2, %v757_v28, 0.0  ;;  %v803_v33 = vsel %vm795_vm2, %v758_v29, 0.0  ;;  %v760_v38 = vld [vmem:[%s736_s30 + $0xc] sm:$0x7]  ;;  %v810_v44 = vsel %vm795_vm2, %v759_v30, 0.0  ;;  %v828_v28 = vadd.f32 %v2824_v47, %v827_v15 }
  0x45   : > { %v797_v39 = vrot.slane %v796_v32, 4  ;;  %v804_v41 = vrot.slane %v803_v33, 4  ;;  %v817_v45 = vsel %vm795_vm2, %v760_v38, 0.0  ;;  %v811_v51 = vrot.slane %v810_v44, 4 }
  0x46   : > { %1042 = vmatpush.bf16.msrb.mxu2 %v1035_v18  ;;  %v818_v54 = vrot.slane %v817_v45, 4  ;;  %v840_v18 = vld [vmem:[%s4111_s24 + $0x28] sm:$0xff]  ;;  %vm1548_vm2 = vcmask 257024  }
  0x47   : > { %v798_v48 = vadd.f32 %v797_v39, %v796_v32  ;;  %v805_v50 = vadd.f32 %v804_v41, %v803_v33  ;;  %v812_v59 = vadd.f32 %v811_v51, %v810_v44  ;;  %v848_v33 = vpack.c.bf16 %v838_v27, %v837_v20 }
  0x48   : > { %v830_v39 = vsel %vm829_vm3, %v2824_v47, %v828_v28  ;;  %v836_v47 = vld [vmem:[%s4111_s24 + $0x8] sm:$0xff] }
  0x49   : > { %v806_v58 = vrot.slane %v805_v50, 2  ;;  %v813_v13 = vrot.slane %v812_v59, 2 }
  0x4a   : > { %1043 = vmatpush.bf16.msrb.mxu2 %v1034_v23 }
  0x4b   : > { %v807_v12 = vadd.f32 %v806_v58, %v805_v50  ;;  %v814_v23 = vadd.f32 %v813_v13, %v812_v59 }
  0x4d   : > { %2600 = vmatmul.msk.bf16.gmra.mxu3 %vm778_vm0, %v3228_v31  ;;  %v808_v22 = vrot.slane %v807_v12, 1  ;;  %v815_v32 = vrot.slane %v814_v23, 1 }
  0x4e   : > { %1044 = vmatpush.bf16.msrb.mxu2 %v1033_v25  ;;  %v849_v25 = vpack.c.bf16 %v840_v18, %v839_v16 }
  0x4f   : > { %v809_v30 = vadd.f32 %v808_v22, %v807_v12  ;;  %v816_v38 = vadd.f32 %v815_v32, %v814_v23 }
  0x50   : > { %878 = vmatpush.bf16.msra.mxu1 %v849_v25 }
  0x54   : > { %879 = vmatpush.bf16.msra.mxu1 %v848_v33 }
  0x5d   : > { %2601 = vmatmul.msk.bf16.gmra.mxu3 %vm778_vm0, %v3235_v34 }
  0x6d   : > { %2602 = vmatmul.msk.bf16.gmra.mxu3 %vm778_vm0, %v3241_v37 }
  0x7d   : > { %2603 = vmatmul.msk.bf16.gmra.mxu3 %vm778_vm0, %v3247_v40 }
  0x8d   : > { %2604 = vmatmul.msk.bf16.gmra.mxu3 %vm778_vm0, %v3253_v43 }
  0x9d   : > { %2605 = vmatmul.msk.bf16.gmra.mxu3 %vm778_vm0, %v3259_v46 }
  0xad   : > { %2606 = vmatmul.msk.bf16.gmra.mxu3 %vm778_vm0, %v3265_v49 }
  0xbb   : > { %v791_v61 = vpop.f32.mrf.mxu0 }
  0xbc   : > { %v3294_v63 = vadd.f32 %v2820_v57, %v791_v61  ;;  %v799_v57 = vrot.slane %v798_v48, 2  ;;  %v819_v61 = vadd.f32 %v818_v54, %v817_v45  ;;  %v832_v45 = vmul.f32 %v830_v39, %v809_v30 }
  0xbd   : > { %2607 = vmatmul.msk.bf16.gmra.mxu3 %vm778_vm0, %v3271_v52 }
  0xbe   : > { %v3298_v0 = vpack.c.bf16 %v3294_v63, %v3294_v63  ;;  %v820_v14 = vrot.slane %v819_v61, 2  ;;  %v844_v55 = vpack.c.bf16 %v832_v45, %v832_v45 }
  0xc0   : > { %v3275_v53 = vpop.f32.mrf.mxu3  ;;  %2598 = vmatmul.msk.bf16.vlgmr.msra.gmra.mxu2 %vm906_vm1, %v3298_v0  ;;  %v821_v24 = vadd.f32 %v820_v14, %v819_v61  ;;  %v860_v62 = vunpack.c.l.b16 %v844_v55 }
  0xc2   : > { %v822_v35 = vrot.slane %v821_v24, 1 }
  0xc3   : > { %v793_v2 = vpop.f32.mrf.mxu0 }
  0xc4   : > { %v800_v2 = vadd.f32 %v799_v57, %v798_v48  ;;  %v823_v42 = vadd.f32 %v822_v35, %v821_v24  ;;  %v833_v48 = vmul.f32 %v830_v39, %v816_v38  ;;  %v835_v57 = vld [vmem:[%s4111_s24] sm:$0xff] }
  0xc5   : > { %v847_v58 = vpack.c.bf16 %v836_v47, %v835_v57 }
  0xc6   : > { %v801_v21 = vrot.slane %v800_v2, 1  ;;  %v834_v51 = vmul.f32 %v830_v39, %v823_v42 }
  0xc7   : > { %880 = vmatpush.bf16.msra.mxu1 %v847_v58 }
  0xc8   : > { %v3292_v60 = vpop.f32.mrf.mxu3  ;;  %v802_v29 = vadd.f32 %v801_v21, %v800_v2  ;;  %v846_v59 = vpack.c.bf16 %v834_v51, %v834_v51 }
  0xca   : > { %v831_v44 = vmul.f32 %v830_v39, %v802_v29  ;;  %v862_v13 = vunpack.c.l.b16 %v846_v59 }
  0xcc   : > { %v843_v54 = vpack.c.bf16 %v831_v44, %v831_v44 }
  0xce   : > { %v859_v61 = vunpack.c.l.b16 %v843_v54 }
  0xd0   : > { %v3302_v1 = vpop.f32.mrf.mxu3  ;;  %2608 = vmatmul.msk.bf16.vlgmr.msrb.gmra.mxu2 %vm778_vm0, %v3200_v17  ;;  %v864_v14 = vsel %vm863_vm5, %v860_v62, %v859_v61 }
  0xd8   : > { %v3304_v3 = vpop.f32.mrf.mxu3 }
  0xd9   : > { %v1093_v32 = vpack.c.bf16 %v3304_v3, %v3302_v1  ;;  %v2620_v1 = vld [vmem:[%s4107_s7 + $0x20] sm:$0xff]  ;;  %v2621_v3 = vld [vmem:[%s4107_s7 + $0x28] sm:$0xff] }
  0xdb   : > { %v1109_v33 = vsel %vm1101_vm4, %v1093_v32, 0 }
  0xe0   : > { %v3306_v4 = vpop.f32.mrf.mxu3  ;;  %2609 = vmatmul.msk.bf16.gmra.mxu2 %vm778_vm0, %v3228_v31 }
  0xe8   : > { %v3308_v5 = vpop.f32.mrf.mxu3 }
  0xf0   : > { %v3310_v6 = vpop.f32.mrf.mxu3  ;;  %2610 = vmatmul.msk.bf16.gmra.mxu2 %vm778_vm0, %v3235_v34 }
  0xf8   : > { %v3312_v7 = vpop.f32.mrf.mxu3 }
 0x100   : > { %v3314_v8 = vpop.f32.mrf.mxu3  ;;  %2611 = vmatmul.msk.bf16.gmra.mxu2 %vm778_vm0, %v3241_v37 }
 0x108   : > { %v3316_v9 = vpop.f32.mrf.mxu3 }
 0x110   : > { %v3318_v10 = vpop.f32.mrf.mxu3  ;;  %2612 = vmatmul.msk.bf16.gmra.mxu2 %vm778_vm0, %v3247_v40 }
 0x118   : > { %v3320_v11 = vpop.f32.mrf.mxu3 }
 0x119   : > { %v1097_v22 = vpack.c.bf16 %v3320_v11, %v3318_v10  ;;  %v1095_v10 = vpack.c.bf16 %v3312_v7, %v3310_v6  ;;  %v2622_v6 = vld [vmem:[%s4107_s7 + $0x30] sm:$0xff]  ;;  %v2623_v7 = vld [vmem:[%s4107_s7 + $0x38] sm:$0xff] }
 0x11b   : > { %v1121_v25 = vsel %vm1101_vm4, %v1097_v22, 0  ;;  %v1115_v30 = vsel %vm1101_vm4, %v1095_v10, 0 }
 0x120   : > { %v3334_v19 = vpop.f32.mrf.mxu3  ;;  %2613 = vmatmul.msk.bf16.gmra.mxu2 %vm778_vm0, %v3253_v43 }
 0x128   : > { %v3352_v26 = vpop.f32.mrf.mxu3 }
 0x129   : > { %v1098_v12 = vpack.c.bf16 %v3352_v26, %v3334_v19  ;;  %v1096_v26 = vpack.c.bf16 %v3316_v9, %v3314_v8  ;;  %v1094_v8 = vpack.c.bf16 %v3308_v5, %v3306_v4  ;;  %v1092_v4 = vpack.c.bf16 %v3292_v60, %v3275_v53 }
 0x12a   : > { %v1233_v5 = vpack.c.bf16 %v2623_v7, %v2622_v6 }
 0x12b   : > { %v1124_v21 = vsel %vm1101_vm4, %v1098_v12, 0  ;;  %v1118_v29 = vsel %vm1101_vm4, %v1096_v26, 0  ;;  %v1112_v9 = vsel %vm1101_vm4, %v1094_v8, 0  ;;  %v1106_v35 = vsel %vm1101_vm4, %v1092_v4, 0 }
 0x130   : > { %v1015_v56 = vpop.f32.mrf.mxu3  ;;  %2614 = vmatmul.msk.bf16.gmra.mxu2 %vm778_vm0, %v3259_v46 }
 0x138   : > { %v1017_v36 = vpop.f32.mrf.mxu3 }
 0x139   : > { %v1099_v41 = vpack.c.bf16 %v1017_v36, %v1015_v56  ;;  %v845_v56 = vpack.c.bf16 %v833_v48, %v833_v48  ;;  %v1232_v36 = vpack.c.bf16 %v2621_v3, %v2620_v1 }
 0x13b   : > { %v1127_v50 = vsel %vm1101_vm4, %v1099_v41, 0  ;;  %v861_v2 = vunpack.c.l.b16 %v845_v56 }
 0x13c   : > { %1132 = vmatpush.bf16.xpose.msrb.mxu0 %v1127_v50  ;;  %v886_v50 = vlaneseq }
 0x13d   : > { %v866_v16 = vsel %vm865_vm6, %v861_v2, %v864_v14 }
 0x13e   : > { %v868_v18 = vsel %vm867_vm7, %v862_v13, %v866_v16  ;;  %v887_v54 = vshrl.u32 %v886_v50, 7  ;;  %v889_v55 = vand.u32 127, %v886_v50 }
 0x13f   : > { %v869_v20 = vpack.c.b16 %v868_v18, %v868_v18 }
 0x140   : > { %v1020_v15 = vpop.f32.mrf.mxu3  ;;  %2615 = vmatmul.msk.bf16.gmra.mxu2 %vm778_vm0, %v3265_v49  ;;  %v891_v57 = vmul.u32 36, %v887_v54  ;;  %v890_v56 = vadd.s32 128, %v889_v55 }
 0x141   : > { %2597 = vmatmul.msk.bf16.vlgmr.msra.gmra.mxu1 %vm778_vm0, %v869_v20 }
 0x142   : > { %v894_v58 = vadd.s32 36, %v891_v57  ;;  %vm893_vm8 = vcmp.ge.s32.totalorder %v890_v56, %v891_v57  ;;  %vm892_vm11 = vcmp.ge.s32.totalorder %v889_v55, %v891_v57  ;;  %v2629_v57 = vld [vmem:[%s4103_s8 + $0x60] sm:$0xff] }
 0x143   : > { %v919_v27 = vpop.f32.mrf.mxu2 }
 0x144   : > { %1133 = vmatpush.bf16.xpose.msrb.mxu0 %v1124_v21  ;;  %v1091_v28 = vpack.c.bf16 %v919_v27, %v919_v27  ;;  %vm896_vm9 = vcmp.lt.s32.totalorder %v890_v56, %v894_v58  ;;  %vm895_vm12 = vcmp.lt.s32.totalorder %v889_v55, %v894_v58  ;;  %v2627_v58 = vld [vmem:[%s4103_s8 + $0x50] sm:$0xff] }
 0x145   : > { %vm3438_vm10 = vmand %vm893_vm8, %vm896_vm9  ;;  %vm1734_vm8 = vcmask 1041408   ;;  %vm1716_vm9 = vcmask 27648  }
 0x146   : > { %vm3444_vm14 = vmand %vm892_vm11, %vm895_vm12 }
 0x148   : > { %v1022_v23 = vpop.f32.mrf.mxu3 }
 0x149   : > { %v1100_v24 = vpack.c.bf16 %v1022_v23, %v1020_v15 }
 0x14b   : > { %v1130_v19 = vsel %vm1101_vm4, %v1100_v24, 0  ;;  %v921_v11 = vpop.f32.mrf.mxu2 }
 0x14c   : > { %1134 = vmatpush.bf16.xpose.msrb.mxu0 %v1121_v25  ;;  %1152 = vmatpush.bf16.xpose.msrb.mxu1 %v1130_v19 }
 0x150   : > { %2616 = vmatmul.msk.bf16.gmra.mxu2 %vm778_vm0, %v3271_v52 }
 0x153   : > { %2618 = vmatmul.msk.bf16.vlgmr.msrb.gmra.mxu1 %vm1101_vm4, %v1091_v28  ;;  %v1046_v53 = vpop.f32.mrf.mxu2 }
 0x154   : > { %1135 = vmatpush.bf16.xpose.msrb.mxu0 %v1118_v29 }
 0x15b   : > { %v1048_v60 = vpop.f32.mrf.mxu2 }
 0x15c   : > { %1136 = vmatpush.bf16.xpose.msrb.mxu0 %v1115_v30  ;;  %v1185_v6 = vpack.c.bf16 %v1048_v60, %v1046_v53 }
 0x163   : > { %v1051_v39 = vpop.f32.mrf.mxu2 }
 0x164   : > { %1137 = vmatpush.bf16.xpose.msrb.mxu0 %v1112_v9 }
 0x16b   : > { %v1053_v42 = vpop.f32.mrf.mxu2 }
 0x16c   : > { %1138 = vmatpush.bf16.xpose.msrb.mxu0 %v1109_v33  ;;  %v1186_v33 = vpack.c.bf16 %v1053_v42, %v1051_v39 }
 0x173   : > { %v1056_v45 = vpop.f32.mrf.mxu2 }
 0x174   : > { %1139 = vmatpush.bf16.xpose.msrb.mxu0 %v1106_v35 }
 0x17b   : > { %2617 = vmatmul.msk.bf16.vlgmr.msrb.gmra.mxu0 %vm1101_vm4, %v1091_v28 }
 0x17c   : > { %1240 = vmatpush.bf16.msra.mxu0 %v1233_v5 }
 0x180   : > { %1241 = vmatpush.bf16.msra.mxu0 %v1232_v36 }
 0x18b   : > { %2624 = vmatmul.msk.bf16.vlgmr.msra.gmra.mxu0 %vm906_vm1, %v3298_v0  ;;  %v1058_v0 = vpop.f32.mrf.mxu2 }
 0x18c   : > { %v1187_v32 = vpack.c.bf16 %v1058_v0, %v1056_v45  ;;  %v2632_v0 = vld [vmem:[%s4103_s8 + $0x78] sm:$0xff] }
 0x193   : > { %v1061_v51 = vpop.f32.mrf.mxu2 }
 0x19b   : > { %v1063_v47 = vpop.f32.mrf.mxu2 }
 0x19c   : > { %v1188_v9 = vpack.c.bf16 %v1063_v47, %v1061_v51  ;;  %v2630_v47 = vld [vmem:[%s4103_s8 + $0x68] sm:$0xff] }
 0x19d   : > { %v1258_v56 = vpack.c.bf16 %v2630_v47, %v2629_v57 }
 0x1a3   : > { %v1066_v59 = vpop.f32.mrf.mxu2 }
 0x1ab   : > { %v1068_v15 = vpop.f32.mrf.mxu2 }
 0x1ac   : > { %v1189_v8 = vpack.c.bf16 %v1068_v15, %v1066_v59  ;;  %v2628_v59 = vld [vmem:[%s4103_s8 + $0x58] sm:$0xff] }
 0x1b3   : > { %v1071_v23 = vpop.f32.mrf.mxu2 }
 0x1bb   : > { %v1073_v25 = vpop.f32.mrf.mxu2 }
 0x1bc   : > { %v1190_v30 = vpack.c.bf16 %v1073_v25, %v1071_v23 }
 0x1be   : > { %v3436_v38 = vpop.f32.mrf.mxu1 }
 0x1c3   : > { %v1076_v26 = vpop.f32.mrf.mxu2 }
 0x1c6   : > { %v884_v41 = vpop.f32.mrf.mxu1 }
 0x1cb   : > { %v1078_v27 = vpop.f32.mrf.mxu2 }
 0x1cc   : > { %v1191_v11 = vpack.c.bf16 %v1078_v27, %v1076_v26 }
 0x1d0   : > { %v1154_v44 = vpop.f32.mrf.mxu1 }
 0x1d1   : > { %v1159_v61 = vmul.f32 0.25, %v1154_v44 }
 0x1d3   : > { %v1161_v2 = vsel %vm3438_vm10, %v1159_v61, -1e+09  ;;  %v1081_v28 = vpop.f32.mrf.mxu2  ;;  %v1257_v61 = vpack.c.bf16 %v2628_v59, %v2627_v58 }
 0x1d4   : > { %v1165_v16 = vsel %vm1164_vm13, %v1161_v2, -inf }
 0x1d8   : > { %v1156_v48 = vpop.f32.mrf.mxu1 }
 0x1d9   : > { %v2631_v48 = vld [vmem:[%s4103_s8 + $0x70] sm:$0xff] }
 0x1da   : > { %v1259_v54 = vpack.c.bf16 %v2632_v0, %v2631_v48 }
 0x1db   : > { %v1083_v29 = vpop.f32.mrf.mxu2 }
 0x1dc   : > { %v1192_v10 = vpack.c.bf16 %v1083_v29, %v1081_v28 }
 0x1de   : > { %1197 = vmatpush.bf16.msra.mxu1 %v1192_v10 }
 0x1e2   : > { %1198 = vmatpush.bf16.msra.mxu1 %v1191_v11 }
 0x1e3   : > { %v1086_v39 = vpop.f32.mrf.mxu2 }
 0x1e6   : > { %1199 = vmatpush.bf16.msra.mxu1 %v1190_v30 }
 0x1ea   : > { %1200 = vmatpush.bf16.msra.mxu1 %v1189_v8 }
 0x1eb   : > { %v1088_v42 = vpop.f32.mrf.mxu2 }
 0x1ec   : > { %v1193_v53 = vpack.c.bf16 %v1088_v42, %v1086_v39  ;;  %v2642_v42 = vld [vmem:[%s4109_s9 + $0x40] sm:$0xff] }
 0x1ee   : > { %1201 = vmatpush.bf16.msra.mxu1 %v1188_v9 }
 0x1f2   : > { %1202 = vmatpush.bf16.msra.mxu1 %v1187_v32 }
 0x1f6   : > { %1203 = vmatpush.bf16.msra.mxu1 %v1186_v33 }
 0x1f8   : > { %v1141_v12 = vpop.f32.mrf.mxu0 }
 0x1f9   : > { %v1158_v14 = vmul.f32 0.25, %v1141_v12  ;;  %v2626_v12 = vld [vmem:[%s4103_s8 + $0x48] sm:$0xff] }
 0x1fa   : > { %1204 = vmatpush.bf16.msra.mxu1 %v1185_v6 }
 0x1fb   : > { %v1160_v18 = vsel %vm3444_vm14, %v1158_v14, -1e+09 }
 0x1fc   : > { %v1163_v20 = vsel %vm1162_vm15, %v1160_v18, -inf }
 0x1fd   : > { %v1166_v21 = vmax.f32 %v1163_v20, %v1165_v16 }
 0x1fe   : > { %1217 = vmatpush.bf16.msrb.mxu1 %v1193_v53  ;;  %v2643_v53 = vld [vmem:[%s4109_s9 + $0x48] sm:$0xff] }
 0x1ff   : > { %1167 = vmax.xlane.f32.xlu0 %v1166_v21 }
 0x200   : > { %v1143_v22 = vpop.f32.mrf.mxu0 }
 0x208   : > { %v3452_v24 = vpop.f32.mrf.mxu0 }
 0x210   : > { %v1245_v19 = vpop.f32.mrf.mxu0 }
 0x272   : > { %v1168_v7 = vpop.xlane.xlu0 %1167 }
 0x273   : > { %v1169_v4 = vsub.f32 %v1160_v18, %v1168_v7  ;;  %v1170_v5 = vsub.f32 %v1161_v2, %v1168_v7  ;;  %v2625_v2 = vld [vmem:[%s4103_s8 + $0x40] sm:$0xff] }
 0x274   : > { %v1256_v14 = vpack.c.bf16 %v2626_v12, %v2625_v2 }
 0x275   : > { %v1171_v1 = vmul.f32 1.442695, %v1169_v4  ;;  %v1173_v3 = vmul.f32 1.442695, %v1170_v5  ;;  %v2648_v4 = vld [vmem:[%s4109_s9 + $0x70] sm:$0xff]  ;;  %v2649_v5 = vld [vmem:[%s4109_s9 + $0x78] sm:$0xff] }
 0x277   : > { %2825 = vpow2.f32 %v1171_v1  ;;  %v1326_v1 = vpack.c.bf16 %v2649_v5, %v2648_v4 }
 0x278   : > { %2827 = vpow2.f32 %v1173_v3  ;;  %v2646_v3 = vld [vmem:[%s4109_s9 + $0x60] sm:$0xff] }
 0x279   : > { %1331 = vmatpush.bf16.msrb.mxu0 %v1326_v1 }
 0x27d   : > { %v2826_v35 = vpop.eup %2825 }
 0x27e   : > { %v2828_v36 = vpop.eup %2827  ;;  %v1175_v41 = vsel %vm1162_vm15, %v2826_v35, 0.0 }
 0x27f   : > { %v1176_v44 = vsel %vm1164_vm13, %v2828_v36, 0.0 }
 0x280   : > { %v1177_v45 = vadd.f32 %v1176_v44, %v1175_v41  ;;  %v2644_v44 = vld [vmem:[%s4109_s9 + $0x50] sm:$0xff] }
 0x282   : > { %1178 = vadd.xlane.f32.xlu0 %v1177_v45  ;;  %v2645_v45 = vld [vmem:[%s4109_s9 + $0x58] sm:$0xff] }
 0x283   : > { %v1324_v39 = vpack.c.bf16 %v2645_v45, %v2644_v44 }
 0x2f5   : > { %v1179_v60 = vpop.xlane.xlu0 %1178 }
 0x2f6   : > { %2829 = vrcp.f32 %v1179_v60  ;;  %v1323_v60 = vpack.c.bf16 %v2643_v53, %v2642_v42 }
 0x2fc   : > { %v2830_v50 = vpop.eup %2829 }
 0x2fd   : > { %v1181_v51 = vmul.f32 %v2830_v50, %v2826_v35  ;;  %v1182_v15 = vmul.f32 %v2830_v50, %v2828_v36  ;;  %v2647_v35 = vld [vmem:[%s4109_s9 + $0x68] sm:$0xff]  ;;  %s2885_s9 = scalar_lea.hbm %s4062_s20, 8 }
 0x2fe   : > { %v1325_v36 = vpack.c.bf16 %v2647_v35, %v2646_v3 }
 0x2ff   : > { %v1183_v55 = vpack.c.bf16 %v1181_v51, %v1181_v51  ;;  %v1184_v16 = vpack.c.bf16 %v1182_v15, %v1182_v15 }
 0x300   : > { %1332 = vmatpush.bf16.msrb.mxu0 %v1325_v36 }
 0x301   : > { %1205 = vmatmul.bf16.vlgmr.msra.gmra.mxu1 %v1183_v55 }
 0x302   : > { %1264 = vmatpush.bf16.msra.mxu1 %v1259_v54 }
 0x304   : > { %1333 = vmatpush.bf16.msrb.mxu0 %v1324_v39 }
 0x306   : > { %1265 = vmatpush.bf16.msra.mxu1 %v1258_v56 }
 0x308   : > { %1334 = vmatpush.bf16.msrb.mxu0 %v1323_v60 }
 0x30a   : > { %1266 = vmatpush.bf16.msra.mxu1 %v1257_v61 }
 0x30b   : > { %2650 = vmatmul.msk.bf16.vlgmr.msrb.gmra.mxu0 %vm778_vm0, %v3200_v17 }
 0x30e   : > { %1267 = vmatpush.bf16.msra.mxu1 %v1256_v14 }
 0x311   : > { %2619 = vmatmul.msk.bf16.vlgmr.msrb.gmra.mxu1 %vm1101_vm4, %v1184_v16 }
 0x31b   : > { %2651 = vmatmul.msk.bf16.gmra.mxu0 %vm778_vm0, %v3228_v31 }
 0x321   : > { %2633 = vmatmul.msk.bf16.vlgmr.msra.gmra.mxu1 %vm778_vm0, %v3200_v17  ;;  %v1381_v17 = vpack.c.bf16 %v3452_v24, %v3452_v24 }
 0x32b   : > { %2652 = vmatmul.msk.bf16.gmra.mxu0 %vm778_vm0, %v3235_v34 }
 0x331   : > { %2634 = vmatmul.msk.bf16.gmra.mxu1 %vm778_vm0, %v3228_v31 }
 0x33b   : > { %2653 = vmatmul.msk.bf16.gmra.mxu0 %vm778_vm0, %v3241_v37 }
 0x341   : > { %2635 = vmatmul.msk.bf16.gmra.mxu1 %vm778_vm0, %v3235_v34 }
 0x34b   : > { %2654 = vmatmul.msk.bf16.gmra.mxu0 %vm778_vm0, %v3247_v40 }
 0x351   : > { %2636 = vmatmul.msk.bf16.gmra.mxu1 %vm778_vm0, %v3241_v37 }
 0x35b   : > { %2655 = vmatmul.msk.bf16.gmra.mxu0 %vm778_vm0, %v3253_v43 }
 0x361   : > { %2637 = vmatmul.msk.bf16.gmra.mxu1 %vm778_vm0, %v3247_v40 }
 0x36b   : > { %2656 = vmatmul.msk.bf16.gmra.mxu0 %vm778_vm0, %v3259_v46 }
 0x371   : > { %2638 = vmatmul.msk.bf16.gmra.mxu1 %vm778_vm0, %v3253_v43 }
 0x37b   : > { %2657 = vmatmul.msk.bf16.gmra.mxu0 %vm778_vm0, %v3265_v49 }
 0x37e   : > { %v1206_v18 = vpop.f32.mrf.mxu1 }
 0x381   : > { %2639 = vmatmul.msk.bf16.gmra.mxu1 %vm778_vm0, %v3259_v46 }
 0x386   : > { %v1208_v20 = vpop.f32.mrf.mxu1 }
 0x388   : > { %v1336_v34 = vpop.f32.mrf.mxu0 }
 0x38b   : > { %2658 = vmatmul.msk.bf16.gmra.mxu0 %vm778_vm0, %v3271_v52 }
 0x38e   : > { %v1219_v21 = vpop.f32.mrf.mxu1 }
 0x38f   : > { %v3495_v22 = vadd.f32 %v1219_v21, %v1206_v18 }
 0x390   : > { %v1338_v37 = vpop.f32.mrf.mxu0 }
 0x391   : > { %2640 = vmatmul.msk.bf16.gmra.mxu1 %vm778_vm0, %v3265_v49  ;;  %v1472_v44 = vpack.c.bf16 %v1338_v37, %v1336_v34  ;;  %v2668_v34 = vld [vmem:[%s4117_s11 + $0x30] sm:$0xff] }
 0x396   : > { %v1221_v23 = vpop.f32.mrf.mxu1 }
 0x398   : > { %v1341_v20 = vpop.f32.mrf.mxu0 }
 0x39e   : > { %v3499_v25 = vpop.f32.mrf.mxu1 }
 0x3a0   : > { %v1343_v21 = vpop.f32.mrf.mxu0 }
 0x3a1   : > { %2641 = vmatmul.msk.bf16.gmra.mxu1 %vm778_vm0, %v3271_v52 }
 0x3a6   : > { %v3503_v19 = vpop.f32.mrf.mxu1 }
 0x3a7   : > { %v1382_v24 = vpack.c.bf16 %v3503_v19, %v3499_v25 }
 0x3a8   : > { %v1346_v25 = vpop.f32.mrf.mxu0 }
 0x3a9   : > { %v1395_v18 = vsel %vm1101_vm4, %v1382_v24, 0  ;;  %v2663_v24 = vld [vmem:[%s4116_s10 + $0x18] sm:$0xff] }
 0x3ae   : > { %v1274_v26 = vpop.f32.mrf.mxu1 }
 0x3b0   : > { %v1348_v40 = vpop.f32.mrf.mxu0 }
 0x3b1   : > { %v1474_v36 = vpack.c.bf16 %v1348_v40, %v1346_v25 }
 0x3b6   : > { %v1276_v27 = vpop.f32.mrf.mxu1 }
 0x3b7   : > { %v1383_v15 = vpack.c.bf16 %v1276_v27, %v1274_v26 }
 0x3b8   : > { %v1351_v26 = vpop.f32.mrf.mxu0 }
 0x3b9   : > { %v1398_v16 = vsel %vm1101_vm4, %v1383_v15, 0  ;;  %v1225_v15 = vpack.c.bf16 %v3495_v22, %v3495_v22  ;;  %v2669_v22 = vld [vmem:[%s4117_s11 + $0x38] sm:$0xff] }
 0x3ba   : > { %v1592_v37 = vpack.c.bf16 %v2669_v22, %v2668_v34  ;;  %v1634_v34 = vld [vmem:[%s4119_s14 + $0x8] sm:$0xff] }
 0x3be   : > { %v1279_v28 = vpop.f32.mrf.mxu1 }
 0x3c0   : > { %v1353_v27 = vpop.f32.mrf.mxu0 }
 0x3c1   : > { %v1475_v43 = vpack.c.bf16 %v1353_v27, %v1351_v26 }
 0x3c6   : > { %v1281_v29 = vpop.f32.mrf.mxu1 }
 0x3c7   : > { %v1384_v14 = vpack.c.bf16 %v1281_v29, %v1279_v28 }
 0x3c8   : > { %v1356_v28 = vpop.f32.mrf.mxu0 }
 0x3c9   : > { %v1401_v31 = vsel %vm1101_vm4, %v1384_v14, 0 }
 0x3ce   : > { %v1284_v10 = vpop.f32.mrf.mxu1 }
 0x3d6   : > { %v1286_v11 = vpop.f32.mrf.mxu1 }
 0x3d7   : > { %v1385_v2 = vpack.c.bf16 %v1286_v11, %v1284_v10  ;;  %v1358_v11 = vpop.f32.mrf.mxu0 }
 0x3d8   : > { %v1476_v13 = vpack.c.bf16 %v1358_v11, %v1356_v28  ;;  %v2821_v28 = vld [vmem:[%s4118_s26] ss:$0 sm:$0xff]  ;;  %s2407_s26 = sshll.u32 %s2403_s23, 4  ;;  %s2408_s26 = int_to_ptr.hbm [resolvable:$true] %s2407_s26 }
 0x3d9   : > { %v1404_v12 = vsel %vm1101_vm4, %v1385_v2, 0  ;;  %s2879_s1 = sshra.s32 %s2408_s26, 4  ;;  %s2880_s1 = int_to_ptr.hbm [resolvable:$true] %s2879_s1 }
 0x3da   : > { %s2881_s0 = scalar_lea.hbm %s2880_s1, 4  ;;  %p2886_p0 = scmp.lt.s32.totalorder %s2880_s1, %s4062_s20 }
 0x3db   : > { %p2882_p11 = scmp.ne.s32.totalorder %s2880_s1, %s2881_s0  ;;  %p2887_p1 = scmp.lt.s32.totalorder %s2885_s9, %s2881_s0 }
 0x3dd   : > { %p2883_p12 = pnand %p2882_p11, %p3148_p5  ;;  %p2888_p2 = por %p2887_p1, %p2886_p0 }
 0x3de   : > { %v1289_v30 = vpop.f32.mrf.mxu1 }
 0x3df   : > { %p2884_p13 = pneg %p2883_p12 }
 0x3e1   : > { %p2889_p3 = pnand %p2888_p2, %p2884_p13 }
 0x3e6   : > { %v1291_v8 = vpop.f32.mrf.mxu1 }
 0x3e7   : > { %v1386_v9 = vpack.c.bf16 %v1291_v8, %v1289_v30 }
 0x3e9   : > { %v1407_v61 = vsel %vm1101_vm4, %v1386_v9, 0 }
 0x3ee   : > { %v1294_v32 = vpop.f32.mrf.mxu1 }
 0x3f6   : > { %v1296_v33 = vpop.f32.mrf.mxu1 }
 0x3f7   : > { %v1387_v57 = vpack.c.bf16 %v1296_v33, %v1294_v32  ;;  %v1361_v33 = vpop.f32.mrf.mxu0 }
 0x3f9   : > { %v1410_v59 = vsel %vm1101_vm4, %v1387_v57, 0 }
 0x3fe   : > { %v1299_v6 = vpop.f32.mrf.mxu1 }
 0x406   : > { %v1301_v7 = vpop.f32.mrf.mxu1 }
 0x407   : > { %v1388_v51 = vpack.c.bf16 %v1301_v7, %v1299_v6  ;;  %v1363_v6 = vpop.f32.mrf.mxu0 }
 0x408   : > { %v1477_v35 = vpack.c.bf16 %v1363_v6, %v1361_v33  ;;  %v2990_v6 = vmov 32.0  }
 0x409   : > { %v1413_v55 = vsel %vm1101_vm4, %v1388_v51, 0 }
 0x40e   : > { %v1304_v41 = vpop.f32.mrf.mxu1 }
 0x40f   : > { %v1366_v7 = vpop.f32.mrf.mxu0 }
 0x416   : > { %v1306_v48 = vpop.f32.mrf.mxu1 }
 0x417   : > { %v1389_v0 = vpack.c.bf16 %v1306_v48, %v1304_v41  ;;  %v1368_v4 = vpop.f32.mrf.mxu0  ;;  %v1473_v41 = vpack.c.bf16 %v1343_v21, %v1341_v20  ;;  %v2666_v20 = vld [vmem:[%s4117_s11 + $0x20] sm:$0xff]  ;;  %v2667_v21 = vld [vmem:[%s4117_s11 + $0x28] sm:$0xff] }
 0x418   : > { %v1478_v62 = vpack.c.bf16 %v1368_v4, %v1366_v7 }
 0x419   : > { %v1416_v50 = vsel %vm1101_vm4, %v1389_v0, 0 }
 0x41a   : > { %1421 = vmatpush.bf16.xpose.msrb.mxu3 %v1416_v50 }
 0x41e   : > { %v1309_v54 = vpop.f32.mrf.mxu1 }
 0x41f   : > { %v1371_v5 = vpop.f32.mrf.mxu0 }
 0x422   : > { %1422 = vmatpush.bf16.xpose.msrb.mxu3 %v1413_v55 }
 0x426   : > { %v1311_v47 = vpop.f32.mrf.mxu1 }
 0x427   : > { %v1390_v56 = vpack.c.bf16 %v1311_v47, %v1309_v54  ;;  %v1373_v1 = vpop.f32.mrf.mxu0 }
 0x428   : > { %v1479_v3 = vpack.c.bf16 %v1373_v1, %v1371_v5 }
 0x429   : > { %v1419_v58 = vsel %vm1101_vm4, %v1390_v56, 0  ;;  %v1223_v56 = vld [vmem:[%s4116_s10] sm:$0xff] }
 0x42a   : > { %1423 = vmatpush.bf16.xpose.msrb.mxu3 %v1410_v59  ;;  %1441 = vmatpush.bf16.xpose.msra.mxu2 %v1419_v58  ;;  %v1224_v58 = vld [vmem:[%s4116_s10 + $0x8] sm:$0xff] }
 0x42b   : > { %v1226_v59 = vpack.c.bf16 %v1224_v58, %v1223_v56 }
 0x42f   : > { %v1376_v55 = vpop.f32.mrf.mxu0 }
 0x431   : > { %2660 = vmatmul.msk.bf16.vlgmr.msra.gmra.mxu2 %vm1101_vm4, %v1381_v17 }
 0x432   : > { %1424 = vmatpush.bf16.xpose.msrb.mxu3 %v1407_v61 }
 0x437   : > { %v1378_v57 = vpop.f32.mrf.mxu0 }
 0x438   : > { %v1480_v47 = vpack.c.bf16 %v1378_v57, %v1376_v55 }
 0x43a   : > { %1425 = vmatpush.bf16.xpose.msrb.mxu3 %v1404_v12  ;;  %1504 = vmatpush.bf16.msrb.mxu2 %v1480_v47 }
 0x442   : > { %1426 = vmatpush.bf16.xpose.msrb.mxu3 %v1401_v31 }
 0x44a   : > { %1427 = vmatpush.bf16.xpose.msrb.mxu3 %v1398_v16  ;;  %v2662_v16 = vld [vmem:[%s4116_s10 + $0x10] sm:$0xff] }
 0x452   : > { %1428 = vmatpush.bf16.xpose.msrb.mxu3 %v1395_v18  ;;  %v1514_v18 = vpack.c.bf16 %v2663_v24, %v2662_v16  ;;  %v1678_v16 = vld [vmem:[%s4058_s16 + $0x18] sm:$0xff] }
 0x454   : > { %1525 = vmatpush.bf16.msra.mxu2 %v1514_v18  ;;  %v1633_v18 = vld [vmem:[%s4119_s14] sm:$0xff] }
 0x455   : > { %v1638_v22 = vpack.c.bf16 %v1634_v34, %v1633_v18 }
 0x459   : > { %2659 = vmatmul.msk.bf16.vlgmr.msrb.gmra.mxu3 %vm1101_vm4, %v1381_v17 }
 0x45a   : > { %1484 = vmatpush.bf16.msra.mxu3 %v1479_v3 }
 0x45e   : > { %1485 = vmatpush.bf16.msra.mxu3 %v1478_v62 }
 0x462   : > { %1486 = vmatpush.bf16.msra.mxu3 %v1477_v35 }
 0x466   : > { %1487 = vmatpush.bf16.msra.mxu3 %v1476_v13 }
 0x46a   : > { %1488 = vmatpush.bf16.msra.mxu3 %v1475_v43 }
 0x46e   : > { %1489 = vmatpush.bf16.msra.mxu3 %v1474_v36 }
 0x472   : > { %1490 = vmatpush.bf16.msra.mxu3 %v1473_v41  ;;  %v1580_v41 = vld [vmem:[%s4117_s11 + $0x10] sm:$0xff] }
 0x476   : > { %1491 = vmatpush.bf16.msra.mxu3 %v1472_v44  ;;  %v1581_v44 = vld [vmem:[%s4117_s11 + $0x18] sm:$0xff] }
 0x47a   : > { %1541 = vmatpush.bf16.msrb.mxu3 %v1226_v59 }
 0x4b4   : > { %v1443_v23 = vpop.f32.mrf.mxu2 }
 0x4b5   : > { %v1448_v29 = vmul.f32 0.25, %v1443_v23  ;;  %v1591_v23 = vpack.c.bf16 %v2667_v21, %v2666_v20  ;;  %v1657_v20 = vld [vmem:[%s4057_s15 + $0x8] sm:$0xff]  ;;  %v1675_v21 = vld [vmem:[%s4058_s16] sm:$0xff] }
 0x4b7   : > { %v1450_v49 = vsel %vm3438_vm10, %v1448_v29, -1e+09  ;;  %v883_v29 = vadd.f32 %v2821_v28, %v3436_v38  ;;  %v2685_v28 = vld [vmem:[%s4057_s15 + $0x38] sm:$0xff]  ;;  %vm1730_vm10 = vcmask 31744  }
 0x4b8   : > { %v1452_v8 = vsel %vm1164_vm13, %v1450_v49, -inf }
 0x4bc   : > { %v1445_v19 = vpop.f32.mrf.mxu2 }
 0x4dc   : > { %v1430_v46 = vpop.f32.mrf.mxu3 }
 0x4dd   : > { %v1447_v10 = vmul.f32 0.25, %v1430_v46 }
 0x4df   : > { %v1449_v52 = vsel %vm3444_vm14, %v1447_v10, -1e+09  ;;  %v1590_v10 = vpack.c.bf16 %v883_v29, %v883_v29  ;;  %v2677_v29 = vld [vmem:[%s4119_s14 + $0x20] sm:$0xff] }
 0x4e0   : > { %v1451_v30 = vsel %vm1162_vm15, %v1449_v52, -inf }
 0x4e1   : > { %v1453_v9 = vmax.f32 %v1451_v30, %v1452_v8 }
 0x4e3   : > { %1454 = vmax.xlane.f32.xlu1 %v1453_v9 }
 0x4e4   : > { %v1432_v32 = vpop.f32.mrf.mxu3 }
 0x556   : > { %v1455_v45 = vpop.xlane.xlu1 %1454 }
 0x557   : > { %v1456_v39 = vsub.f32 %v1449_v52, %v1455_v45  ;;  %v1457_v42 = vsub.f32 %v1450_v49, %v1455_v45  ;;  %v1584_v45 = vpack.c.bf16 %v1581_v44, %v1580_v41 }
 0x559   : > { %v1458_v53 = vmul.f32 1.442695, %v1456_v39  ;;  %v1460_v60 = vmul.f32 1.442695, %v1457_v42  ;;  %v1578_v39 = vld [vmem:[%s4117_s11] sm:$0xff]  ;;  %v1579_v42 = vld [vmem:[%s4117_s11 + $0x8] sm:$0xff] }
 0x55b   : > { %2831 = vpow2.f32 %v1458_v53  ;;  %v1583_v53 = vpack.c.bf16 %v1579_v42, %v1578_v39 }
 0x55c   : > { %2833 = vpow2.f32 %v1460_v60  ;;  %v1658_v60 = vld [vmem:[%s4057_s15 + $0x10] sm:$0xff] }
 0x561   : > { %v2832_v48 = vpop.eup %2831 }
 0x562   : > { %v2834_v0 = vpop.eup %2833  ;;  %v1462_v50 = vsel %vm1162_vm15, %v2832_v48, 0.0 }
 0x563   : > { %v1463_v51 = vsel %vm1164_vm13, %v2834_v0, 0.0 }
 0x564   : > { %v1464_v54 = vadd.f32 %v1463_v51, %v1462_v50 }
 0x566   : > { %1465 = vadd.xlane.f32.xlu1 %v1464_v54 }
 0x5d9   : > { %v1466_v17 = vpop.xlane.xlu1 %1465 }
 0x5da   : > { %2835 = vrcp.f32 %v1466_v17 }
 0x5db   : > { %2837 = vrcp.f32 %v2990_v6  ;;  %v1631_v6 = vld [vmem:[%s4121_s13] sm:$0xf] }
 0x5e0   : > { %v2836_v61 = vpop.eup %2835 }
 0x5e1   : > { %v1468_v2 = vmul.f32 %v2836_v61, %v2832_v48  ;;  %v1469_v12 = vmul.f32 %v2836_v61, %v2834_v0  ;;  %v2838_v38 = vpop.eup %2837  ;;  %v1659_v48 = vld [vmem:[%s4057_s15 + $0x18] sm:$0xff] }
 0x5e2   : > { %v1553_v7 = vmul.f32 32.0, %v2838_v38  ;;  %vm1557_vm3 = vweird.f32 %v2838_v38  ;;  %v1661_v0 = vpack.c.bf16 %v1659_v48, %v1658_v60 }
 0x5e3   : > { %v1471_v14 = vpack.c.bf16 %v1469_v12, %v1469_v12  ;;  %v1470_v31 = vpack.c.bf16 %v1468_v2, %v1468_v2  ;;  %v1635_v12 = vld [vmem:[%s4119_s14 + $0x10] sm:$0xff] }
 0x5e4   : > { %v1554_v4 = vsub.f32 1.0, %v1553_v7  ;;  %1668 = vmatpush.bf16.msrb.mxu1 %v1661_v0 }
 0x5e5   : > { %1492 = vmatmul.bf16.vlgmr.msra.gmra.mxu3 %v1470_v31  ;;  %2661 = vmatmul.msk.bf16.vlgmr.msrb.gmra.mxu2 %vm1101_vm4, %v1471_v14  ;;  %v1636_v14 = vld [vmem:[%s4119_s14 + $0x18] sm:$0xff]  ;;  %v1677_v31 = vld [vmem:[%s4058_s16 + $0x10] sm:$0xff] }
 0x5e6   : > { %1602 = vmatpush.bf16.msrb.mxu2 %v1592_v37  ;;  %v1555_v5 = vmul.f32 %v2838_v38, %v1554_v4  ;;  %1618 = vmatpush.bf16.msra.mxu3 %v1584_v45  ;;  %v1680_v24 = vpack.c.bf16 %v1678_v16, %v1677_v31  ;;  %v1656_v37 = vld [vmem:[%s4057_s15] sm:$0xff] }
 0x5e8   : > { %v1556_v1 = vadd.f32 %v2838_v38, %v1555_v5 }
 0x5ea   : > { %1603 = vmatpush.bf16.msrb.mxu2 %v1591_v23  ;;  %v3608_v3 = vsel %vm1557_vm3, %v2838_v38, %v1556_v1  ;;  %1619 = vmatpush.bf16.msra.mxu3 %v1583_v53  ;;  %v1660_v23 = vpack.c.bf16 %v1657_v20, %v1656_v37  ;;  %v2690_v1 = vld [vmem:[%s4058_s16 + $0x38] sm:$0xff] }
 0x5ec   : > { %1669 = vmatpush.bf16.msrb.mxu1 %v1660_v23 }
 0x5f5   : > { %2665 = vmatmul.msk.bf16.vlgmr.msrb.gmra.mxu3 %vm1101_vm4, %v1225_v15  ;;  %v1639_v15 = vpack.c.bf16 %v1636_v14, %v1635_v12 }
 0x5f6   : > { %1687 = vmatpush.bf16.msrb.mxu3 %v1680_v24 }
 0x668   : > { %v1493_v25 = vpop.f32.mrf.mxu3  ;;  %v1506_v19 = vpop.f32.mrf.mxu2 }
 0x669   : > { %v1507_v40 = vadd.f32 %v1506_v19, %v1493_v25  ;;  %v1676_v25 = vld [vmem:[%s4058_s16 + $0x8] sm:$0xff] }
 0x66a   : > { %v1679_v19 = vpack.c.bf16 %v1676_v25, %v1675_v21  ;;  %v1751_v25 = vld [vmem:[%s4059_s17] sm:$0xff] }
 0x66b   : > { %v1513_v26 = vpack.c.bf16 %v1507_v40, %v1507_v40  ;;  %v2679_v40 = vld [vmem:[%s4119_s14 + $0x30] sm:$0xff] }
 0x66c   : > { %1688 = vmatpush.bf16.msrb.mxu3 %v1679_v19  ;;  %v1752_v19 = vld [vmem:[%s4059_s17 + $0x8] sm:$0xff] }
 0x66d   : > { %2664 = vmatmul.msk.bf16.vlgmr.msra.gmra.mxu2 %vm1101_vm4, %v1513_v26  ;;  %v2680_v26 = vld [vmem:[%s4119_s14 + $0x38] sm:$0xff] }
 0x66e   : > { %1649 = vmatpush.bf16.msra.mxu2 %v1639_v15 }
 0x670   : > { %v1495_v27 = vpop.f32.mrf.mxu3  ;;  %v1508_v43 = vpop.f32.mrf.mxu2 }
 0x671   : > { %v2684_v27 = vld [vmem:[%s4057_s15 + $0x30] sm:$0xff]  ;;  %v1761_v43 = vpack.c.bf16 %v2680_v26, %v2679_v40  ;;  %v1754_v40 = vpack.c.bf16 %v1752_v19, %v1751_v25  ;;  %v1953_v19 = vld [vmem:[%s4061_s19] sm:$0xff] }
 0x672   : > { %1650 = vmatpush.bf16.msra.mxu2 %v1638_v22 }
 0x673   : > { %1768 = vmatpush.bf16.msra.mxu1 %v1761_v43 }
 0x678   : > { %v1543_v46 = vpop.f32.mrf.mxu3 }
 0x67d   : > { %2670 = vmatmul.msk.bf16.vlgmr.msrb.gmra.mxu2 %vm906_vm1, %v1590_v10  ;;  %v1781_v10 = vpack.c.bf16 %v2685_v28, %v2684_v27 }
 0x680   : > { %v1545_v49 = vpop.f32.mrf.mxu3 }
 0x681   : > { %v2682_v49 = vld [vmem:[%s4057_s15 + $0x20] sm:$0xff] }
 0x6f0   : > { %v1527_v11 = vpop.f32.mrf.mxu2 }
 0x6f1   : > { %v1544_v52 = vadd.f32 %v1543_v46, %v1527_v11  ;;  %v2678_v46 = vld [vmem:[%s4119_s14 + $0x28] sm:$0xff] }
 0x6f2   : > { %v2683_v11 = vld [vmem:[%s4057_s15 + $0x28] sm:$0xff] }
 0x6f3   : > { %v1547_v30 = vadd.f32 %v1544_v52, %v3294_v63  ;;  %v1760_v52 = vpack.c.bf16 %v2678_v46, %v2677_v29 }
 0x6f5   : > { %v1549_v8 = vsel %vm1548_vm2, %v1547_v30, 0.0  ;;  %1769 = vmatpush.bf16.msra.mxu1 %v1760_v52 }
 0x6f6   : > { %1550 = vadd.xlane.f32.xlu2 %v1549_v8  ;;  %v2822_v8 = vld [vmem:[%s4120_s12] ss:$0 sm:$0xff] }
 0x6f8   : > { %v1529_v9 = vpop.f32.mrf.mxu2 }
 0x700   : > { %v3606_v32 = vpop.f32.mrf.mxu2 }
 0x708   : > { %v1607_v33 = vpop.f32.mrf.mxu2 }
 0x769   : > { %v1551_v62 = vpop.xlane.xlu2 %1550 }
 0x76a   : > { %v1559_v63 = vmul.f32 %v3608_v3, %v1551_v62 }
 0x76c   : > { %v1560_v35 = vsub.f32 %v1547_v30, %v1559_v63  ;;  %v1780_v30 = vpack.c.bf16 %v2683_v11, %v2682_v49 }
 0x76e   : > { %v1561_v13 = vmul.f32 %v1560_v35, %v1560_v35 }
 0x770   : > { %v1562_v36 = vsel %vm1548_vm2, %v1561_v13, 0.0  ;;  %v2687_v13 = vld [vmem:[%s4058_s16 + $0x20] sm:$0xff] }
 0x771   : > { %1563 = vadd.xlane.f32.xlu2 %v1562_v36  ;;  %v2688_v36 = vld [vmem:[%s4058_s16 + $0x28] sm:$0xff] }
 0x772   : > { %v1800_v44 = vpack.c.bf16 %v2688_v36, %v2687_v13 }
 0x7e4   : > { %v1564_v50 = vpop.xlane.xlu2 %1563 }
 0x7e5   : > { %v1565_v51 = vmul.f32 %v1564_v50, %v3608_v3 }
 0x7e7   : > { %v1566_v54 = vadd.f32 1e-05, %v1565_v51 }
 0x7e9   : > { %2839 = vrsqrt.f32 %v1566_v54  ;;  %vm1573_vm6 = vweird.f32 %v1566_v54 }
 0x7ef   : > { %v2840_v55 = vpop.eup %2839 }
 0x7f0   : > { %v1568_v57 = vmul.f32 %v2840_v55, %v1566_v54  ;;  %vm1574_vm5 = vweird.f32 %v2840_v55 }
 0x7f1   : > { %vm1575_vm7 = vmor %vm1573_vm6, %vm1574_vm5 }
 0x7f2   : > { %v1569_v47 = vmul.f32 %v2840_v55, %v1568_v57 }
 0x7f4   : > { %v1570_v56 = vmul.f32 0.5, %v1569_v47 }
 0x7f6   : > { %v1571_v58 = vsub.f32 1.5, %v1570_v56 }
 0x7f8   : > { %v1572_v59 = vmul.f32 %v2840_v55, %v1571_v58 }
 0x7fa   : > { %v1576_v17 = vsel %vm1575_vm7, %v2840_v55, %v1572_v59 }
 0x7fb   : > { %v1577_v61 = vmul.f32 %v1576_v17, %v1560_v35 }
 0x7fd   : > { %v1582_v2 = vpack.c.bf16 %v1577_v61, %v1577_v61 }
 0x7ff   : > { %2671 = vmatmul.msk.bf16.vlgmr.msra.gmra.mxu3 %vm906_vm1, %v1582_v2 }
 0x800   : > { %1788 = vmatpush.bf16.msra.mxu3 %v1781_v10 }
 0x804   : > { %1789 = vmatpush.bf16.msra.mxu3 %v1780_v30 }
 0x882   : > { %v1621_v9 = vpop.f32.mrf.mxu3 }
 0x883   : > { %v1622_v33 = vadd.f32 %v1621_v9, %v3606_v32  ;;  %v2689_v32 = vld [vmem:[%s4058_s16 + $0x30] sm:$0xff] }
 0x884   : > { %v1801_v35 = vpack.c.bf16 %v2690_v1, %v2689_v32  ;;  %v2694_v32 = vld [vmem:[%s4059_s17 + $0x10] sm:$0xff]  ;;  %v2695_v1 = vld [vmem:[%s4059_s17 + $0x18] sm:$0xff] }
 0x885   : > { %v1629_v38 = vadd.f32 %v2822_v8, %v1622_v33 }
 0x887   : > { %v3697_v7 = vadd.f32 %v1631_v6, %v1629_v38  ;;  %1630 = vst.msk [vmem:[%s3701_s3] sm:$0xf] %vm1548_vm2, %v1629_v38 }
 0x889   : > { %v1637_v4 = vpack.c.bf16 %v3697_v7, %v3697_v7 }
 0x88a   : > { %v1623_v5 = vpop.f32.mrf.mxu3 }
 0x88b   : > { %2672 = vmatmul.msk.bf16.vlgmr.msra.gmra.mxu2 %vm906_vm1, %v1637_v4  ;;  %2673 = vmatmul.msk.bf16.vlgmr.msrb.gmra.mxu1 %vm906_vm1, %v1637_v4 }
 0x88c   : > { %2674 = vmatmul.msk.bf16.vlgmr.msrb.gmra.mxu3 %vm906_vm1, %v1637_v4 }
 0x89b   : > { %2681 = vmatmul.msk.bf16.vlgmr.msra.gmra.mxu1 %vm906_vm1, %v1637_v4 }
 0x89c   : > { %2686 = vmatmul.msk.bf16.vlgmr.msra.gmra.mxu3 %vm906_vm1, %v1637_v4 }
 0x908   : > { %v1671_v62 = vpop.f32.mrf.mxu1 }
 0x909   : > { %v1695_v63 = vpack.c.bf16 %v1671_v62, %v1671_v62  ;;  %v1873_v62 = vpack.c.bf16 %v2695_v1, %v2694_v32  ;;  %v2708_v32 = vld [vmem:[%s4057_s15 + $0x58] sm:$0xff]  ;;  %v2712_v1 = vld [vmem:[%s4058_s16 + $0x50] sm:$0xff] }
 0x90b   : > { %v1700_v41 = vsel %vm1101_vm4, %v1695_v63, 0  ;;  %1884 = vmatpush.bf16.msrb.mxu3 %v1873_v62  ;;  %v2713_v62 = vld [vmem:[%s4058_s16 + $0x58] sm:$0xff] }
 0x90c   : > { %1709 = vmatpush.bf16.xpose.msrb.mxu2 %v1700_v41 }
 0x90e   : > { %v1652_v45 = vpop.f32.mrf.mxu2 }
 0x90f   : > { %v1690_v39 = vpop.f32.mrf.mxu3  ;;  %v1694_v60 = vpack.c.bf16 %v1652_v45, %v1652_v45 }
 0x910   : > { %v1729_v42 = vpack.c.bf16 %v1690_v39, %v1690_v39  ;;  %v1673_v53 = vpop.f32.mrf.mxu1 }
 0x912   : > { %v1736_v48 = vsel %vm1734_vm8, %v1729_v42, 0 }
 0x913   : > { %1745 = vmatpush.bf16.msra.mxu0 %v1736_v48  ;;  %2675 = vmatmul.msk.bf16.vlgmr.msrb.gmra.mxu2 %vm1101_vm4, %v1694_v60 }
 0x914   : > { %1808 = vmatpush.bf16.msra.mxu2 %v1801_v35 }
 0x916   : > { %v1654_v0 = vpop.f32.mrf.mxu2 }
 0x917   : > { %v1692_v50 = vpop.f32.mrf.mxu3 }
 0x918   : > { %1809 = vmatpush.bf16.msra.mxu2 %v1800_v44  ;;  %v1771_v51 = vpop.f32.mrf.mxu1  ;;  %v1931_v50 = vld [vmem:[%s4060_s18 + $0x10] sm:$0xff] }
 0x919   : > { %v1815_v23 = vpack.c.bf16 %v1771_v51, %v1771_v51 }
 0x91c   : > { %1900 = vmatpush.bf16.msrb.mxu2 %v1754_v40  ;;  %v1954_v40 = vld [vmem:[%s4061_s19 + $0x8] sm:$0xff] }
 0x91f   : > { %v1791_v54 = vpop.f32.mrf.mxu3 }
 0x920   : > { %v1816_v55 = vpack.c.bf16 %v1791_v54, %v1791_v54  ;;  %v1773_v57 = vpop.f32.mrf.mxu1  ;;  %v1929_v54 = vld [vmem:[%s4060_s18] sm:$0xff] }
 0x922   : > { %v1821_v47 = vsel %vm1101_vm4, %v1816_v55, 0  ;;  %v1930_v55 = vld [vmem:[%s4060_s18 + $0x8] sm:$0xff] }
 0x923   : > { %1830 = vmatpush.bf16.xpose.msrb.mxu0 %v1821_v47  ;;  %2691 = vmatmul.msk.bf16.vlgmr.msra.gmra.mxu2 %vm906_vm1, %v1637_v4  ;;  %v1934_v57 = vpack.c.bf16 %v1930_v55, %v1929_v54  ;;  %v1959_v47 = vld [vmem:[%s4061_s19 + $0x30] sm:$0xff]  ;;  %v2719_v54 = vld [vmem:[%s4119_s14 + $0x60] sm:$0xff]  ;;  %v2720_v55 = vld [vmem:[%s4119_s14 + $0x68] sm:$0xff] }
 0x927   : > { %v1793_v56 = vpop.f32.mrf.mxu3 }
 0x928   : > { %v1960_v56 = vld [vmem:[%s4061_s19 + $0x38] sm:$0xff] }
 0x996   : > { %v1711_v58 = vpop.f32.mrf.mxu2 }
 0x997   : > { %v1715_v59 = vmul.f32 0.25, %v1711_v58  ;;  %v1957_v58 = vld [vmem:[%s4061_s19 + $0x20] sm:$0xff] }
 0x999   : > { %v1717_v17 = vsel %vm1716_vm9, %v1715_v59, -inf }
 0x99a   : > { %1718 = vmax.xlane.f32.xlu0 %v1717_v17  ;;  %v1958_v17 = vld [vmem:[%s4061_s19 + $0x28] sm:$0xff] }
 0x99e   : > { %v1713_v61 = vpop.f32.mrf.mxu2 }
 0x99f   : > { %v1964_v61 = vpack.c.bf16 %v1958_v17, %v1957_v58  ;;  %v2133_v58 = vpack.c.bf16 %v2720_v55, %v2719_v54 }
 0x9a6   : > { %v1811_v2 = vpop.f32.mrf.mxu2 }
 0x9a7   : > { %v1849_v12 = vpack.c.bf16 %v1811_v2, %v1811_v2  ;;  %v1955_v2 = vld [vmem:[%s4061_s19 + $0x10] sm:$0xff] }
 0x9a9   : > { %v1854_v14 = vsel %vm1734_vm8, %v1849_v12, 0  ;;  %v1956_v12 = vld [vmem:[%s4061_s19 + $0x18] sm:$0xff] }
 0x9aa   : > { %1863 = vmatpush.bf16.msrb.mxu1 %v1854_v14 }
 0x9ae   : > { %v1813_v31 = vpop.f32.mrf.mxu2 }
 0xa0d   : > { %v1719_v15 = vpop.xlane.xlu0 %1718 }
 0xa0e   : > { %v1720_v16 = vsub.f32 %v1715_v59, %v1719_v15  ;;  %v1965_v59 = vpack.c.bf16 %v1960_v56, %v1959_v47  ;;  %v1963_v15 = vpack.c.bf16 %v1956_v12, %v1955_v2  ;;  %v2724_v47 = vld [vmem:[%s4057_s15 + $0x60] sm:$0xff]  ;;  %v2725_v56 = vld [vmem:[%s4057_s15 + $0x68] sm:$0xff] }
 0xa0f   : > { %v2153_v17 = vpack.c.bf16 %v2725_v56, %v2724_v47 }
 0xa10   : > { %v1721_v24 = vmul.f32 1.442695, %v1720_v16  ;;  %1973 = vmatpush.bf16.msra.mxu1 %v1965_v59 }
 0xa12   : > { %2841 = vpow2.f32 %v1721_v24 }
 0xa14   : > { %1974 = vmatpush.bf16.msra.mxu1 %v1964_v61 }
 0xa18   : > { %v2842_v18 = vpop.eup %2841  ;;  %1975 = vmatpush.bf16.msra.mxu1 %v1963_v15 }
 0xa19   : > { %v1723_v34 = vsel %vm1716_vm9, %v2842_v18, 0.0 }
 0xa1a   : > { %1724 = vadd.xlane.f32.xlu1 %v1723_v34 }
 0xa8d   : > { %v1725_v22 = vpop.xlane.xlu1 %1724 }
 0xa8e   : > { %2843 = vrcp.f32 %v1725_v22 }
 0xa94   : > { %v2844_v37 = vpop.eup %2843 }
 0xa95   : > { %v1727_v20 = vmul.f32 %v2844_v37, %v2842_v18 }
 0xa97   : > { %v1728_v21 = vpack.c.bf16 %v1727_v20, %v1727_v20 }
 0xa99   : > { %2676 = vmatmul.msk.bf16.vlgmr.msra.gmra.mxu0 %vm1730_vm10, %v1728_v21 }
 0xaa9   : > { %2692 = vmatmul.msk.bf16.vlgmr.msrb.gmra.mxu0 %vm1101_vm4, %v1815_v23 }
 0xb16   : > { %v1747_v26 = vpop.f32.mrf.mxu0 }
 0xb17   : > { %v1753_v27 = vpack.c.bf16 %v1747_v26, %v1747_v26  ;;  %v1962_v26 = vpack.c.bf16 %v1954_v40, %v1953_v19 }
 0xb19   : > { %2697 = vmatmul.msk.bf16.vlgmr.msrb.gmra.mxu2 %vm1101_vm4, %v1753_v27  ;;  %1976 = vmatpush.bf16.msra.mxu1 %v1962_v26 }
 0xb1e   : > { %v1749_v43 = vpop.f32.mrf.mxu0 }
 0xb26   : > { %v1832_v28 = vpop.f32.mrf.mxu0 }
 0xb27   : > { %v1836_v29 = vmul.f32 0.25, %v1832_v28 }
 0xb29   : > { %v1837_v46 = vsel %vm1716_vm9, %v1836_v29, -inf }
 0xb2a   : > { %1838 = vmax.xlane.f32.xlu2 %v1837_v46 }
 0xb2e   : > { %v1834_v10 = vpop.f32.mrf.mxu0 }
 0xb9c   : > { %v1902_v49 = vpop.f32.mrf.mxu2 }
 0xb9d   : > { %v1839_v11 = vpop.xlane.xlu2 %1838 }
 0xb9e   : > { %v1840_v52 = vsub.f32 %v1836_v29, %v1839_v11 }
 0xba0   : > { %v1841_v30 = vmul.f32 1.442695, %v1840_v52 }
 0xba2   : > { %2845 = vpow2.f32 %v1841_v30 }
 0xba4   : > { %v1904_v8 = vpop.f32.mrf.mxu2 }
 0xba8   : > { %v2846_v9 = vpop.eup %2845 }
 0xba9   : > { %v1843_v33 = vsel %vm1716_vm9, %v2846_v9, 0.0 }
 0xbaa   : > { %1844 = vadd.xlane.f32.xlu0 %v1843_v33 }
 0xc1d   : > { %v1845_v6 = vpop.xlane.xlu0 %1844 }
 0xc1e   : > { %2847 = vrcp.f32 %v1845_v6  ;;  %v2702_v6 = vld [vmem:[%s4119_s14 + $0x50] sm:$0xff] }
 0xc24   : > { %v2848_v38 = vpop.eup %2847 }
 0xc25   : > { %v1847_v4 = vmul.f32 %v2848_v38, %v2846_v9  ;;  %v2703_v38 = vld [vmem:[%s4119_s14 + $0x58] sm:$0xff] }
 0xc27   : > { %v1848_v5 = vpack.c.bf16 %v1847_v4, %v1847_v4  ;;  %v2707_v4 = vld [vmem:[%s4057_s15 + $0x50] sm:$0xff] }
 0xc29   : > { %2693 = vmatmul.msk.bf16.vlgmr.msrb.gmra.mxu1 %vm1730_vm10, %v1848_v5  ;;  %v2011_v5 = vpack.c.bf16 %v2703_v38, %v2702_v6 }
 0xc2b   : > { %2021 = vmatpush.bf16.msra.mxu3 %v2011_v5 }
 0xca6   : > { %v1865_v63 = vpop.f32.mrf.mxu1 }
 0xca7   : > { %v1872_v35 = vpack.c.bf16 %v1865_v63, %v1865_v63  ;;  %v2034_v63 = vpack.c.bf16 %v2708_v32, %v2707_v4 }
 0xca9   : > { %2696 = vmatmul.msk.bf16.vlgmr.msrb.gmra.mxu3 %vm1101_vm4, %v1872_v35  ;;  %v2054_v35 = vpack.c.bf16 %v2713_v62, %v2712_v1  ;;  %2041 = vmatpush.bf16.msra.mxu2 %v2034_v63 }
 0xcae   : > { %v1867_v13 = vpop.f32.mrf.mxu1 }
 0xcaf   : > { %v2700_v13 = vld [vmem:[%s4119_s14 + $0x40] sm:$0xff] }
 0xd2c   : > { %v1886_v36 = vpop.f32.mrf.mxu3 }
 0xd2d   : > { %v1903_v41 = vadd.f32 %v1902_v49, %v1886_v36  ;;  %v2701_v36 = vld [vmem:[%s4119_s14 + $0x48] sm:$0xff] }
 0xd2f   : > { %v1906_v44 = vadd.f32 %v1903_v41, %v3697_v7  ;;  %v1932_v7 = vld [vmem:[%s4060_s18 + $0x18] sm:$0xff]  ;;  %v2705_v41 = vld [vmem:[%s4057_s15 + $0x40] sm:$0xff] }
 0xd30   : > { %v1935_v51 = vpack.c.bf16 %v1932_v7, %v1931_v50  ;;  %v2726_v50 = vld [vmem:[%s4057_s15 + $0x70] sm:$0xff] }
 0xd31   : > { %v1907_v45 = vsel %vm1548_vm2, %v1906_v44, 0.0 }
 0xd32   : > { %1908 = vadd.xlane.f32.xlu1 %v1907_v45  ;;  %1945 = vmatpush.bf16.msra.mxu0 %v1935_v51  ;;  %v2706_v45 = vld [vmem:[%s4057_s15 + $0x48] sm:$0xff]  ;;  %v2727_v51 = vld [vmem:[%s4057_s15 + $0x78] sm:$0xff] }
 0xd34   : > { %v1888_v39 = vpop.f32.mrf.mxu3 }
 0xd35   : > { %v2710_v39 = vld [vmem:[%s4058_s16 + $0x40] sm:$0xff] }
 0xd36   : > { %1946 = vmatpush.bf16.msra.mxu0 %v1934_v57  ;;  %v2154_v57 = vpack.c.bf16 %v2727_v51, %v2726_v50  ;;  %v2717_v50 = vld [vmem:[%s4059_s17 + $0x20] sm:$0xff] }
 0xd3a   : > { %2061 = vmatpush.bf16.msrb.mxu0 %v2054_v35 }
 0xda5   : > { %v1909_v42 = vpop.xlane.xlu1 %1908 }
 0xda6   : > { %v1910_v53 = vmul.f32 %v1909_v42, %v3608_v3  ;;  %v2711_v42 = vld [vmem:[%s4058_s16 + $0x48] sm:$0xff] }
 0xda8   : > { %v1911_v60 = vsub.f32 %v1906_v44, %v1910_v53  ;;  %v2010_v44 = vpack.c.bf16 %v2701_v36, %v2700_v13  ;;  %v2033_v53 = vpack.c.bf16 %v2706_v45, %v2705_v41 }
 0xdaa   : > { %v1912_v48 = vmul.f32 %v1911_v60, %v1911_v60  ;;  %2022 = vmatpush.bf16.msra.mxu3 %v2010_v44  ;;  %2042 = vmatpush.bf16.msra.mxu2 %v2033_v53 }
 0xdac   : > { %v1913_v0 = vsel %vm1548_vm2, %v1912_v48, 0.0  ;;  %v2721_v48 = vld [vmem:[%s4119_s14 + $0x70] sm:$0xff] }
 0xdad   : > { %1914 = vadd.xlane.f32.xlu2 %v1913_v0  ;;  %v2722_v0 = vld [vmem:[%s4119_s14 + $0x78] sm:$0xff] }
 0xdae   : > { %v2134_v7 = vpack.c.bf16 %v2722_v0, %v2721_v48 }
 0xdb0   : > { %2141 = vmatpush.bf16.msrb.mxu2 %v2134_v7  ;;  %v2718_v7 = vld [vmem:[%s4059_s17 + $0x28] sm:$0xff] }
 0xdb1   : > { %v2127_v51 = vpack.c.bf16 %v2718_v7, %v2717_v50  ;;  %v2746_v7 = vld [vmem:[%s4061_s19 + $0x40] sm:$0xff] }
 0xdb4   : > { %2142 = vmatpush.bf16.msrb.mxu2 %v2133_v58 }
 0xe20   : > { %v1915_v14 = vpop.xlane.xlu2 %1914 }
 0xe21   : > { %v1916_v31 = vmul.f32 %v1915_v14, %v3608_v3 }
 0xe23   : > { %v1917_v16 = vadd.f32 1e-05, %v1916_v31 }
 0xe25   : > { %2849 = vrsqrt.f32 %v1917_v16  ;;  %vm1924_vm12 = vweird.f32 %v1917_v16 }
 0xe2b   : > { %v2850_v24 = vpop.eup %2849 }
 0xe2c   : > { %v1919_v18 = vmul.f32 %v2850_v24, %v1917_v16  ;;  %vm1925_vm11 = vweird.f32 %v2850_v24 }
 0xe2d   : > { %vm1926_vm13 = vmor %vm1924_vm12, %vm1925_vm11 }
 0xe2e   : > { %v1920_v34 = vmul.f32 %v2850_v24, %v1919_v18 }
 0xe30   : > { %v1921_v22 = vmul.f32 0.5, %v1920_v34 }
 0xe32   : > { %v1922_v37 = vsub.f32 1.5, %v1921_v22 }
 0xe34   : > { %v1923_v20 = vmul.f32 %v2850_v24, %v1922_v37 }
 0xe36   : > { %v1927_v21 = vsel %vm1926_vm13, %v2850_v24, %v1923_v20 }
 0xe37   : > { %v1928_v23 = vmul.f32 %v1927_v21, %v1911_v60  ;;  %v2053_v60 = vpack.c.bf16 %v2711_v42, %v2710_v39 }
 0xe39   : > { %v1933_v25 = vpack.c.bf16 %v1928_v23, %v1928_v23  ;;  %2062 = vmatpush.bf16.msrb.mxu0 %v2053_v60 }
 0xe3b   : > { %2698 = vmatmul.msk.bf16.vlgmr.msra.gmra.mxu0 %vm906_vm1, %v1933_v25  ;;  %v2732_v25 = vld [vmem:[%s4058_s16 + $0x78] sm:$0xff] }
 0xe3d   : > { %2161 = vmatpush.bf16.msra.mxu0 %v2154_v57 }
 0xe41   : > { %2162 = vmatpush.bf16.msra.mxu0 %v2153_v17 }
 0xeb8   : > { %v1948_v27 = vpop.f32.mrf.mxu0 }
 0xeb9   : > { %v1952_v43 = vmax.f32 %v1948_v27, 0.0 }
 0xebb   : > { %v1961_v28 = vpack.c.bf16 %v1952_v43, %v1952_v43  ;;  %v2729_v43 = vld [vmem:[%s4058_s16 + $0x60] sm:$0xff] }
 0xebd   : > { %2699 = vmatmul.msk.bf16.vlgmr.msra.gmra.mxu1 %vm778_vm0, %v1961_v28  ;;  %v2730_v28 = vld [vmem:[%s4058_s16 + $0x68] sm:$0xff] }
 0xec0   : > { %v1950_v29 = vpop.f32.mrf.mxu0 }
 0xf3a   : > { %v1978_v46 = vpop.f32.mrf.mxu1 }
 0xf3b   : > { %v1979_v10 = vadd.f32 %v1978_v46, %v1928_v23  ;;  %v2731_v23 = vld [vmem:[%s4058_s16 + $0x70] sm:$0xff] }
 0xf3c   : > { %v2174_v27 = vpack.c.bf16 %v2732_v25, %v2731_v23 }
 0xf3d   : > { %v1982_v49 = vsel %vm1548_vm2, %v1979_v10, 0.0 }
 0xf3e   : > { %1983 = vadd.xlane.f32.xlu0 %v1982_v49 }
 0xf42   : > { %v1980_v11 = vpop.f32.mrf.mxu1 }
 0xfb1   : > { %v1984_v52 = vpop.xlane.xlu0 %1983 }
 0xfb2   : > { %v1985_v30 = vmul.f32 %v1984_v52, %v3608_v3 }
 0xfb4   : > { %v1986_v8 = vsub.f32 %v1979_v10, %v1985_v30  ;;  %v2173_v10 = vpack.c.bf16 %v2730_v28, %v2729_v43 }
 0xfb6   : > { %v1987_v9 = vmul.f32 %v1986_v8, %v1986_v8 }
 0xfb8   : > { %v1988_v33 = vsel %vm1548_vm2, %v1987_v9, 0.0 }
 0xfb9   : > { %1989 = vadd.xlane.f32.xlu1 %v1988_v33 }
0x102c   : > { %v1990_v59 = vpop.xlane.xlu1 %1989 }
0x102d   : > { %v1991_v61 = vmul.f32 %v1990_v59, %v3608_v3 }
0x102f   : > { %v1992_v2 = vadd.f32 1e-05, %v1991_v61 }
0x1031   : > { %2851 = vrsqrt.f32 %v1992_v2  ;;  %vm1999_vm15 = vweird.f32 %v1992_v2 }
0x1037   : > { %v2852_v12 = vpop.eup %2851 }
0x1038   : > { %v1994_v14 = vmul.f32 %v2852_v12, %v1992_v2  ;;  %vm2000_vm14 = vweird.f32 %v2852_v12 }
0x1039   : > { %vm2001_vm3 = vmor %vm1999_vm15, %vm2000_vm14 }
0x103a   : > { %v1995_v31 = vmul.f32 %v2852_v12, %v1994_v14 }
0x103c   : > { %v1996_v15 = vmul.f32 0.5, %v1995_v31 }
0x103e   : > { %v1997_v16 = vsub.f32 1.5, %v1996_v15 }
0x1040   : > { %v1998_v24 = vmul.f32 %v2852_v12, %v1997_v16 }
0x1042   : > { %v2002_v18 = vsel %vm2001_vm3, %v2852_v12, %v1998_v24 }
0x1043   : > { %v3858_v34 = vmul.f32 %v2002_v18, %v1986_v8 }
0x1045   : > { %v2009_v22 = vpack.c.bf16 %v3858_v34, %v3858_v34 }
0x1047   : > { %2704 = vmatmul.msk.bf16.vlgmr.msra.gmra.mxu3 %vm906_vm1, %v2009_v22  ;;  %2709 = vmatmul.msk.bf16.vlgmr.msra.gmra.mxu2 %vm906_vm1, %v2009_v22 }
0x1048   : > { %2714 = vmatmul.msk.bf16.vlgmr.msrb.gmra.mxu0 %vm906_vm1, %v2009_v22 }
0x1057   : > { %2723 = vmatmul.msk.bf16.vlgmr.msrb.gmra.mxu2 %vm906_vm1, %v2009_v22 }
0x1058   : > { %2728 = vmatmul.msk.bf16.vlgmr.msra.gmra.mxu0 %vm906_vm1, %v2009_v22 }
0x10c5   : > { %v2064_v37 = vpop.f32.mrf.mxu0 }
0x10c6   : > { %v2103_v20 = vpack.c.bf16 %v2064_v37, %v2064_v37  ;;  %v2737_v37 = vld [vmem:[%s4059_s17 + $0x30] sm:$0xff] }
0x10c8   : > { %v2108_v21 = vsel %vm1734_vm8, %v2103_v20, 0  ;;  %v2738_v20 = vld [vmem:[%s4059_s17 + $0x38] sm:$0xff] }
0x10c9   : > { %2117 = vmatpush.bf16.msrb.mxu3 %v2108_v21  ;;  %v2248_v21 = vpack.c.bf16 %v2738_v20, %v2737_v37 }
0x10ca   : > { %v2024_v19 = vpop.f32.mrf.mxu3  ;;  %v2044_v40 = vpop.f32.mrf.mxu2 }
0x10cb   : > { %v2069_v26 = vpack.c.bf16 %v2044_v40, %v2044_v40  ;;  %v2068_v52 = vpack.c.bf16 %v2024_v19, %v2024_v19  ;;  %2259 = vmatpush.bf16.msrb.mxu0 %v2248_v21 }
0x10cd   : > { %v2074_v29 = vsel %vm1101_vm4, %v2069_v26, 0  ;;  %v2066_v46 = vpop.f32.mrf.mxu0 }
0x10ce   : > { %2083 = vmatpush.bf16.xpose.msrb.mxu1 %v2074_v29 }
0x10d2   : > { %v2026_v49 = vpop.f32.mrf.mxu3  ;;  %v2046_v11 = vpop.f32.mrf.mxu2 }
0x10d5   : > { %v2164_v30 = vpop.f32.mrf.mxu0  ;;  %2715 = vmatmul.msk.bf16.vlgmr.msrb.gmra.mxu1 %vm1101_vm4, %v2068_v52  ;;  %v2743_v52 = vld [vmem:[%s4060_s18 + $0x30] sm:$0xff] }
0x10d6   : > { %2181 = vmatpush.bf16.msra.mxu1 %v2174_v27  ;;  %v2189_v8 = vpack.c.bf16 %v2164_v30, %v2164_v30 }
0x10d8   : > { %v2194_v9 = vsel %vm1101_vm4, %v2189_v8, 0  ;;  %v2741_v8 = vld [vmem:[%s4060_s18 + $0x20] sm:$0xff] }
0x10d9   : > { %2203 = vmatpush.bf16.xpose.msra.mxu3 %v2194_v9  ;;  %v2742_v9 = vld [vmem:[%s4060_s18 + $0x28] sm:$0xff] }
0x10da   : > { %2182 = vmatpush.bf16.msra.mxu1 %v2173_v10  ;;  %v2144_v33 = vpop.f32.mrf.mxu2 }
0x10db   : > { %v2188_v0 = vpack.c.bf16 %v2144_v33, %v2144_v33  ;;  %v2310_v33 = vpack.c.bf16 %v2742_v9, %v2741_v8 }
0x10dd   : > { %v2166_v6 = vpop.f32.mrf.mxu0 }
0x10de   : > { %2275 = vmatpush.bf16.msrb.mxu1 %v2127_v51  ;;  %v2752_v6 = vld [vmem:[%s4061_s19 + $0x70] sm:$0xff]  ;;  %v2747_v51 = vld [vmem:[%s4061_s19 + $0x48] sm:$0xff] }
0x10e2   : > { %v2146_v38 = vpop.f32.mrf.mxu2 }
0x10e3   : > { %v2753_v38 = vld [vmem:[%s4061_s19 + $0x78] sm:$0xff] }
0x10e5   : > { %2733 = vmatmul.msk.bf16.vlgmr.msra.gmra.mxu1 %vm906_vm1, %v2009_v22 }
0x1152   : > { %v2085_v4 = vpop.f32.mrf.mxu1 }
0x1153   : > { %v2089_v5 = vmul.f32 0.25, %v2085_v4  ;;  %v2750_v4 = vld [vmem:[%s4061_s19 + $0x60] sm:$0xff] }
0x1155   : > { %v2090_v32 = vsel %vm1716_vm9, %v2089_v5, -inf }
0x1156   : > { %2091 = vmax.xlane.f32.xlu2 %v2090_v32  ;;  %v2751_v32 = vld [vmem:[%s4061_s19 + $0x68] sm:$0xff] }
0x115a   : > { %v2087_v1 = vpop.f32.mrf.mxu1 }
0x115b   : > { %v2341_v1 = vpack.c.bf16 %v2751_v32, %v2750_v4 }
0x1162   : > { %v2184_v62 = vpop.f32.mrf.mxu1 }
0x1163   : > { %v2224_v63 = vpack.c.bf16 %v2184_v62, %v2184_v62  ;;  %v2748_v62 = vld [vmem:[%s4061_s19 + $0x50] sm:$0xff] }
0x1165   : > { %v2229_v35 = vsel %vm1734_vm8, %v2224_v63, 0  ;;  %v2749_v63 = vld [vmem:[%s4061_s19 + $0x58] sm:$0xff] }
0x1166   : > { %2238 = vmatpush.bf16.msra.mxu2 %v2229_v35 }
0x116a   : > { %v2186_v13 = vpop.f32.mrf.mxu1 }
0x11c9   : > { %v2092_v36 = vpop.xlane.xlu2 %2091 }
0x11ca   : > { %v2093_v41 = vsub.f32 %v2089_v5, %v2092_v36  ;;  %v2342_v5 = vpack.c.bf16 %v2753_v38, %v2752_v6  ;;  %v2340_v36 = vpack.c.bf16 %v2749_v63, %v2748_v62 }
0x11cc   : > { %v2094_v44 = vmul.f32 1.442695, %v2093_v41  ;;  %2350 = vmatpush.bf16.msrb.mxu2 %v2342_v5 }
0x11ce   : > { %2853 = vpow2.f32 %v2094_v44 }
0x11d0   : > { %2351 = vmatpush.bf16.msrb.mxu2 %v2341_v1 }
0x11d4   : > { %v2854_v45 = vpop.eup %2853  ;;  %2352 = vmatpush.bf16.msrb.mxu2 %v2340_v36 }
0x11d5   : > { %v2096_v39 = vsel %vm1716_vm9, %v2854_v45, 0.0 }
0x11d6   : > { %2097 = vadd.xlane.f32.xlu0 %v2096_v39 }
0x1249   : > { %v2098_v42 = vpop.xlane.xlu0 %2097 }
0x124a   : > { %2855 = vrcp.f32 %v2098_v42 }
0x1250   : > { %v2856_v53 = vpop.eup %2855 }
0x1251   : > { %v2100_v60 = vmul.f32 %v2856_v53, %v2854_v45 }
0x1253   : > { %v2102_v48 = vpack.c.bf16 %v2100_v60, %v2100_v60  ;;  %2101 = vst.msk [vmem:[%s3888_s27] sm:$0xf] %vm1716_vm9, %v2100_v60 }
0x1255   : > { %2716 = vmatmul.msk.bf16.vlgmr.msrb.gmra.mxu3 %vm1730_vm10, %v2102_v48 }
0x1265   : > { %2734 = vmatmul.msk.bf16.vlgmr.msra.gmra.mxu3 %vm1101_vm4, %v2188_v0 }
0x12d8   : > { %v2119_v54 = vpop.f32.mrf.mxu3 }
0x12d9   : > { %v2126_v55 = vpack.c.bf16 %v2119_v54, %v2119_v54  ;;  %v2339_v54 = vpack.c.bf16 %v2747_v51, %v2746_v7 }
0x12db   : > { %2740 = vmatmul.msk.bf16.vlgmr.msrb.gmra.mxu1 %vm1101_vm4, %v2126_v55  ;;  %2353 = vmatpush.bf16.msrb.mxu2 %v2339_v54 }
0x12e0   : > { %v2121_v57 = vpop.f32.mrf.mxu3 }
0x12e8   : > { %v2205_v47 = vpop.f32.mrf.mxu3 }
0x12e9   : > { %v2209_v56 = vmul.f32 0.25, %v2205_v47 }
0x12eb   : > { %v2210_v58 = vsel %vm1716_vm9, %v2209_v56, -inf }
0x12ec   : > { %2211 = vmax.xlane.f32.xlu1 %v2210_v58 }
0x12f0   : > { %v2207_v59 = vpop.f32.mrf.mxu3 }
0x1358   : > { %v2277_v17 = vpop.f32.mrf.mxu1 }
0x135f   : > { %v2212_v61 = vpop.xlane.xlu1 %2211 }
0x1360   : > { %v2213_v2 = vsub.f32 %v2209_v56, %v2212_v61  ;;  %v2279_v12 = vpop.f32.mrf.mxu1 }
0x1362   : > { %v2214_v14 = vmul.f32 1.442695, %v2213_v2 }
0x1364   : > { %2857 = vpow2.f32 %v2214_v14 }
0x136a   : > { %v2858_v31 = vpop.eup %2857 }
0x136b   : > { %v2216_v15 = vsel %vm1716_vm9, %v2858_v31, 0.0 }
0x136c   : > { %2217 = vadd.xlane.f32.xlu2 %v2216_v15 }
0x13df   : > { %v2218_v16 = vpop.xlane.xlu2 %2217 }
0x13e0   : > { %2859 = vrcp.f32 %v2218_v16 }
0x13e6   : > { %v2860_v24 = vpop.eup %2859 }
0x13e7   : > { %v2220_v18 = vmul.f32 %v2860_v24, %v2858_v31 }
0x13e9   : > { %v2223_v22 = vpack.c.bf16 %v2220_v18, %v2220_v18  ;;  %2735 = vst.msk [vmem:[%s3888_s27 + $0x4] sm:$0xf] %vm1716_vm9, %v2220_v18 }
0x13eb   : > { %2736 = vmatmul.msk.bf16.vlgmr.msra.gmra.mxu2 %vm1730_vm10, %v2223_v22 }
0x146e   : > { %v2240_v23 = vpop.f32.mrf.mxu2 }
0x146f   : > { %v2247_v25 = vpack.c.bf16 %v2240_v23, %v2240_v23 }
0x1471   : > { %2739 = vmatmul.msk.bf16.vlgmr.msrb.gmra.mxu0 %vm1101_vm4, %v2247_v25 }
0x1476   : > { %v2242_v19 = vpop.f32.mrf.mxu2 }
0x14ee   : > { %v2261_v40 = vpop.f32.mrf.mxu0 }
0x14ef   : > { %v2278_v26 = vadd.f32 %v2277_v17, %v2261_v40 }
0x14f1   : > { %v2281_v27 = vadd.f32 %v2278_v26, %v3858_v34  ;;  %v2744_v34 = vld [vmem:[%s4060_s18 + $0x38] sm:$0xff] }
0x14f2   : > { %v2311_v30 = vpack.c.bf16 %v2744_v34, %v2743_v52 }
0x14f3   : > { %v2282_v43 = vsel %vm1548_vm2, %v2281_v27, 0.0 }
0x14f4   : > { %2283 = vadd.xlane.f32.xlu0 %v2282_v43  ;;  %2321 = vmatpush.bf16.msrb.mxu3 %v2311_v30 }
0x14f6   : > { %v2263_v28 = vpop.f32.mrf.mxu0 }
0x14f8   : > { %2322 = vmatpush.bf16.msrb.mxu3 %v2310_v33 }
0x1567   : > { %v2284_v29 = vpop.xlane.xlu0 %2283 }
0x1568   : > { %v2285_v46 = vmul.f32 %v2284_v29, %v3608_v3 }
0x156a   : > { %v2286_v10 = vsub.f32 %v2281_v27, %v2285_v46 }
0x156c   : > { %v2287_v49 = vmul.f32 %v2286_v10, %v2286_v10 }
0x156e   : > { %v2288_v11 = vsel %vm1548_vm2, %v2287_v49, 0.0 }
0x156f   : > { %2289 = vadd.xlane.f32.xlu1 %v2288_v11 }
0x15e2   : > { %v2290_v35 = vpop.xlane.xlu1 %2289 }
0x15e3   : > { %v2291_v13 = vmul.f32 %v2290_v35, %v3608_v3 }
0x15e5   : > { %v2292_v41 = vadd.f32 1e-05, %v2291_v13 }
0x15e7   : > { %2861 = vrsqrt.f32 %v2292_v41  ;;  %vm2299_vm5 = vweird.f32 %v2292_v41 }
0x15ed   : > { %v2862_v44 = vpop.eup %2861 }
0x15ee   : > { %v2294_v45 = vmul.f32 %v2862_v44, %v2292_v41  ;;  %vm2300_vm4 = vweird.f32 %v2862_v44 }
0x15ef   : > { %vm2301_vm6 = vmor %vm2299_vm5, %vm2300_vm4 }
0x15f0   : > { %v2295_v39 = vmul.f32 %v2862_v44, %v2294_v45 }
0x15f2   : > { %v2296_v42 = vmul.f32 0.5, %v2295_v39 }
0x15f4   : > { %v2297_v53 = vsub.f32 1.5, %v2296_v42 }
0x15f6   : > { %v2298_v60 = vmul.f32 %v2862_v44, %v2297_v53 }
0x15f8   : > { %v2302_v48 = vsel %vm2301_vm6, %v2862_v44, %v2298_v60 }
0x15f9   : > { %v2303_v0 = vmul.f32 %v2302_v48, %v2286_v10 }
0x15fb   : > { %v2309_v50 = vpack.c.bf16 %v2303_v0, %v2303_v0 }
0x15fd   : > { %2745 = vmatmul.msk.bf16.vlgmr.msrb.gmra.mxu3 %vm906_vm1, %v2309_v50 }
0x1680   : > { %v2324_v55 = vpop.f32.mrf.mxu3 }
0x1681   : > { %v2328_v57 = vmax.f32 %v2324_v55, 0.0 }
0x1683   : > { %v2338_v47 = vpack.c.bf16 %v2328_v57, %v2328_v57 }
0x1685   : > { %2754 = vmatmul.msk.bf16.vlgmr.msrb.gmra.mxu2 %vm778_vm0, %v2338_v47 }
0x1688   : > { %v2326_v56 = vpop.f32.mrf.mxu3 }
0x1708   : > { %v2355_v58 = vpop.f32.mrf.mxu2 }
0x1709   : > { %v2356_v59 = vadd.f32 %v2355_v58, %v2303_v0 }
0x170b   : > { %v2359_v17 = vsel %vm1548_vm2, %v2356_v59, 0.0 }
0x170c   : > { %2360 = vadd.xlane.f32.xlu2 %v2359_v17 }
0x1710   : > { %v2357_v61 = vpop.f32.mrf.mxu2 }
0x177f   : > { %v2361_v2 = vpop.xlane.xlu2 %2360 }
0x1780   : > { %v2362_v12 = vmul.f32 %v2361_v2, %v3608_v3 }
0x1782   : > { %v2363_v14 = vsub.f32 %v2356_v59, %v2362_v12 }
0x1784   : > { %v2364_v31 = vmul.f32 %v2363_v14, %v2363_v14 }
0x1786   : > { %v2365_v15 = vsel %vm1548_vm2, %v2364_v31, 0.0 }
0x1787   : > { %2366 = vadd.xlane.f32.xlu0 %v2365_v15 }
0x1788   : > { %2892 = shalt.err (!%p2889_p3)
}
0x1789   : > { %2767 = dma.vmem_to_hbm [thread:$0]  (%p3148_p5), %s2406_s29, 64, %s2408_s26, %s2383_s21  }
0x178a   : > { %s2765_s8 = sshll.u32 %s3129_s4, 3  ;;  %s4122_s11 = sld [smem:[#allocation30_spill]] }
0x178b   : > { %s2387_s22 = sand.u32 1, %s3129_s4   ;;  %s4123_s29 = sld [smem:[#allocation31_spill]] }
0x178c   : > { %s4125_s1 = sshll.u32 %s3687_s2, 2  ;;  %s2433_s13 = sshll.u32 %s3888_s27, 4  ;;  %s3991_s13 = int_to_ptr.vmem [resolvable:$true] %s2433_s13 }
0x178d   : > { %s715_s0 = scalar_lea.vmem [#allocation4], %s4125_s1  ;;  %s3996_s4 = scalar_lea.sflag [#allocation5], %s2387_s22 }
0x178e   : > { %s2419_s7 = sshll.u32 %s715_s0, 4  ;;  %s2420_s7 = int_to_ptr.vmem [resolvable:$true] %s2419_s7 }
0x1790   : > { %s2417_s3 = scalar_lea.hbm %s4122_s11, %s2758_s5  ;;  %s2913_s9 = scalar_lea.hbm %s4122_s11, 8 }
0x1791   : > { %s4124_s26 = smov %s4123_s29  ;;  %s2432_s21 = scalar_lea.hbm %s4123_s29, %s2765_s8 }
0x1792   : > { %s2421_s12 = sshll.u32 %s2417_s3, 4  ;;  %s2435_s14 = sshll.u32 %s2432_s21, 4  ;;  %s2422_s12 = int_to_ptr.hbm [resolvable:$true] %s2421_s12  ;;  %s3993_s14 = int_to_ptr.hbm [resolvable:$true] %s2435_s14 }
0x1793   : > { %s2907_s2 = sshra.s32 %s2422_s12, 4  ;;  %s2908_s2 = int_to_ptr.hbm [resolvable:$true] %s2907_s2 }
0x1794   : > { %s2909_s5 = scalar_lea.hbm %s2908_s2, 4  ;;  %p2914_p9 = scmp.lt.s32.totalorder %s2908_s2, %s4122_s11 }
0x1795   : > { %p2910_p4 = scmp.ne.s32.totalorder %s2908_s2, %s2909_s5  ;;  %p2915_p10 = scmp.lt.s32.totalorder %s2913_s9, %s2909_s5 }
0x1797   : > { %p2911_p7 = pnand %p2910_p4, %p3148_p5  ;;  %p2916_p11 = por %p2915_p10, %p2914_p9 }
0x1799   : > { %p2912_p8 = pneg %p2911_p7 }
0x179b   : > { %p2917_p12 = pnand %p2916_p11, %p2912_p8 }
0x17fa   : > { %v2367_v16 = vpop.xlane.xlu0 %2366 }
0x17fb   : > { %v2368_v24 = vmul.f32 %v2367_v16, %v3608_v3 }
0x17fd   : > { %v2369_v18 = vadd.f32 1e-05, %v2368_v24 }
0x17ff   : > { %2863 = vrsqrt.f32 %v2369_v18  ;;  %vm2376_vm1 = vweird.f32 %v2369_v18 }
0x1805   : > { %v2864_v22 = vpop.eup %2863 }
0x1806   : > { %v2371_v37 = vmul.f32 %v2864_v22, %v2369_v18  ;;  %vm2377_vm0 = vweird.f32 %v2864_v22 }
0x1807   : > { %vm2378_vm7 = vmor %vm2376_vm1, %vm2377_vm0 }
0x1808   : > { %v2372_v20 = vmul.f32 %v2864_v22, %v2371_v37 }
0x180a   : > { %v2373_v21 = vmul.f32 0.5, %v2372_v20 }
0x180c   : > { %v2374_v23 = vsub.f32 1.5, %v2373_v21 }
0x180e   : > { %v2375_v3 = vmul.f32 %v2864_v22, %v2374_v23 }
0x1810   : > { %v2379_v25 = vsel %vm2378_vm7, %v2864_v22, %v2375_v3 }
0x1811   : > { %v2380_v19 = vmul.f32 %v2379_v25, %v2363_v14 }
0x1813   : > { %2381 = vst.msk [vmem:[%s715_s0] sm:$0xf] %vm1548_vm2, %v2380_v19 }
0x1814   : > { %2920 = shalt.err (!%p2917_p12)
}
0x1815   : > { %2768 = dma.vmem_to_hbm [thread:$0]  (%p3148_p5), %s2420_s7, 64, %s2422_s12, %s3996_s4  }
0x1816   : > { %s2935_s22 = sshra.s32 %s3993_s14, 4  ;;  %s2941_s21 = scalar_lea.hbm %s4124_s26, 16  ;;  %s2936_s22 = int_to_ptr.hbm [resolvable:$true] %s2935_s22 }
0x1817   : > { %s2937_s30 = scalar_lea.hbm %s2936_s22, 8  ;;  %p2942_p2 = scmp.lt.s32.totalorder %s2936_s22, %s4124_s26 }
0x1818   : > { %p2938_p13 = scmp.ne.s32.totalorder %s2936_s22, %s2937_s30  ;;  %p2943_p3 = scmp.lt.s32.totalorder %s2941_s21, %s2937_s30 }
0x181a   : > { %p2939_p0 = pnand %p2938_p13, %p3148_p5  ;;  %p2944_p4 = por %p2943_p3, %p2942_p2 }
0x181c   : > { %p2940_p1 = pneg %p2939_p0 }
0x181e   : > { %p2945_p7 = pnand %p2944_p4, %p2940_p1 }
0x1820   : > { %2948 = shalt.err (!%p2945_p7)
}
0x1821   : > { %s2991_s12 = smov 64   ;;  %s2992_s7 = smov 4  }
0x1822   : > { %2769 = dma.vmem_to_hbm [thread:$0]  (%p3148_p5), %s3991_s13, 128, %s3993_s14, %s3996_s4, %s2991_s12, %s2991_s12, %s2992_s7  }
0x1823 PF: > { %s4126_s2 = sld [smem:[#allocation11_spill]] }
0x1824   : > { %s4127_s5 = sld [smem:[#allocation9_spill]] }
0x1829   : > { %p2783_p8 = scmp.ge.s32.totalorder %s4126_s2, 2 }
0x182a   : > { %s2450_s8 = sand.u32 1, %s4127_s5  }
0x182b   : > { %p2774_p9 = pnand %p2783_p8, %p3152_p6  ;;  %s2451_s9 = scalar_lea.sflag [#allocation3], %s2450_s8 }
0x182d   : > { %p2775_p10 = pneg %p2774_p9 }
0x182f   : > { %2966 = dma.done.wait (%p2775_p10), %s2451_s9, 64  }
0x1830   : > { %2968 = vsyncadd (%p2775_p10), %s2451_s9, 4294967232  ;;  %s4129_s10 = sadd.s32 4294967294, %s4126_s2  }
0x1831   : > { %s2460_s3 = sand.u32 1, %s4129_s10  }
0x1832   : > { %s2461_s22 = scalar_lea.sflag [#allocation5], %s2460_s3 }
0x1833   : > { %2970 = dma.done.wait (%p2775_p10), %s2461_s22, 192  }
0x1834   : > { %2972 = vsyncadd (%p2775_p10), %s2461_s22, 4294967104  ;;  %s4130_s30 = sld [smem:[#allocation12_spill]]  ;;  %s4133_s3 = smov %s2979_s28 }
0x1835   : > { %s4131_s13 = sld [smem:[#allocation10_spill]] }
0x1836   : > { %s4132_s29 = sld [smem:[#allocation13_spill]] }
0x183a   : > { %p36_p5 = scmp.ge.s32.totalorder %s4130_s30, 4  }
0x183b   : > { %s4134_s28 = smov %s4131_s13 }
0x183c   :  { %38 = sbr.rel (!%p36_p5) target bundleno = 23 (0x17), region = 193 }
0x1841   :  { %2477 = vsyncpa [#allocation3], 1 }
0x1842   :  { %2479 = vsyncpa [#allocation3 + $0x1], 1 }
0x1843   :  { %2480 = vsyncpa [#allocation5], 1 }
0x1844   :  { %2482 = vsyncpa [#allocation5 + $0x1], 1 }

</bundles_post_ra>
